<compile_context>
chip_gen: v6e
topology: v6e:2x2x1
jax: 0.10.0
libtpu: 0.0.40
codegen_flags: <defaults>
</compile_context>

<pallas_src>
import functools

import jax
import jax.numpy as jnp
from jax.experimental import pallas as pl
from jax.experimental.pallas import tpu as pltpu


# ----------------------------------------------------------------------------
# Pallas kernel: one grid step = one time chunk, BOTH directions.
#   gxf_ref : (tT, B, 4H)  forward  pre-projected gates, chunk k (natural order)
#   gxb_ref : (tT, B, 4H)  backward pre-projected gates, chunk nT-1-k
#   whf_ref : (H, 4H)      forward  recurrent weights (transposed, [i,f,g,o])
#   whb_ref : (H, 4H)      backward recurrent weights
#   yf_ref  : (tT, B, H)   forward  hidden states, chunk k
#   yb_ref  : (tT, B, H)   backward hidden states, chunk nT-1-k (natural order)
#   state_ref: (4, B, H) f32 persistent scratch = (h_f, c_f, h_b, c_b)
# ----------------------------------------------------------------------------
def _bidi_lstm_kernel(gxf_ref, gxb_ref, whf_ref, whb_ref,
                      yf_ref, yb_ref, state_ref, *, tT, H, unroll):
    k = pl.program_id(0)

    @pl.when(k == 0)
    def _init():
        state_ref[...] = jnp.zeros_like(state_ref)

    # Loop-invariant recurrent weights, hoisted (stay in compute dtype for MXU).
    whf = whf_ref[...]
    whb = whb_ref[...]

    def lstm_cell(gates, c):
        # PyTorch gate order [i, f, g, o]; nonlinearities / state kept in f32.
        i = jax.nn.sigmoid(gates[:, 0:H])
        f = jax.nn.sigmoid(gates[:, H:2 * H])
        g = jnp.tanh(gates[:, 2 * H:3 * H])
        o = jax.nn.sigmoid(gates[:, 3 * H:4 * H])
        c_new = f * c + i * g
        h_new = o * jnp.tanh(c_new)
        return h_new, c_new

    def step(s, carry):
        hf, cf, hb, cb = carry

        # ---- forward direction: local time s (global k*tT + s) ----
        gf = gxf_ref[s].astype(jnp.float32) + jnp.dot(
            hf.astype(whf.dtype), whf, preferred_element_type=jnp.float32)
        hf, cf = lstm_cell(gf, cf)
        yf_ref[s] = hf.astype(yf_ref.dtype)

        # ---- backward direction: local time tT-1-s (chunk arrives reversed) ----
        tb = tT - 1 - s
        gb = gxb_ref[tb].astype(jnp.float32) + jnp.dot(
            hb.astype(whb.dtype), whb, preferred_element_type=jnp.float32)
        hb, cb = lstm_cell(gb, cb)
        yb_ref[tb] = hb.astype(yb_ref.dtype)

        return (hf, cf, hb, cb)

    carry0 = (state_ref[0], state_ref[1], state_ref[2], state_ref[3])
    hf, cf, hb, cb = jax.lax.fori_loop(0, tT, step, carry0, unroll=unroll)
    state_ref[0] = hf
    state_ref[1] = cf
    state_ref[2] = hb
    state_ref[3] = cb


def _pick_time_tile(T, B, H, in_itemsize, out_itemsize, budget_bytes=8 << 20):
    """Largest divisor of T whose double-buffered chunk footprint fits budget."""
    per_t = 2 * 2 * B * (4 * H * in_itemsize + H * out_itemsize)  # dirs x bufs
    best = 1
    for tT in range(1, T + 1):
        if T % tT == 0 and tT * per_t <= budget_bytes:
            best = tT
    return best


def _bidi_lstm_layer(gx_f, gx_b, whh_f, whh_b, out_dtype):
    """gx_*: (T, B, 4H), whh_*: (H, 4H). Returns (y_f, y_b), each (T, B, H)."""
    T, B, G = gx_f.shape
    H = G // 4
    in_item = jnp.dtype(gx_f.dtype).itemsize
    out_item = jnp.dtype(out_dtype).itemsize

    tT = _pick_time_tile(T, B, H, in_item, out_item)
    nT = T // tT
    unroll = True if tT <= 8 else 8   # full unroll only for small chunks

    # VMEM footprint: double-buffered gx/y chunks + weights + state scratch.
    vmem_est = (2 * 2 * tT * B * 4 * H * in_item
                + 2 * 2 * tT * B * H * out_item
                + 2 * 2 * H * 4 * H * in_item
                + 4 * B * H * 4)
    vmem_limit = int(min(max(32 << 20, 2 * vmem_est), 64 << 20))

    cost = pl.CostEstimate(
        flops=2 * 2 * T * B * H * 4 * H,              # 2 dirs, 2*M*K*N per step
        transcendentals=2 * T * B * 5 * H,            # 3 sigmoid + 2 tanh
        bytes_accessed=(2 * T * B * 4 * H * in_item
                        + 2 * T * B * H * out_item
                        + 2 * H * 4 * H * in_item))

    kernel = functools.partial(_bidi_lstm_kernel, tT=tT, H=H, unroll=unroll)

    y_f, y_b = pl.pallas_call(
        kernel,
        out_shape=(jax.ShapeDtypeStruct((T, B, H), out_dtype),
                   jax.ShapeDtypeStruct((T, B, H), out_dtype)),
        grid=(nT,),
        in_specs=[
            pl.BlockSpec((tT, B, G), lambda k: (k, 0, 0)),            # fwd gx
            pl.BlockSpec((tT, B, G), lambda k: (nT - 1 - k, 0, 0)),   # bwd gx
            pl.BlockSpec((H, G), lambda k: (0, 0)),                   # fwd W_hh
            pl.BlockSpec((H, G), lambda k: (0, 0)),                   # bwd W_hh
        ],
        out_specs=(
            pl.BlockSpec((tT, B, H), lambda k: (k, 0, 0)),            # fwd y
            pl.BlockSpec((tT, B, H), lambda k: (nT - 1 - k, 0, 0)),   # bwd y
        ),
        scratch_shapes=[pltpu.VMEM((4, B, H), jnp.float32)],          # h/c state
        compiler_params=pltpu.CompilerParams(
            dimension_semantics=("arbitrary",),       # sequential recurrence
            vmem_limit_bytes=vmem_limit),
        cost_estimate=cost,
    )(gx_f, gx_b, whh_f, whh_b)
    return y_f, y_b


# ----------------------------------------------------------------------------
# Full module forward: bidirectional, multi-layer, zero initial state.
# ----------------------------------------------------------------------------
def rnn_decoder_bidi_forward(x, params, num_layers, output_dim,
                             compute_dtype=jnp.bfloat16):
    """x: (B, T, 2*hidden_dim), batch_first. Returns (B, T, output_dim) f32."""
    del num_layers, output_dim  # shapes come from params
    cd = compute_dtype
    x_tbd = jnp.transpose(x, (1, 0, 2))                 # (T, B, D)

    y_f = y_b = None
    for layer, p in enumerate(params):
        bias_f = p["bias"][0].astype(jnp.float32)       # (4H,)
        bias_b = p["bias"][1].astype(jnp.float32)
        if layer == 0:
            xin = x_tbd.astype(cd)
            w = p["w_in"].astype(cd)                    # (2, D, 4H)
            gf = jnp.einsum("tbd,dg->tbg", xin, w[0],
                            preferred_element_type=jnp.float32) + bias_f
            gb = jnp.einsum("tbd,dg->tbg", xin, w[1],
                            preferred_element_type=jnp.float32) + bias_b
        else:
            # consume (y_f, y_b) directly with split weights -> no concatenate
            w = p["w_in"].astype(cd)                    # (2_out, 2_in, H, 4H)
            gf = (jnp.einsum("tbh,hg->tbg", y_f, w[0, 0],
                             preferred_element_type=jnp.float32)
                  + jnp.einsum("tbh,hg->tbg", y_b, w[0, 1],
                               preferred_element_type=jnp.float32) + bias_f)
            gb = (jnp.einsum("tbh,hg->tbg", y_f, w[1, 0],
                             preferred_element_type=jnp.float32)
                  + jnp.einsum("tbh,hg->tbg", y_b, w[1, 1],
                               preferred_element_type=jnp.float32) + bias_b)
        y_f, y_b = _bidi_lstm_layer(gf.astype(cd), gb.astype(cd),
                                    p["w_hh"][0].astype(cd),
                                    p["w_hh"][1].astype(cd),
                                    out_dtype=cd)
        # TODO(synk): inter-layer dropout (training-only) omitted (inference).

    out = (y_f.astype(jnp.float32) + y_b.astype(jnp.float32)) * 0.5  # (T, B, H)
    return jnp.transpose(out, (1, 0, 2))                             # (B, T, H)


# ----------------------------------------------------------------------------
# Pure-JAX reference (lax.scan, f32) used only for correctness checking.
# ----------------------------------------------------------------------------
def _ref_direction(x_tbd, w_ih_t, w_hh_t, bias, H):
    B = x_tbd.shape[1]

    def step(carry, x_t):
        h, c = carry
        gates = x_t @ w_ih_t + h @ w_hh_t + bias
        i = jax.nn.sigmoid(gates[:, :H])
        f = jax.nn.sigmoid(gates[:, H:2 * H])
        g = jnp.tanh(gates[:, 2 * H:3 * H])
        o = jax.nn.sigmoid(gates[:, 3 * H:])
        c = f * c + i * g
        h = o * jnp.tanh(c)
        return (h, c), h

    init = (jnp.zeros((B, H), jnp.float32), jnp.zeros((B, H), jnp.float32))
    _, ys = jax.lax.scan(step, init, x_tbd)
    return ys


def _ref_forward(x, params, num_layers, output_dim):
    H = output_dim
    layer_in = jnp.transpose(x, (1, 0, 2)).astype(jnp.float32)
    for layer in range(num_layers):
        p = params[layer]
        w_in = p["w_in"]
        if layer > 0:
            w_in = w_in.reshape(2, 2 * H, 4 * H)
        y_f = _ref_direction(layer_in, w_in[0], p["w_hh"][0], p["bias"][0], H)
        y_b = _ref_direction(layer_in[::-1], w_in[1], p["w_hh"][1],
                             p["bias"][1], H)[::-1]
        layer_in = jnp.concatenate([y_f, y_b], axis=-1)
    out = (layer_in[..., :H] + layer_in[..., H:]) / 2.0
    return jnp.transpose(out, (1, 0, 2))


# ----------------------------------------------------------------------------
# Deterministic parameter init (matches nn.LSTM uniform(-1/sqrt(H), 1/sqrt(H))).
# Stored pre-transposed / split per direction for the fused kernel.
# ----------------------------------------------------------------------------
def init_params(key, hidden_dim, output_dim, num_layers):
    H = output_dim
    bound = 1.0 / jnp.sqrt(jnp.float32(H))
    params = []
    for layer in range(num_layers):
        d_in = 2 * hidden_dim if layer == 0 else 2 * H
        key, k1, k2, k3, k4 = jax.random.split(key, 5)
        w_ih = jax.random.uniform(k1, (2, 4 * H, d_in), jnp.float32,
                                  -bound, bound)
        w_hh = jax.random.uniform(k2, (2, 4 * H, H), jnp.float32,
                                  -bound, bound)
        b_ih = jax.random.uniform(k3, (2, 4 * H), jnp.float32, -bound, bound)
        b_hh = jax.random.uniform(k4, (2, 4 * H), jnp.float32, -bound, bound)

        w_in = jnp.transpose(w_ih, (0, 2, 1))            # (2, d_in, 4H)
        if layer > 0:
            # split rows by input direction: (2_out_dir, 2_in_dir, H, 4H)
            w_in = w_in.reshape(2, 2, H, 4 * H)
        params.append({
            "w_in": w_in,
            "w_hh": jnp.transpose(w_hh, (0, 2, 1)),      # (2, H, 4H)
            "bias": b_ih + b_hh,                         # (2, 4H)
        })
    return params


if __name__ == "__main__":
    # Tile-aligned small shapes: B=8 (f32 sublane), H=128 (lane), input dim 128.
    hidden_dim, output_dim, num_layers = 64, 128, 2
    B, T = 8, 8

    key = jax.random.PRNGKey(0)
    kx, kp = jax.random.split(key)
    x = jax.random.normal(kx, (B, T, hidden_dim * 2), jnp.float32)
    params = init_params(kp, hidden_dim, output_dim, num_layers)

    ref = jax.block_until_ready(_ref_forward(x, params, num_layers, output_dim))

    fwd = jax.jit(rnn_decoder_bidi_forward, static_argnums=(2, 3, 4))

    # Exact f32 path: tight check against the lax.scan reference.
    out_f32 = jax.block_until_ready(
        fwd(x, params, num_layers, output_dim, jnp.float32))
    assert out_f32.shape == (B, T, output_dim)
    assert jnp.allclose(out_f32, ref, atol=1e-4, rtol=1e-4), \
        "f32 kernel mismatch vs reference"

    # bf16 production path (bf16 MXU operands, f32 accumulation/state):
    # looser tolerance since rounding compounds over T and layers.
    out_bf16 = jax.block_until_ready(
        fwd(x, params, num_layers, output_dim, jnp.bfloat16))
    assert out_bf16.shape == (B, T, output_dim)
    assert jnp.allclose(out_bf16, ref, atol=5e-2, rtol=5e-2), \
        "bf16 kernel mismatch vs reference"

    print("KERNEL_OK")
</pallas_src>

<mosaic_0001>
module attributes {stable_mosaic.version = 11 : i64} {
  func.func @_bidi_lstm_kernel(%arg0: i32, %arg1: memref<8x8x512xf32, #tpu.memory_space<vmem>>, %arg2: memref<8x8x512xf32, #tpu.memory_space<vmem>>, %arg3: memref<128x512xf32, #tpu.memory_space<vmem>>, %arg4: memref<128x512xf32, #tpu.memory_space<vmem>>, %arg5: memref<8x8x128xf32, #tpu.memory_space<vmem>>, %arg6: memref<8x8x128xf32, #tpu.memory_space<vmem>>, %arg7: memref<4x8x128xf32, #tpu.memory_space<vmem>>) attributes {dimension_semantics = [#tpu.dimension_semantics<arbitrary>], iteration_bounds = array<i64: 1>, scalar_prefetch = 0 : i64, scratch_operands = 1 : i64, tpu.core_type = #tpu.core_type<tc>, window_params = [{transform_indices = @transform_0, window_bounds = array<i64: 8, 8, 512>}, {transform_indices = @transform_1, window_bounds = array<i64: 8, 8, 512>}, {pipeline_mode = #tpu.pipeline_mode<synchronous>, transform_indices = @transform_2, window_bounds = array<i64: 128, 512>}, {pipeline_mode = #tpu.pipeline_mode<synchronous>, transform_indices = @transform_3, window_bounds = array<i64: 128, 512>}, {transform_indices = @transform_4, window_bounds = array<i64: 8, 8, 128>}, {transform_indices = @transform_5, window_bounds = array<i64: 8, 8, 128>}]} {
    %c0_i32 = arith.constant 0 : i32
    %0 = arith.cmpi eq, %arg0, %c0_i32 : i32
    %1 = arith.extui %0 : i1 to i32
    %c0_i32_0 = arith.constant 0 : i32
    %2 = arith.cmpi ne, %1, %c0_i32_0 : i32
    scf.if %2 {
      %cst_161 = arith.constant 0.000000e+00 : f32
      %577 = vector.broadcast %cst_161 : f32 to vector<4x8x128xf32>
      %c0_162 = arith.constant 0 : index
      %c0_163 = arith.constant 0 : index
      %c0_164 = arith.constant 0 : index
      %578 = vector.load %arg7[%c0_162, %c0_163, %c0_164] : memref<4x8x128xf32, #tpu.memory_space<vmem>>, vector<4x8x128xf32>
      tpu.vector_store %arg7[%c0_162, %c0_163, %c0_164], %577 {strides = array<i32>} : memref<4x8x128xf32, #tpu.memory_space<vmem>>, vector<4x8x128xf32>,
    } else {
    }
    %c0 = arith.constant 0 : index
    %c0_1 = arith.constant 0 : index
    %3 = vector.load %arg3[%c0, %c0_1] : memref<128x512xf32, #tpu.memory_space<vmem>>, vector<128x512xf32>
    %c0_2 = arith.constant 0 : index
    %c0_3 = arith.constant 0 : index
    %4 = vector.load %arg4[%c0_2, %c0_3] : memref<128x512xf32, #tpu.memory_space<vmem>>, vector<128x512xf32>
    %c0_4 = arith.constant 0 : index
    %c0_5 = arith.constant 0 : index
    %c0_6 = arith.constant 0 : index
    %5 = vector.load %arg7[%c0_4, %c0_5, %c0_6] : memref<4x8x128xf32, #tpu.memory_space<vmem>>, vector<1x8x128xf32>
    %6 = vector.shape_cast %5 : vector<1x8x128xf32> to vector<8x128xf32>
    %c1 = arith.constant 1 : index
    %c0_7 = arith.constant 0 : index
    %c0_8 = arith.constant 0 : index
    %7 = vector.load %arg7[%c1, %c0_7, %c0_8] : memref<4x8x128xf32, #tpu.memory_space<vmem>>, vector<1x8x128xf32>
    %8 = vector.shape_cast %7 : vector<1x8x128xf32> to vector<8x128xf32>
    %c2 = arith.constant 2 : index
    %c0_9 = arith.constant 0 : index
    %c0_10 = arith.constant 0 : index
    %9 = vector.load %arg7[%c2, %c0_9, %c0_10] : memref<4x8x128xf32, #tpu.memory_space<vmem>>, vector<1x8x128xf32>
    %10 = vector.shape_cast %9 : vector<1x8x128xf32> to vector<8x128xf32>
    %c3 = arith.constant 3 : index
    %c0_11 = arith.constant 0 : index
    %c0_12 = arith.constant 0 : index
    %11 = vector.load %arg7[%c3, %c0_11, %c0_12] : memref<4x8x128xf32, #tpu.memory_space<vmem>>, vector<1x8x128xf32>
    %12 = vector.shape_cast %11 : vector<1x8x128xf32> to vector<8x128xf32>
    %c0_i32_13 = arith.constant 0 : i32
    %13 = arith.index_cast %c0_i32_13 : i32 to index
    %c0_14 = arith.constant 0 : index
    %c0_15 = arith.constant 0 : index
    %14 = vector.load %arg1[%13, %c0_14, %c0_15] : memref<8x8x512xf32, #tpu.memory_space<vmem>>, vector<1x8x512xf32>
    %15 = vector.shape_cast %14 : vector<1x8x512xf32> to vector<8x512xf32>
    %cst = arith.constant dense<0.000000e+00> : vector<8x512xf32>
    %16 = tpu.matmul %6, %3, %cst {dimension_numbers = #tpu.dot_dimension_numbers<[1], [0], [0], [1], [0, 0, 1, 1], [], []>} : vector<8x128xf32>, vector<128x512xf32>, vector<8x512xf32> -> vector<8x512xf32>
    %17 = arith.addf %15, %16 : vector<8x512xf32>
    %18 = vector.extract_strided_slice %17 {offsets = [0, 0], sizes = [8, 128], strides = [1, 1]} : vector<8x512xf32> to vector<8x128xf32>
    %19 = arith.negf %18 : vector<8x128xf32>
    %20 = math.exp %19 : vector<8x128xf32>
    %cst_16 = arith.constant 1.000000e+00 : f32
    %21 = vector.broadcast %cst_16 : f32 to vector<8x128xf32>
    %22 = arith.addf %21, %20 : vector<8x128xf32>
    %23 = arith.divf %21, %22 : vector<8x128xf32>
    %24 = vector.extract_strided_slice %17 {offsets = [0, 128], sizes = [8, 128], strides = [1, 1]} : vector<8x512xf32> to vector<8x128xf32>
    %25 = arith.negf %24 : vector<8x128xf32>
    %26 = math.exp %25 : vector<8x128xf32>
    %cst_17 = arith.constant 1.000000e+00 : f32
    %27 = vector.broadcast %cst_17 : f32 to vector<8x128xf32>
    %28 = arith.addf %27, %26 : vector<8x128xf32>
    %29 = arith.divf %27, %28 : vector<8x128xf32>
    %30 = vector.extract_strided_slice %17 {offsets = [0, 256], sizes = [8, 128], strides = [1, 1]} : vector<8x512xf32> to vector<8x128xf32>
    %31 = math.tanh %30 : vector<8x128xf32>
    %32 = vector.extract_strided_slice %17 {offsets = [0, 384], sizes = [8, 128], strides = [1, 1]} : vector<8x512xf32> to vector<8x128xf32>
    %33 = arith.negf %32 : vector<8x128xf32>
    %34 = math.exp %33 : vector<8x128xf32>
    %cst_18 = arith.constant 1.000000e+00 : f32
    %35 = vector.broadcast %cst_18 : f32 to vector<8x128xf32>
    %36 = arith.addf %35, %34 : vector<8x128xf32>
    %37 = arith.divf %35, %36 : vector<8x128xf32>
    %38 = arith.mulf %29, %8 : vector<8x128xf32>
    %39 = arith.mulf %23, %31 : vector<8x128xf32>
    %40 = arith.addf %38, %39 : vector<8x128xf32>
    %41 = math.tanh %40 : vector<8x128xf32>
    %42 = arith.mulf %37, %41 : vector<8x128xf32>
    %43 = arith.index_cast %c0_i32_13 : i32 to index
    %c0_19 = arith.constant 0 : index
    %c0_20 = arith.constant 0 : index
    %44 = vector.load %arg5[%43, %c0_19, %c0_20] : memref<8x8x128xf32, #tpu.memory_space<vmem>>, vector<1x8x128xf32>
    %45 = vector.shape_cast %44 : vector<1x8x128xf32> to vector<8x128xf32>
    %46 = vector.shape_cast %42 : vector<8x128xf32> to vector<1x8x128xf32>
    tpu.vector_store %arg5[%43, %c0_19, %c0_20], %46 {strides = array<i32>} : memref<8x8x128xf32, #tpu.memory_space<vmem>>, vector<1x8x128xf32>,
    %c7_i32 = arith.constant 7 : i32
    %47 = arith.subi %c7_i32, %c0_i32_13 : i32
    %48 = arith.index_cast %47 : i32 to index
    %c0_21 = arith.constant 0 : index
    %c0_22 = arith.constant 0 : index
    %49 = vector.load %arg2[%48, %c0_21, %c0_22] : memref<8x8x512xf32, #tpu.memory_space<vmem>>, vector<1x8x512xf32>
    %50 = vector.shape_cast %49 : vector<1x8x512xf32> to vector<8x512xf32>
    %cst_23 = arith.constant dense<0.000000e+00> : vector<8x512xf32>
    %51 = tpu.matmul %10, %4, %cst_23 {dimension_numbers = #tpu.dot_dimension_numbers<[1], [0], [0], [1], [0, 0, 1, 1], [], []>} : vector<8x128xf32>, vector<128x512xf32>, vector<8x512xf32> -> vector<8x512xf32>
    %52 = arith.addf %50, %51 : vector<8x512xf32>
    %53 = vector.extract_strided_slice %52 {offsets = [0, 0], sizes = [8, 128], strides = [1, 1]} : vector<8x512xf32> to vector<8x128xf32>
    %54 = arith.negf %53 : vector<8x128xf32>
    %55 = math.exp %54 : vector<8x128xf32>
    %cst_24 = arith.constant 1.000000e+00 : f32
    %56 = vector.broadcast %cst_24 : f32 to vector<8x128xf32>
    %57 = arith.addf %56, %55 : vector<8x128xf32>
    %58 = arith.divf %56, %57 : vector<8x128xf32>
    %59 = vector.extract_strided_slice %52 {offsets = [0, 128], sizes = [8, 128], strides = [1, 1]} : vector<8x512xf32> to vector<8x128xf32>
    %60 = arith.negf %59 : vector<8x128xf32>
    %61 = math.exp %60 : vector<8x128xf32>
    %cst_25 = arith.constant 1.000000e+00 : f32
    %62 = vector.broadcast %cst_25 : f32 to vector<8x128xf32>
    %63 = arith.addf %62, %61 : vector<8x128xf32>
    %64 = arith.divf %62, %63 : vector<8x128xf32>
    %65 = vector.extract_strided_slice %52 {offsets = [0, 256], sizes = [8, 128], strides = [1, 1]} : vector<8x512xf32> to vector<8x128xf32>
    %66 = math.tanh %65 : vector<8x128xf32>
    %67 = vector.extract_strided_slice %52 {offsets = [0, 384], sizes = [8, 128], strides = [1, 1]} : vector<8x512xf32> to vector<8x128xf32>
    %68 = arith.negf %67 : vector<8x128xf32>
    %69 = math.exp %68 : vector<8x128xf32>
    %cst_26 = arith.constant 1.000000e+00 : f32
    %70 = vector.broadcast %cst_26 : f32 to vector<8x128xf32>
    %71 = arith.addf %70, %69 : vector<8x128xf32>
    %72 = arith.divf %70, %71 : vector<8x128xf32>
    %73 = arith.mulf %64, %12 : vector<8x128xf32>
    %74 = arith.mulf %58, %66 : vector<8x128xf32>
    %75 = arith.addf %73, %74 : vector<8x128xf32>
    %76 = math.tanh %75 : vector<8x128xf32>
    %77 = arith.mulf %72, %76 : vector<8x128xf32>
    %78 = arith.index_cast %47 : i32 to index
    %c0_27 = arith.constant 0 : index
    %c0_28 = arith.constant 0 : index
    %79 = vector.load %arg6[%78, %c0_27, %c0_28] : memref<8x8x128xf32, #tpu.memory_space<vmem>>, vector<1x8x128xf32>
    %80 = vector.shape_cast %79 : vector<1x8x128xf32> to vector<8x128xf32>
    %81 = vector.shape_cast %77 : vector<8x128xf32> to vector<1x8x128xf32>
    tpu.vector_store %arg6[%78, %c0_27, %c0_28], %81 {strides = array<i32>} : memref<8x8x128xf32, #tpu.memory_space<vmem>>, vector<1x8x128xf32>,
    %c1_i32 = arith.constant 1 : i32
    %82 = arith.index_cast %c1_i32 : i32 to index
    %c0_29 = arith.constant 0 : index
    %c0_30 = arith.constant 0 : index
    %83 = vector.load %arg1[%82, %c0_29, %c0_30] : memref<8x8x512xf32, #tpu.memory_space<vmem>>, vector<1x8x512xf32>
    %84 = vector.shape_cast %83 : vector<1x8x512xf32> to vector<8x512xf32>
    %cst_31 = arith.constant dense<0.000000e+00> : vector<8x512xf32>
    %85 = tpu.matmul %42, %3, %cst_31 {dimension_numbers = #tpu.dot_dimension_numbers<[1], [0], [0], [1], [0, 0, 1, 1], [], []>} : vector<8x128xf32>, vector<128x512xf32>, vector<8x512xf32> -> vector<8x512xf32>
    %86 = arith.addf %84, %85 : vector<8x512xf32>
    %87 = vector.extract_strided_slice %86 {offsets = [0, 0], sizes = [8, 128], strides = [1, 1]} : vector<8x512xf32> to vector<8x128xf32>
    %88 = arith.negf %87 : vector<8x128xf32>
    %89 = math.exp %88 : vector<8x128xf32>
    %cst_32 = arith.constant 1.000000e+00 : f32
    %90 = vector.broadcast %cst_32 : f32 to vector<8x128xf32>
    %91 = arith.addf %90, %89 : vector<8x128xf32>
    %92 = arith.divf %90, %91 : vector<8x128xf32>
    %93 = vector.extract_strided_slice %86 {offsets = [0, 128], sizes = [8, 128], strides = [1, 1]} : vector<8x512xf32> to vector<8x128xf32>
    %94 = arith.negf %93 : vector<8x128xf32>
    %95 = math.exp %94 : vector<8x128xf32>
    %cst_33 = arith.constant 1.000000e+00 : f32
    %96 = vector.broadcast %cst_33 : f32 to vector<8x128xf32>
    %97 = arith.addf %96, %95 : vector<8x128xf32>
    %98 = arith.divf %96, %97 : vector<8x128xf32>
    %99 = vector.extract_strided_slice %86 {offsets = [0, 256], sizes = [8, 128], strides = [1, 1]} : vector<8x512xf32> to vector<8x128xf32>
    %100 = math.tanh %99 : vector<8x128xf32>
    %101 = vector.extract_strided_slice %86 {offsets = [0, 384], sizes = [8, 128], strides = [1, 1]} : vector<8x512xf32> to vector<8x128xf32>
    %102 = arith.negf %101 : vector<8x128xf32>
    %103 = math.exp %102 : vector<8x128xf32>
    %cst_34 = arith.constant 1.000000e+00 : f32
    %104 = vector.broadcast %cst_34 : f32 to vector<8x128xf32>
    %105 = arith.addf %104, %103 : vector<8x128xf32>
    %106 = arith.divf %104, %105 : vector<8x128xf32>
    %107 = arith.mulf %98, %40 : vector<8x128xf32>
    %108 = arith.mulf %92, %100 : vector<8x128xf32>
    %109 = arith.addf %107, %108 : vector<8x128xf32>
    %110 = math.tanh %109 : vector<8x128xf32>
    %111 = arith.mulf %106, %110 : vector<8x128xf32>
    %112 = arith.index_cast %c1_i32 : i32 to index
    %c0_35 = arith.constant 0 : index
    %c0_36 = arith.constant 0 : index
    %113 = vector.load %arg5[%112, %c0_35, %c0_36] : memref<8x8x128xf32, #tpu.memory_space<vmem>>, vector<1x8x128xf32>
    %114 = vector.shape_cast %113 : vector<1x8x128xf32> to vector<8x128xf32>
    %115 = vector.shape_cast %111 : vector<8x128xf32> to vector<1x8x128xf32>
    tpu.vector_store %arg5[%112, %c0_35, %c0_36], %115 {strides = array<i32>} : memref<8x8x128xf32, #tpu.memory_space<vmem>>, vector<1x8x128xf32>,
    %c7_i32_37 = arith.constant 7 : i32
    %116 = arith.subi %c7_i32_37, %c1_i32 : i32
    %117 = arith.index_cast %116 : i32 to index
    %c0_38 = arith.constant 0 : index
    %c0_39 = arith.constant 0 : index
    %118 = vector.load %arg2[%117, %c0_38, %c0_39] : memref<8x8x512xf32, #tpu.memory_space<vmem>>, vector<1x8x512xf32>
    %119 = vector.shape_cast %118 : vector<1x8x512xf32> to vector<8x512xf32>
    %cst_40 = arith.constant dense<0.000000e+00> : vector<8x512xf32>
    %120 = tpu.matmul %77, %4, %cst_40 {dimension_numbers = #tpu.dot_dimension_numbers<[1], [0], [0], [1], [0, 0, 1, 1], [], []>} : vector<8x128xf32>, vector<128x512xf32>, vector<8x512xf32> -> vector<8x512xf32>
    %121 = arith.addf %119, %120 : vector<8x512xf32>
    %122 = vector.extract_strided_slice %121 {offsets = [0, 0], sizes = [8, 128], strides = [1, 1]} : vector<8x512xf32> to vector<8x128xf32>
    %123 = arith.negf %122 : vector<8x128xf32>
    %124 = math.exp %123 : vector<8x128xf32>
    %cst_41 = arith.constant 1.000000e+00 : f32
    %125 = vector.broadcast %cst_41 : f32 to vector<8x128xf32>
    %126 = arith.addf %125, %124 : vector<8x128xf32>
    %127 = arith.divf %125, %126 : vector<8x128xf32>
    %128 = vector.extract_strided_slice %121 {offsets = [0, 128], sizes = [8, 128], strides = [1, 1]} : vector<8x512xf32> to vector<8x128xf32>
    %129 = arith.negf %128 : vector<8x128xf32>
    %130 = math.exp %129 : vector<8x128xf32>
    %cst_42 = arith.constant 1.000000e+00 : f32
    %131 = vector.broadcast %cst_42 : f32 to vector<8x128xf32>
    %132 = arith.addf %131, %130 : vector<8x128xf32>
    %133 = arith.divf %131, %132 : vector<8x128xf32>
    %134 = vector.extract_strided_slice %121 {offsets = [0, 256], sizes = [8, 128], strides = [1, 1]} : vector<8x512xf32> to vector<8x128xf32>
    %135 = math.tanh %134 : vector<8x128xf32>
    %136 = vector.extract_strided_slice %121 {offsets = [0, 384], sizes = [8, 128], strides = [1, 1]} : vector<8x512xf32> to vector<8x128xf32>
    %137 = arith.negf %136 : vector<8x128xf32>
    %138 = math.exp %137 : vector<8x128xf32>
    %cst_43 = arith.constant 1.000000e+00 : f32
    %139 = vector.broadcast %cst_43 : f32 to vector<8x128xf32>
    %140 = arith.addf %139, %138 : vector<8x128xf32>
    %141 = arith.divf %139, %140 : vector<8x128xf32>
    %142 = arith.mulf %133, %75 : vector<8x128xf32>
    %143 = arith.mulf %127, %135 : vector<8x128xf32>
    %144 = arith.addf %142, %143 : vector<8x128xf32>
    %145 = math.tanh %144 : vector<8x128xf32>
    %146 = arith.mulf %141, %145 : vector<8x128xf32>
    %147 = arith.index_cast %116 : i32 to index
    %c0_44 = arith.constant 0 : index
    %c0_45 = arith.constant 0 : index
    %148 = vector.load %arg6[%147, %c0_44, %c0_45] : memref<8x8x128xf32, #tpu.memory_space<vmem>>, vector<1x8x128xf32>
    %149 = vector.shape_cast %148 : vector<1x8x128xf32> to vector<8x128xf32>
    %150 = vector.shape_cast %146 : vector<8x128xf32> to vector<1x8x128xf32>
    tpu.vector_store %arg6[%147, %c0_44, %c0_45], %150 {strides = array<i32>} : memref<8x8x128xf32, #tpu.memory_space<vmem>>, vector<1x8x128xf32>,
    %c2_i32 = arith.constant 2 : i32
    %151 = arith.index_cast %c2_i32 : i32 to index
    %c0_46 = arith.constant 0 : index
    %c0_47 = arith.constant 0 : index
    %152 = vector.load %arg1[%151, %c0_46, %c0_47] : memref<8x8x512xf32, #tpu.memory_space<vmem>>, vector<1x8x512xf32>
    %153 = vector.shape_cast %152 : vector<1x8x512xf32> to vector<8x512xf32>
    %cst_48 = arith.constant dense<0.000000e+00> : vector<8x512xf32>
    %154 = tpu.matmul %111, %3, %cst_48 {dimension_numbers = #tpu.dot_dimension_numbers<[1], [0], [0], [1], [0, 0, 1, 1], [], []>} : vector<8x128xf32>, vector<128x512xf32>, vector<8x512xf32> -> vector<8x512xf32>
    %155 = arith.addf %153, %154 : vector<8x512xf32>
    %156 = vector.extract_strided_slice %155 {offsets = [0, 0], sizes = [8, 128], strides = [1, 1]} : vector<8x512xf32> to vector<8x128xf32>
    %157 = arith.negf %156 : vector<8x128xf32>
    %158 = math.exp %157 : vector<8x128xf32>
    %cst_49 = arith.constant 1.000000e+00 : f32
    %159 = vector.broadcast %cst_49 : f32 to vector<8x128xf32>
    %160 = arith.addf %159, %158 : vector<8x128xf32>
    %161 = arith.divf %159, %160 : vector<8x128xf32>
    %162 = vector.extract_strided_slice %155 {offsets = [0, 128], sizes = [8, 128], strides = [1, 1]} : vector<8x512xf32> to vector<8x128xf32>
    %163 = arith.negf %162 : vector<8x128xf32>
    %164 = math.exp %163 : vector<8x128xf32>
    %cst_50 = arith.constant 1.000000e+00 : f32
    %165 = vector.broadcast %cst_50 : f32 to vector<8x128xf32>
    %166 = arith.addf %165, %164 : vector<8x128xf32>
    %167 = arith.divf %165, %166 : vector<8x128xf32>
    %168 = vector.extract_strided_slice %155 {offsets = [0, 256], sizes = [8, 128], strides = [1, 1]} : vector<8x512xf32> to vector<8x128xf32>
    %169 = math.tanh %168 : vector<8x128xf32>
    %170 = vector.extract_strided_slice %155 {offsets = [0, 384], sizes = [8, 128], strides = [1, 1]} : vector<8x512xf32> to vector<8x128xf32>
    %171 = arith.negf %170 : vector<8x128xf32>
    %172 = math.exp %171 : vector<8x128xf32>
    %cst_51 = arith.constant 1.000000e+00 : f32
    %173 = vector.broadcast %cst_51 : f32 to vector<8x128xf32>
    %174 = arith.addf %173, %172 : vector<8x128xf32>
    %175 = arith.divf %173, %174 : vector<8x128xf32>
    %176 = arith.mulf %167, %109 : vector<8x128xf32>
    %177 = arith.mulf %161, %169 : vector<8x128xf32>
    %178 = arith.addf %176, %177 : vector<8x128xf32>
    %179 = math.tanh %178 : vector<8x128xf32>
    %180 = arith.mulf %175, %179 : vector<8x128xf32>
    %181 = arith.index_cast %c2_i32 : i32 to index
    %c0_52 = arith.constant 0 : index
    %c0_53 = arith.constant 0 : index
    %182 = vector.load %arg5[%181, %c0_52, %c0_53] : memref<8x8x128xf32, #tpu.memory_space<vmem>>, vector<1x8x128xf32>
    %183 = vector.shape_cast %182 : vector<1x8x128xf32> to vector<8x128xf32>
    %184 = vector.shape_cast %180 : vector<8x128xf32> to vector<1x8x128xf32>
    tpu.vector_store %arg5[%181, %c0_52, %c0_53], %184 {strides = array<i32>} : memref<8x8x128xf32, #tpu.memory_space<vmem>>, vector<1x8x128xf32>,
    %c7_i32_54 = arith.constant 7 : i32
    %185 = arith.subi %c7_i32_54, %c2_i32 : i32
    %186 = arith.index_cast %185 : i32 to index
    %c0_55 = arith.constant 0 : index
    %c0_56 = arith.constant 0 : index
    %187 = vector.load %arg2[%186, %c0_55, %c0_56] : memref<8x8x512xf32, #tpu.memory_space<vmem>>, vector<1x8x512xf32>
    %188 = vector.shape_cast %187 : vector<1x8x512xf32> to vector<8x512xf32>
    %cst_57 = arith.constant dense<0.000000e+00> : vector<8x512xf32>
    %189 = tpu.matmul %146, %4, %cst_57 {dimension_numbers = #tpu.dot_dimension_numbers<[1], [0], [0], [1], [0, 0, 1, 1], [], []>} : vector<8x128xf32>, vector<128x512xf32>, vector<8x512xf32> -> vector<8x512xf32>
    %190 = arith.addf %188, %189 : vector<8x512xf32>
    %191 = vector.extract_strided_slice %190 {offsets = [0, 0], sizes = [8, 128], strides = [1, 1]} : vector<8x512xf32> to vector<8x128xf32>
    %192 = arith.negf %191 : vector<8x128xf32>
    %193 = math.exp %192 : vector<8x128xf32>
    %cst_58 = arith.constant 1.000000e+00 : f32
    %194 = vector.broadcast %cst_58 : f32 to vector<8x128xf32>
    %195 = arith.addf %194, %193 : vector<8x128xf32>
    %196 = arith.divf %194, %195 : vector<8x128xf32>
    %197 = vector.extract_strided_slice %190 {offsets = [0, 128], sizes = [8, 128], strides = [1, 1]} : vector<8x512xf32> to vector<8x128xf32>
    %198 = arith.negf %197 : vector<8x128xf32>
    %199 = math.exp %198 : vector<8x128xf32>
    %cst_59 = arith.constant 1.000000e+00 : f32
    %200 = vector.broadcast %cst_59 : f32 to vector<8x128xf32>
    %201 = arith.addf %200, %199 : vector<8x128xf32>
    %202 = arith.divf %200, %201 : vector<8x128xf32>
    %203 = vector.extract_strided_slice %190 {offsets = [0, 256], sizes = [8, 128], strides = [1, 1]} : vector<8x512xf32> to vector<8x128xf32>
    %204 = math.tanh %203 : vector<8x128xf32>
    %205 = vector.extract_strided_slice %190 {offsets = [0, 384], sizes = [8, 128], strides = [1, 1]} : vector<8x512xf32> to vector<8x128xf32>
    %206 = arith.negf %205 : vector<8x128xf32>
    %207 = math.exp %206 : vector<8x128xf32>
    %cst_60 = arith.constant 1.000000e+00 : f32
    %208 = vector.broadcast %cst_60 : f32 to vector<8x128xf32>
    %209 = arith.addf %208, %207 : vector<8x128xf32>
    %210 = arith.divf %208, %209 : vector<8x128xf32>
    %211 = arith.mulf %202, %144 : vector<8x128xf32>
    %212 = arith.mulf %196, %204 : vector<8x128xf32>
    %213 = arith.addf %211, %212 : vector<8x128xf32>
    %214 = math.tanh %213 : vector<8x128xf32>
    %215 = arith.mulf %210, %214 : vector<8x128xf32>
    %216 = arith.index_cast %185 : i32 to index
    %c0_61 = arith.constant 0 : index
    %c0_62 = arith.constant 0 : index
    %217 = vector.load %arg6[%216, %c0_61, %c0_62] : memref<8x8x128xf32, #tpu.memory_space<vmem>>, vector<1x8x128xf32>
    %218 = vector.shape_cast %217 : vector<1x8x128xf32> to vector<8x128xf32>
    %219 = vector.shape_cast %215 : vector<8x128xf32> to vector<1x8x128xf32>
    tpu.vector_store %arg6[%216, %c0_61, %c0_62], %219 {strides = array<i32>} : memref<8x8x128xf32, #tpu.memory_space<vmem>>, vector<1x8x128xf32>,
    %c3_i32 = arith.constant 3 : i32
    %220 = arith.index_cast %c3_i32 : i32 to index
    %c0_63 = arith.constant 0 : index
    %c0_64 = arith.constant 0 : index
    %221 = vector.load %arg1[%220, %c0_63, %c0_64] : memref<8x8x512xf32, #tpu.memory_space<vmem>>, vector<1x8x512xf32>
    %222 = vector.shape_cast %221 : vector<1x8x512xf32> to vector<8x512xf32>
    %cst_65 = arith.constant dense<0.000000e+00> : vector<8x512xf32>
    %223 = tpu.matmul %180, %3, %cst_65 {dimension_numbers = #tpu.dot_dimension_numbers<[1], [0], [0], [1], [0, 0, 1, 1], [], []>} : vector<8x128xf32>, vector<128x512xf32>, vector<8x512xf32> -> vector<8x512xf32>
    %224 = arith.addf %222, %223 : vector<8x512xf32>
    %225 = vector.extract_strided_slice %224 {offsets = [0, 0], sizes = [8, 128], strides = [1, 1]} : vector<8x512xf32> to vector<8x128xf32>
    %226 = arith.negf %225 : vector<8x128xf32>
    %227 = math.exp %226 : vector<8x128xf32>
    %cst_66 = arith.constant 1.000000e+00 : f32
    %228 = vector.broadcast %cst_66 : f32 to vector<8x128xf32>
    %229 = arith.addf %228, %227 : vector<8x128xf32>
    %230 = arith.divf %228, %229 : vector<8x128xf32>
    %231 = vector.extract_strided_slice %224 {offsets = [0, 128], sizes = [8, 128], strides = [1, 1]} : vector<8x512xf32> to vector<8x128xf32>
    %232 = arith.negf %231 : vector<8x128xf32>
    %233 = math.exp %232 : vector<8x128xf32>
    %cst_67 = arith.constant 1.000000e+00 : f32
    %234 = vector.broadcast %cst_67 : f32 to vector<8x128xf32>
    %235 = arith.addf %234, %233 : vector<8x128xf32>
    %236 = arith.divf %234, %235 : vector<8x128xf32>
    %237 = vector.extract_strided_slice %224 {offsets = [0, 256], sizes = [8, 128], strides = [1, 1]} : vector<8x512xf32> to vector<8x128xf32>
    %238 = math.tanh %237 : vector<8x128xf32>
    %239 = vector.extract_strided_slice %224 {offsets = [0, 384], sizes = [8, 128], strides = [1, 1]} : vector<8x512xf32> to vector<8x128xf32>
    %240 = arith.negf %239 : vector<8x128xf32>
    %241 = math.exp %240 : vector<8x128xf32>
    %cst_68 = arith.constant 1.000000e+00 : f32
    %242 = vector.broadcast %cst_68 : f32 to vector<8x128xf32>
    %243 = arith.addf %242, %241 : vector<8x128xf32>
    %244 = arith.divf %242, %243 : vector<8x128xf32>
    %245 = arith.mulf %236, %178 : vector<8x128xf32>
    %246 = arith.mulf %230, %238 : vector<8x128xf32>
    %247 = arith.addf %245, %246 : vector<8x128xf32>
    %248 = math.tanh %247 : vector<8x128xf32>
    %249 = arith.mulf %244, %248 : vector<8x128xf32>
    %250 = arith.index_cast %c3_i32 : i32 to index
    %c0_69 = arith.constant 0 : index
    %c0_70 = arith.constant 0 : index
    %251 = vector.load %arg5[%250, %c0_69, %c0_70] : memref<8x8x128xf32, #tpu.memory_space<vmem>>, vector<1x8x128xf32>
    %252 = vector.shape_cast %251 : vector<1x8x128xf32> to vector<8x128xf32>
    %253 = vector.shape_cast %249 : vector<8x128xf32> to vector<1x8x128xf32>
    tpu.vector_store %arg5[%250, %c0_69, %c0_70], %253 {strides = array<i32>} : memref<8x8x128xf32, #tpu.memory_space<vmem>>, vector<1x8x128xf32>,
    %c7_i32_71 = arith.constant 7 : i32
    %254 = arith.subi %c7_i32_71, %c3_i32 : i32
    %255 = arith.index_cast %254 : i32 to index
    %c0_72 = arith.constant 0 : index
    %c0_73 = arith.constant 0 : index
    %256 = vector.load %arg2[%255, %c0_72, %c0_73] : memref<8x8x512xf32, #tpu.memory_space<vmem>>, vector<1x8x512xf32>
    %257 = vector.shape_cast %256 : vector<1x8x512xf32> to vector<8x512xf32>
    %cst_74 = arith.constant dense<0.000000e+00> : vector<8x512xf32>
    %258 = tpu.matmul %215, %4, %cst_74 {dimension_numbers = #tpu.dot_dimension_numbers<[1], [0], [0], [1], [0, 0, 1, 1], [], []>} : vector<8x128xf32>, vector<128x512xf32>, vector<8x512xf32> -> vector<8x512xf32>
    %259 = arith.addf %257, %258 : vector<8x512xf32>
    %260 = vector.extract_strided_slice %259 {offsets = [0, 0], sizes = [8, 128], strides = [1, 1]} : vector<8x512xf32> to vector<8x128xf32>
    %261 = arith.negf %260 : vector<8x128xf32>
    %262 = math.exp %261 : vector<8x128xf32>
    %cst_75 = arith.constant 1.000000e+00 : f32
    %263 = vector.broadcast %cst_75 : f32 to vector<8x128xf32>
    %264 = arith.addf %263, %262 : vector<8x128xf32>
    %265 = arith.divf %263, %264 : vector<8x128xf32>
    %266 = vector.extract_strided_slice %259 {offsets = [0, 128], sizes = [8, 128], strides = [1, 1]} : vector<8x512xf32> to vector<8x128xf32>
    %267 = arith.negf %266 : vector<8x128xf32>
    %268 = math.exp %267 : vector<8x128xf32>
    %cst_76 = arith.constant 1.000000e+00 : f32
    %269 = vector.broadcast %cst_76 : f32 to vector<8x128xf32>
    %270 = arith.addf %269, %268 : vector<8x128xf32>
    %271 = arith.divf %269, %270 : vector<8x128xf32>
    %272 = vector.extract_strided_slice %259 {offsets = [0, 256], sizes = [8, 128], strides = [1, 1]} : vector<8x512xf32> to vector<8x128xf32>
    %273 = math.tanh %272 : vector<8x128xf32>
    %274 = vector.extract_strided_slice %259 {offsets = [0, 384], sizes = [8, 128], strides = [1, 1]} : vector<8x512xf32> to vector<8x128xf32>
    %275 = arith.negf %274 : vector<8x128xf32>
    %276 = math.exp %275 : vector<8x128xf32>
    %cst_77 = arith.constant 1.000000e+00 : f32
    %277 = vector.broadcast %cst_77 : f32 to vector<8x128xf32>
    %278 = arith.addf %277, %276 : vector<8x128xf32>
    %279 = arith.divf %277, %278 : vector<8x128xf32>
    %280 = arith.mulf %271, %213 : vector<8x128xf32>
    %281 = arith.mulf %265, %273 : vector<8x128xf32>
    %282 = arith.addf %280, %281 : vector<8x128xf32>
    %283 = math.tanh %282 : vector<8x128xf32>
    %284 = arith.mulf %279, %283 : vector<8x128xf32>
    %285 = arith.index_cast %254 : i32 to index
    %c0_78 = arith.constant 0 : index
    %c0_79 = arith.constant 0 : index
    %286 = vector.load %arg6[%285, %c0_78, %c0_79] : memref<8x8x128xf32, #tpu.memory_space<vmem>>, vector<1x8x128xf32>
    %287 = vector.shape_cast %286 : vector<1x8x128xf32> to vector<8x128xf32>
    %288 = vector.shape_cast %284 : vector<8x128xf32> to vector<1x8x128xf32>
    tpu.vector_store %arg6[%285, %c0_78, %c0_79], %288 {strides = array<i32>} : memref<8x8x128xf32, #tpu.memory_space<vmem>>, vector<1x8x128xf32>,
    %c4_i32 = arith.constant 4 : i32
    %289 = arith.index_cast %c4_i32 : i32 to index
    %c0_80 = arith.constant 0 : index
    %c0_81 = arith.constant 0 : index
    %290 = vector.load %arg1[%289, %c0_80, %c0_81] : memref<8x8x512xf32, #tpu.memory_space<vmem>>, vector<1x8x512xf32>
    %291 = vector.shape_cast %290 : vector<1x8x512xf32> to vector<8x512xf32>
    %cst_82 = arith.constant dense<0.000000e+00> : vector<8x512xf32>
    %292 = tpu.matmul %249, %3, %cst_82 {dimension_numbers = #tpu.dot_dimension_numbers<[1], [0], [0], [1], [0, 0, 1, 1], [], []>} : vector<8x128xf32>, vector<128x512xf32>, vector<8x512xf32> -> vector<8x512xf32>
    %293 = arith.addf %291, %292 : vector<8x512xf32>
    %294 = vector.extract_strided_slice %293 {offsets = [0, 0], sizes = [8, 128], strides = [1, 1]} : vector<8x512xf32> to vector<8x128xf32>
    %295 = arith.negf %294 : vector<8x128xf32>
    %296 = math.exp %295 : vector<8x128xf32>
    %cst_83 = arith.constant 1.000000e+00 : f32
    %297 = vector.broadcast %cst_83 : f32 to vector<8x128xf32>
    %298 = arith.addf %297, %296 : vector<8x128xf32>
    %299 = arith.divf %297, %298 : vector<8x128xf32>
    %300 = vector.extract_strided_slice %293 {offsets = [0, 128], sizes = [8, 128], strides = [1, 1]} : vector<8x512xf32> to vector<8x128xf32>
    %301 = arith.negf %300 : vector<8x128xf32>
    %302 = math.exp %301 : vector<8x128xf32>
    %cst_84 = arith.constant 1.000000e+00 : f32
    %303 = vector.broadcast %cst_84 : f32 to vector<8x128xf32>
    %304 = arith.addf %303, %302 : vector<8x128xf32>
    %305 = arith.divf %303, %304 : vector<8x128xf32>
    %306 = vector.extract_strided_slice %293 {offsets = [0, 256], sizes = [8, 128], strides = [1, 1]} : vector<8x512xf32> to vector<8x128xf32>
    %307 = math.tanh %306 : vector<8x128xf32>
    %308 = vector.extract_strided_slice %293 {offsets = [0, 384], sizes = [8, 128], strides = [1, 1]} : vector<8x512xf32> to vector<8x128xf32>
    %309 = arith.negf %308 : vector<8x128xf32>
    %310 = math.exp %309 : vector<8x128xf32>
    %cst_85 = arith.constant 1.000000e+00 : f32
    %311 = vector.broadcast %cst_85 : f32 to vector<8x128xf32>
    %312 = arith.addf %311, %310 : vector<8x128xf32>
    %313 = arith.divf %311, %312 : vector<8x128xf32>
    %314 = arith.mulf %305, %247 : vector<8x128xf32>
    %315 = arith.mulf %299, %307 : vector<8x128xf32>
    %316 = arith.addf %314, %315 : vector<8x128xf32>
    %317 = math.tanh %316 : vector<8x128xf32>
    %318 = arith.mulf %313, %317 : vector<8x128xf32>
    %319 = arith.index_cast %c4_i32 : i32 to index
    %c0_86 = arith.constant 0 : index
    %c0_87 = arith.constant 0 : index
    %320 = vector.load %arg5[%319, %c0_86, %c0_87] : memref<8x8x128xf32, #tpu.memory_space<vmem>>, vector<1x8x128xf32>
    %321 = vector.shape_cast %320 : vector<1x8x128xf32> to vector<8x128xf32>
    %322 = vector.shape_cast %318 : vector<8x128xf32> to vector<1x8x128xf32>
    tpu.vector_store %arg5[%319, %c0_86, %c0_87], %322 {strides = array<i32>} : memref<8x8x128xf32, #tpu.memory_space<vmem>>, vector<1x8x128xf32>,
    %c7_i32_88 = arith.constant 7 : i32
    %323 = arith.subi %c7_i32_88, %c4_i32 : i32
    %324 = arith.index_cast %323 : i32 to index
    %c0_89 = arith.constant 0 : index
    %c0_90 = arith.constant 0 : index
    %325 = vector.load %arg2[%324, %c0_89, %c0_90] : memref<8x8x512xf32, #tpu.memory_space<vmem>>, vector<1x8x512xf32>
    %326 = vector.shape_cast %325 : vector<1x8x512xf32> to vector<8x512xf32>
    %cst_91 = arith.constant dense<0.000000e+00> : vector<8x512xf32>
    %327 = tpu.matmul %284, %4, %cst_91 {dimension_numbers = #tpu.dot_dimension_numbers<[1], [0], [0], [1], [0, 0, 1, 1], [], []>} : vector<8x128xf32>, vector<128x512xf32>, vector<8x512xf32> -> vector<8x512xf32>
    %328 = arith.addf %326, %327 : vector<8x512xf32>
    %329 = vector.extract_strided_slice %328 {offsets = [0, 0], sizes = [8, 128], strides = [1, 1]} : vector<8x512xf32> to vector<8x128xf32>
    %330 = arith.negf %329 : vector<8x128xf32>
    %331 = math.exp %330 : vector<8x128xf32>
    %cst_92 = arith.constant 1.000000e+00 : f32
    %332 = vector.broadcast %cst_92 : f32 to vector<8x128xf32>
    %333 = arith.addf %332, %331 : vector<8x128xf32>
    %334 = arith.divf %332, %333 : vector<8x128xf32>
    %335 = vector.extract_strided_slice %328 {offsets = [0, 128], sizes = [8, 128], strides = [1, 1]} : vector<8x512xf32> to vector<8x128xf32>
    %336 = arith.negf %335 : vector<8x128xf32>
    %337 = math.exp %336 : vector<8x128xf32>
    %cst_93 = arith.constant 1.000000e+00 : f32
    %338 = vector.broadcast %cst_93 : f32 to vector<8x128xf32>
    %339 = arith.addf %338, %337 : vector<8x128xf32>
    %340 = arith.divf %338, %339 : vector<8x128xf32>
    %341 = vector.extract_strided_slice %328 {offsets = [0, 256], sizes = [8, 128], strides = [1, 1]} : vector<8x512xf32> to vector<8x128xf32>
    %342 = math.tanh %341 : vector<8x128xf32>
    %343 = vector.extract_strided_slice %328 {offsets = [0, 384], sizes = [8, 128], strides = [1, 1]} : vector<8x512xf32> to vector<8x128xf32>
    %344 = arith.negf %343 : vector<8x128xf32>
    %345 = math.exp %344 : vector<8x128xf32>
    %cst_94 = arith.constant 1.000000e+00 : f32
    %346 = vector.broadcast %cst_94 : f32 to vector<8x128xf32>
    %347 = arith.addf %346, %345 : vector<8x128xf32>
    %348 = arith.divf %346, %347 : vector<8x128xf32>
    %349 = arith.mulf %340, %282 : vector<8x128xf32>
    %350 = arith.mulf %334, %342 : vector<8x128xf32>
    %351 = arith.addf %349, %350 : vector<8x128xf32>
    %352 = math.tanh %351 : vector<8x128xf32>
    %353 = arith.mulf %348, %352 : vector<8x128xf32>
    %354 = arith.index_cast %323 : i32 to index
    %c0_95 = arith.constant 0 : index
    %c0_96 = arith.constant 0 : index
    %355 = vector.load %arg6[%354, %c0_95, %c0_96] : memref<8x8x128xf32, #tpu.memory_space<vmem>>, vector<1x8x128xf32>
    %356 = vector.shape_cast %355 : vector<1x8x128xf32> to vector<8x128xf32>
    %357 = vector.shape_cast %353 : vector<8x128xf32> to vector<1x8x128xf32>
    tpu.vector_store %arg6[%354, %c0_95, %c0_96], %357 {strides = array<i32>} : memref<8x8x128xf32, #tpu.memory_space<vmem>>, vector<1x8x128xf32>,
    %c5_i32 = arith.constant 5 : i32
    %358 = arith.index_cast %c5_i32 : i32 to index
    %c0_97 = arith.constant 0 : index
    %c0_98 = arith.constant 0 : index
    %359 = vector.load %arg1[%358, %c0_97, %c0_98] : memref<8x8x512xf32, #tpu.memory_space<vmem>>, vector<1x8x512xf32>
    %360 = vector.shape_cast %359 : vector<1x8x512xf32> to vector<8x512xf32>
    %cst_99 = arith.constant dense<0.000000e+00> : vector<8x512xf32>
    %361 = tpu.matmul %318, %3, %cst_99 {dimension_numbers = #tpu.dot_dimension_numbers<[1], [0], [0], [1], [0, 0, 1, 1], [], []>} : vector<8x128xf32>, vector<128x512xf32>, vector<8x512xf32> -> vector<8x512xf32>
    %362 = arith.addf %360, %361 : vector<8x512xf32>
    %363 = vector.extract_strided_slice %362 {offsets = [0, 0], sizes = [8, 128], strides = [1, 1]} : vector<8x512xf32> to vector<8x128xf32>
    %364 = arith.negf %363 : vector<8x128xf32>
    %365 = math.exp %364 : vector<8x128xf32>
    %cst_100 = arith.constant 1.000000e+00 : f32
    %366 = vector.broadcast %cst_100 : f32 to vector<8x128xf32>
    %367 = arith.addf %366, %365 : vector<8x128xf32>
    %368 = arith.divf %366, %367 : vector<8x128xf32>
    %369 = vector.extract_strided_slice %362 {offsets = [0, 128], sizes = [8, 128], strides = [1, 1]} : vector<8x512xf32> to vector<8x128xf32>
    %370 = arith.negf %369 : vector<8x128xf32>
    %371 = math.exp %370 : vector<8x128xf32>
    %cst_101 = arith.constant 1.000000e+00 : f32
    %372 = vector.broadcast %cst_101 : f32 to vector<8x128xf32>
    %373 = arith.addf %372, %371 : vector<8x128xf32>
    %374 = arith.divf %372, %373 : vector<8x128xf32>
    %375 = vector.extract_strided_slice %362 {offsets = [0, 256], sizes = [8, 128], strides = [1, 1]} : vector<8x512xf32> to vector<8x128xf32>
    %376 = math.tanh %375 : vector<8x128xf32>
    %377 = vector.extract_strided_slice %362 {offsets = [0, 384], sizes = [8, 128], strides = [1, 1]} : vector<8x512xf32> to vector<8x128xf32>
    %378 = arith.negf %377 : vector<8x128xf32>
    %379 = math.exp %378 : vector<8x128xf32>
    %cst_102 = arith.constant 1.000000e+00 : f32
    %380 = vector.broadcast %cst_102 : f32 to vector<8x128xf32>
    %381 = arith.addf %380, %379 : vector<8x128xf32>
    %382 = arith.divf %380, %381 : vector<8x128xf32>
    %383 = arith.mulf %374, %316 : vector<8x128xf32>
    %384 = arith.mulf %368, %376 : vector<8x128xf32>
    %385 = arith.addf %383, %384 : vector<8x128xf32>
    %386 = math.tanh %385 : vector<8x128xf32>
    %387 = arith.mulf %382, %386 : vector<8x128xf32>
    %388 = arith.index_cast %c5_i32 : i32 to index
    %c0_103 = arith.constant 0 : index
    %c0_104 = arith.constant 0 : index
    %389 = vector.load %arg5[%388, %c0_103, %c0_104] : memref<8x8x128xf32, #tpu.memory_space<vmem>>, vector<1x8x128xf32>
    %390 = vector.shape_cast %389 : vector<1x8x128xf32> to vector<8x128xf32>
    %391 = vector.shape_cast %387 : vector<8x128xf32> to vector<1x8x128xf32>
    tpu.vector_store %arg5[%388, %c0_103, %c0_104], %391 {strides = array<i32>} : memref<8x8x128xf32, #tpu.memory_space<vmem>>, vector<1x8x128xf32>,
    %c7_i32_105 = arith.constant 7 : i32
    %392 = arith.subi %c7_i32_105, %c5_i32 : i32
    %393 = arith.index_cast %392 : i32 to index
    %c0_106 = arith.constant 0 : index
    %c0_107 = arith.constant 0 : index
    %394 = vector.load %arg2[%393, %c0_106, %c0_107] : memref<8x8x512xf32, #tpu.memory_space<vmem>>, vector<1x8x512xf32>
    %395 = vector.shape_cast %394 : vector<1x8x512xf32> to vector<8x512xf32>
    %cst_108 = arith.constant dense<0.000000e+00> : vector<8x512xf32>
    %396 = tpu.matmul %353, %4, %cst_108 {dimension_numbers = #tpu.dot_dimension_numbers<[1], [0], [0], [1], [0, 0, 1, 1], [], []>} : vector<8x128xf32>, vector<128x512xf32>, vector<8x512xf32> -> vector<8x512xf32>
    %397 = arith.addf %395, %396 : vector<8x512xf32>
    %398 = vector.extract_strided_slice %397 {offsets = [0, 0], sizes = [8, 128], strides = [1, 1]} : vector<8x512xf32> to vector<8x128xf32>
    %399 = arith.negf %398 : vector<8x128xf32>
    %400 = math.exp %399 : vector<8x128xf32>
    %cst_109 = arith.constant 1.000000e+00 : f32
    %401 = vector.broadcast %cst_109 : f32 to vector<8x128xf32>
    %402 = arith.addf %401, %400 : vector<8x128xf32>
    %403 = arith.divf %401, %402 : vector<8x128xf32>
    %404 = vector.extract_strided_slice %397 {offsets = [0, 128], sizes = [8, 128], strides = [1, 1]} : vector<8x512xf32> to vector<8x128xf32>
    %405 = arith.negf %404 : vector<8x128xf32>
    %406 = math.exp %405 : vector<8x128xf32>
    %cst_110 = arith.constant 1.000000e+00 : f32
    %407 = vector.broadcast %cst_110 : f32 to vector<8x128xf32>
    %408 = arith.addf %407, %406 : vector<8x128xf32>
    %409 = arith.divf %407, %408 : vector<8x128xf32>
    %410 = vector.extract_strided_slice %397 {offsets = [0, 256], sizes = [8, 128], strides = [1, 1]} : vector<8x512xf32> to vector<8x128xf32>
    %411 = math.tanh %410 : vector<8x128xf32>
    %412 = vector.extract_strided_slice %397 {offsets = [0, 384], sizes = [8, 128], strides = [1, 1]} : vector<8x512xf32> to vector<8x128xf32>
    %413 = arith.negf %412 : vector<8x128xf32>
    %414 = math.exp %413 : vector<8x128xf32>
    %cst_111 = arith.constant 1.000000e+00 : f32
    %415 = vector.broadcast %cst_111 : f32 to vector<8x128xf32>
    %416 = arith.addf %415, %414 : vector<8x128xf32>
    %417 = arith.divf %415, %416 : vector<8x128xf32>
    %418 = arith.mulf %409, %351 : vector<8x128xf32>
    %419 = arith.mulf %403, %411 : vector<8x128xf32>
    %420 = arith.addf %418, %419 : vector<8x128xf32>
    %421 = math.tanh %420 : vector<8x128xf32>
    %422 = arith.mulf %417, %421 : vector<8x128xf32>
    %423 = arith.index_cast %392 : i32 to index
    %c0_112 = arith.constant 0 : index
    %c0_113 = arith.constant 0 : index
    %424 = vector.load %arg6[%423, %c0_112, %c0_113] : memref<8x8x128xf32, #tpu.memory_space<vmem>>, vector<1x8x128xf32>
    %425 = vector.shape_cast %424 : vector<1x8x128xf32> to vector<8x128xf32>
    %426 = vector.shape_cast %422 : vector<8x128xf32> to vector<1x8x128xf32>
    tpu.vector_store %arg6[%423, %c0_112, %c0_113], %426 {strides = array<i32>} : memref<8x8x128xf32, #tpu.memory_space<vmem>>, vector<1x8x128xf32>,
    %c6_i32 = arith.constant 6 : i32
    %427 = arith.index_cast %c6_i32 : i32 to index
    %c0_114 = arith.constant 0 : index
    %c0_115 = arith.constant 0 : index
    %428 = vector.load %arg1[%427, %c0_114, %c0_115] : memref<8x8x512xf32, #tpu.memory_space<vmem>>, vector<1x8x512xf32>
    %429 = vector.shape_cast %428 : vector<1x8x512xf32> to vector<8x512xf32>
    %cst_116 = arith.constant dense<0.000000e+00> : vector<8x512xf32>
    %430 = tpu.matmul %387, %3, %cst_116 {dimension_numbers = #tpu.dot_dimension_numbers<[1], [0], [0], [1], [0, 0, 1, 1], [], []>} : vector<8x128xf32>, vector<128x512xf32>, vector<8x512xf32> -> vector<8x512xf32>
    %431 = arith.addf %429, %430 : vector<8x512xf32>
    %432 = vector.extract_strided_slice %431 {offsets = [0, 0], sizes = [8, 128], strides = [1, 1]} : vector<8x512xf32> to vector<8x128xf32>
    %433 = arith.negf %432 : vector<8x128xf32>
    %434 = math.exp %433 : vector<8x128xf32>
    %cst_117 = arith.constant 1.000000e+00 : f32
    %435 = vector.broadcast %cst_117 : f32 to vector<8x128xf32>
    %436 = arith.addf %435, %434 : vector<8x128xf32>
    %437 = arith.divf %435, %436 : vector<8x128xf32>
    %438 = vector.extract_strided_slice %431 {offsets = [0, 128], sizes = [8, 128], strides = [1, 1]} : vector<8x512xf32> to vector<8x128xf32>
    %439 = arith.negf %438 : vector<8x128xf32>
    %440 = math.exp %439 : vector<8x128xf32>
    %cst_118 = arith.constant 1.000000e+00 : f32
    %441 = vector.broadcast %cst_118 : f32 to vector<8x128xf32>
    %442 = arith.addf %441, %440 : vector<8x128xf32>
    %443 = arith.divf %441, %442 : vector<8x128xf32>
    %444 = vector.extract_strided_slice %431 {offsets = [0, 256], sizes = [8, 128], strides = [1, 1]} : vector<8x512xf32> to vector<8x128xf32>
    %445 = math.tanh %444 : vector<8x128xf32>
    %446 = vector.extract_strided_slice %431 {offsets = [0, 384], sizes = [8, 128], strides = [1, 1]} : vector<8x512xf32> to vector<8x128xf32>
    %447 = arith.negf %446 : vector<8x128xf32>
    %448 = math.exp %447 : vector<8x128xf32>
    %cst_119 = arith.constant 1.000000e+00 : f32
    %449 = vector.broadcast %cst_119 : f32 to vector<8x128xf32>
    %450 = arith.addf %449, %448 : vector<8x128xf32>
    %451 = arith.divf %449, %450 : vector<8x128xf32>
    %452 = arith.mulf %443, %385 : vector<8x128xf32>
    %453 = arith.mulf %437, %445 : vector<8x128xf32>
    %454 = arith.addf %452, %453 : vector<8x128xf32>
    %455 = math.tanh %454 : vector<8x128xf32>
    %456 = arith.mulf %451, %455 : vector<8x128xf32>
    %457 = arith.index_cast %c6_i32 : i32 to index
    %c0_120 = arith.constant 0 : index
    %c0_121 = arith.constant 0 : index
    %458 = vector.load %arg5[%457, %c0_120, %c0_121] : memref<8x8x128xf32, #tpu.memory_space<vmem>>, vector<1x8x128xf32>
    %459 = vector.shape_cast %458 : vector<1x8x128xf32> to vector<8x128xf32>
    %460 = vector.shape_cast %456 : vector<8x128xf32> to vector<1x8x128xf32>
    tpu.vector_store %arg5[%457, %c0_120, %c0_121], %460 {strides = array<i32>} : memref<8x8x128xf32, #tpu.memory_space<vmem>>, vector<1x8x128xf32>,
    %c7_i32_122 = arith.constant 7 : i32
    %461 = arith.subi %c7_i32_122, %c6_i32 : i32
    %462 = arith.index_cast %461 : i32 to index
    %c0_123 = arith.constant 0 : index
    %c0_124 = arith.constant 0 : index
    %463 = vector.load %arg2[%462, %c0_123, %c0_124] : memref<8x8x512xf32, #tpu.memory_space<vmem>>, vector<1x8x512xf32>
    %464 = vector.shape_cast %463 : vector<1x8x512xf32> to vector<8x512xf32>
    %cst_125 = arith.constant dense<0.000000e+00> : vector<8x512xf32>
    %465 = tpu.matmul %422, %4, %cst_125 {dimension_numbers = #tpu.dot_dimension_numbers<[1], [0], [0], [1], [0, 0, 1, 1], [], []>} : vector<8x128xf32>, vector<128x512xf32>, vector<8x512xf32> -> vector<8x512xf32>
    %466 = arith.addf %464, %465 : vector<8x512xf32>
    %467 = vector.extract_strided_slice %466 {offsets = [0, 0], sizes = [8, 128], strides = [1, 1]} : vector<8x512xf32> to vector<8x128xf32>
    %468 = arith.negf %467 : vector<8x128xf32>
    %469 = math.exp %468 : vector<8x128xf32>
    %cst_126 = arith.constant 1.000000e+00 : f32
    %470 = vector.broadcast %cst_126 : f32 to vector<8x128xf32>
    %471 = arith.addf %470, %469 : vector<8x128xf32>
    %472 = arith.divf %470, %471 : vector<8x128xf32>
    %473 = vector.extract_strided_slice %466 {offsets = [0, 128], sizes = [8, 128], strides = [1, 1]} : vector<8x512xf32> to vector<8x128xf32>
    %474 = arith.negf %473 : vector<8x128xf32>
    %475 = math.exp %474 : vector<8x128xf32>
    %cst_127 = arith.constant 1.000000e+00 : f32
    %476 = vector.broadcast %cst_127 : f32 to vector<8x128xf32>
    %477 = arith.addf %476, %475 : vector<8x128xf32>
    %478 = arith.divf %476, %477 : vector<8x128xf32>
    %479 = vector.extract_strided_slice %466 {offsets = [0, 256], sizes = [8, 128], strides = [1, 1]} : vector<8x512xf32> to vector<8x128xf32>
    %480 = math.tanh %479 : vector<8x128xf32>
    %481 = vector.extract_strided_slice %466 {offsets = [0, 384], sizes = [8, 128], strides = [1, 1]} : vector<8x512xf32> to vector<8x128xf32>
    %482 = arith.negf %481 : vector<8x128xf32>
    %483 = math.exp %482 : vector<8x128xf32>
    %cst_128 = arith.constant 1.000000e+00 : f32
    %484 = vector.broadcast %cst_128 : f32 to vector<8x128xf32>
    %485 = arith.addf %484, %483 : vector<8x128xf32>
    %486 = arith.divf %484, %485 : vector<8x128xf32>
    %487 = arith.mulf %478, %420 : vector<8x128xf32>
    %488 = arith.mulf %472, %480 : vector<8x128xf32>
    %489 = arith.addf %487, %488 : vector<8x128xf32>
    %490 = math.tanh %489 : vector<8x128xf32>
    %491 = arith.mulf %486, %490 : vector<8x128xf32>
    %492 = arith.index_cast %461 : i32 to index
    %c0_129 = arith.constant 0 : index
    %c0_130 = arith.constant 0 : index
    %493 = vector.load %arg6[%492, %c0_129, %c0_130] : memref<8x8x128xf32, #tpu.memory_space<vmem>>, vector<1x8x128xf32>
    %494 = vector.shape_cast %493 : vector<1x8x128xf32> to vector<8x128xf32>
    %495 = vector.shape_cast %491 : vector<8x128xf32> to vector<1x8x128xf32>
    tpu.vector_store %arg6[%492, %c0_129, %c0_130], %495 {strides = array<i32>} : memref<8x8x128xf32, #tpu.memory_space<vmem>>, vector<1x8x128xf32>,
    %c7_i32_131 = arith.constant 7 : i32
    %496 = arith.index_cast %c7_i32_131 : i32 to index
    %c0_132 = arith.constant 0 : index
    %c0_133 = arith.constant 0 : index
    %497 = vector.load %arg1[%496, %c0_132, %c0_133] : memref<8x8x512xf32, #tpu.memory_space<vmem>>, vector<1x8x512xf32>
    %498 = vector.shape_cast %497 : vector<1x8x512xf32> to vector<8x512xf32>
    %cst_134 = arith.constant dense<0.000000e+00> : vector<8x512xf32>
    %499 = tpu.matmul %456, %3, %cst_134 {dimension_numbers = #tpu.dot_dimension_numbers<[1], [0], [0], [1], [0, 0, 1, 1], [], []>} : vector<8x128xf32>, vector<128x512xf32>, vector<8x512xf32> -> vector<8x512xf32>
    %500 = arith.addf %498, %499 : vector<8x512xf32>
    %501 = vector.extract_strided_slice %500 {offsets = [0, 0], sizes = [8, 128], strides = [1, 1]} : vector<8x512xf32> to vector<8x128xf32>
    %502 = arith.negf %501 : vector<8x128xf32>
    %503 = math.exp %502 : vector<8x128xf32>
    %cst_135 = arith.constant 1.000000e+00 : f32
    %504 = vector.broadcast %cst_135 : f32 to vector<8x128xf32>
    %505 = arith.addf %504, %503 : vector<8x128xf32>
    %506 = arith.divf %504, %505 : vector<8x128xf32>
    %507 = vector.extract_strided_slice %500 {offsets = [0, 128], sizes = [8, 128], strides = [1, 1]} : vector<8x512xf32> to vector<8x128xf32>
    %508 = arith.negf %507 : vector<8x128xf32>
    %509 = math.exp %508 : vector<8x128xf32>
    %cst_136 = arith.constant 1.000000e+00 : f32
    %510 = vector.broadcast %cst_136 : f32 to vector<8x128xf32>
    %511 = arith.addf %510, %509 : vector<8x128xf32>
    %512 = arith.divf %510, %511 : vector<8x128xf32>
    %513 = vector.extract_strided_slice %500 {offsets = [0, 256], sizes = [8, 128], strides = [1, 1]} : vector<8x512xf32> to vector<8x128xf32>
    %514 = math.tanh %513 : vector<8x128xf32>
    %515 = vector.extract_strided_slice %500 {offsets = [0, 384], sizes = [8, 128], strides = [1, 1]} : vector<8x512xf32> to vector<8x128xf32>
    %516 = arith.negf %515 : vector<8x128xf32>
    %517 = math.exp %516 : vector<8x128xf32>
    %cst_137 = arith.constant 1.000000e+00 : f32
    %518 = vector.broadcast %cst_137 : f32 to vector<8x128xf32>
    %519 = arith.addf %518, %517 : vector<8x128xf32>
    %520 = arith.divf %518, %519 : vector<8x128xf32>
    %521 = arith.mulf %512, %454 : vector<8x128xf32>
    %522 = arith.mulf %506, %514 : vector<8x128xf32>
    %523 = arith.addf %521, %522 : vector<8x128xf32>
    %524 = math.tanh %523 : vector<8x128xf32>
    %525 = arith.mulf %520, %524 : vector<8x128xf32>
    %526 = arith.index_cast %c7_i32_131 : i32 to index
    %c0_138 = arith.constant 0 : index
    %c0_139 = arith.constant 0 : index
    %527 = vector.load %arg5[%526, %c0_138, %c0_139] : memref<8x8x128xf32, #tpu.memory_space<vmem>>, vector<1x8x128xf32>
    %528 = vector.shape_cast %527 : vector<1x8x128xf32> to vector<8x128xf32>
    %529 = vector.shape_cast %525 : vector<8x128xf32> to vector<1x8x128xf32>
    tpu.vector_store %arg5[%526, %c0_138, %c0_139], %529 {strides = array<i32>} : memref<8x8x128xf32, #tpu.memory_space<vmem>>, vector<1x8x128xf32>,
    %c7_i32_140 = arith.constant 7 : i32
    %530 = arith.subi %c7_i32_140, %c7_i32_131 : i32
    %531 = arith.index_cast %530 : i32 to index
    %c0_141 = arith.constant 0 : index
    %c0_142 = arith.constant 0 : index
    %532 = vector.load %arg2[%531, %c0_141, %c0_142] : memref<8x8x512xf32, #tpu.memory_space<vmem>>, vector<1x8x512xf32>
    %533 = vector.shape_cast %532 : vector<1x8x512xf32> to vector<8x512xf32>
    %cst_143 = arith.constant dense<0.000000e+00> : vector<8x512xf32>
    %534 = tpu.matmul %491, %4, %cst_143 {dimension_numbers = #tpu.dot_dimension_numbers<[1], [0], [0], [1], [0, 0, 1, 1], [], []>} : vector<8x128xf32>, vector<128x512xf32>, vector<8x512xf32> -> vector<8x512xf32>
    %535 = arith.addf %533, %534 : vector<8x512xf32>
    %536 = vector.extract_strided_slice %535 {offsets = [0, 0], sizes = [8, 128], strides = [1, 1]} : vector<8x512xf32> to vector<8x128xf32>
    %537 = arith.negf %536 : vector<8x128xf32>
    %538 = math.exp %537 : vector<8x128xf32>
    %cst_144 = arith.constant 1.000000e+00 : f32
    %539 = vector.broadcast %cst_144 : f32 to vector<8x128xf32>
    %540 = arith.addf %539, %538 : vector<8x128xf32>
    %541 = arith.divf %539, %540 : vector<8x128xf32>
    %542 = vector.extract_strided_slice %535 {offsets = [0, 128], sizes = [8, 128], strides = [1, 1]} : vector<8x512xf32> to vector<8x128xf32>
    %543 = arith.negf %542 : vector<8x128xf32>
    %544 = math.exp %543 : vector<8x128xf32>
    %cst_145 = arith.constant 1.000000e+00 : f32
    %545 = vector.broadcast %cst_145 : f32 to vector<8x128xf32>
    %546 = arith.addf %545, %544 : vector<8x128xf32>
    %547 = arith.divf %545, %546 : vector<8x128xf32>
    %548 = vector.extract_strided_slice %535 {offsets = [0, 256], sizes = [8, 128], strides = [1, 1]} : vector<8x512xf32> to vector<8x128xf32>
    %549 = math.tanh %548 : vector<8x128xf32>
    %550 = vector.extract_strided_slice %535 {offsets = [0, 384], sizes = [8, 128], strides = [1, 1]} : vector<8x512xf32> to vector<8x128xf32>
    %551 = arith.negf %550 : vector<8x128xf32>
    %552 = math.exp %551 : vector<8x128xf32>
    %cst_146 = arith.constant 1.000000e+00 : f32
    %553 = vector.broadcast %cst_146 : f32 to vector<8x128xf32>
    %554 = arith.addf %553, %552 : vector<8x128xf32>
    %555 = arith.divf %553, %554 : vector<8x128xf32>
    %556 = arith.mulf %547, %489 : vector<8x128xf32>
    %557 = arith.mulf %541, %549 : vector<8x128xf32>
    %558 = arith.addf %556, %557 : vector<8x128xf32>
    %559 = math.tanh %558 : vector<8x128xf32>
    %560 = arith.mulf %555, %559 : vector<8x128xf32>
    %561 = arith.index_cast %530 : i32 to index
    %c0_147 = arith.constant 0 : index
    %c0_148 = arith.constant 0 : index
    %562 = vector.load %arg6[%561, %c0_147, %c0_148] : memref<8x8x128xf32, #tpu.memory_space<vmem>>, vector<1x8x128xf32>
    %563 = vector.shape_cast %562 : vector<1x8x128xf32> to vector<8x128xf32>
    %564 = vector.shape_cast %560 : vector<8x128xf32> to vector<1x8x128xf32>
    tpu.vector_store %arg6[%561, %c0_147, %c0_148], %564 {strides = array<i32>} : memref<8x8x128xf32, #tpu.memory_space<vmem>>, vector<1x8x128xf32>,
    %c8_i32 = arith.constant 8 : i32
    %c0_149 = arith.constant 0 : index
    %c0_150 = arith.constant 0 : index
    %c0_151 = arith.constant 0 : index
    %565 = vector.load %arg7[%c0_149, %c0_150, %c0_151] : memref<4x8x128xf32, #tpu.memory_space<vmem>>, vector<1x8x128xf32>
    %566 = vector.shape_cast %565 : vector<1x8x128xf32> to vector<8x128xf32>
    %567 = vector.shape_cast %525 : vector<8x128xf32> to vector<1x8x128xf32>
    tpu.vector_store %arg7[%c0_149, %c0_150, %c0_151], %567 {strides = array<i32>} : memref<4x8x128xf32, #tpu.memory_space<vmem>>, vector<1x8x128xf32>,
    %c1_152 = arith.constant 1 : index
    %c0_153 = arith.constant 0 : index
    %c0_154 = arith.constant 0 : index
    %568 = vector.load %arg7[%c1_152, %c0_153, %c0_154] : memref<4x8x128xf32, #tpu.memory_space<vmem>>, vector<1x8x128xf32>
    %569 = vector.shape_cast %568 : vector<1x8x128xf32> to vector<8x128xf32>
    %570 = vector.shape_cast %523 : vector<8x128xf32> to vector<1x8x128xf32>
    tpu.vector_store %arg7[%c1_152, %c0_153, %c0_154], %570 {strides = array<i32>} : memref<4x8x128xf32, #tpu.memory_space<vmem>>, vector<1x8x128xf32>,
    %c2_155 = arith.constant 2 : index
    %c0_156 = arith.constant 0 : index
    %c0_157 = arith.constant 0 : index
    %571 = vector.load %arg7[%c2_155, %c0_156, %c0_157] : memref<4x8x128xf32, #tpu.memory_space<vmem>>, vector<1x8x128xf32>
    %572 = vector.shape_cast %571 : vector<1x8x128xf32> to vector<8x128xf32>
    %573 = vector.shape_cast %560 : vector<8x128xf32> to vector<1x8x128xf32>
    tpu.vector_store %arg7[%c2_155, %c0_156, %c0_157], %573 {strides = array<i32>} : memref<4x8x128xf32, #tpu.memory_space<vmem>>, vector<1x8x128xf32>,
    %c3_158 = arith.constant 3 : index
    %c0_159 = arith.constant 0 : index
    %c0_160 = arith.constant 0 : index
    %574 = vector.load %arg7[%c3_158, %c0_159, %c0_160] : memref<4x8x128xf32, #tpu.memory_space<vmem>>, vector<1x8x128xf32>
    %575 = vector.shape_cast %574 : vector<1x8x128xf32> to vector<8x128xf32>
    %576 = vector.shape_cast %558 : vector<8x128xf32> to vector<1x8x128xf32>
    tpu.vector_store %arg7[%c3_158, %c0_159, %c0_160], %576 {strides = array<i32>} : memref<4x8x128xf32, #tpu.memory_space<vmem>>, vector<1x8x128xf32>,
    return
  }
  func.func @transform_0(%arg0: i32) -> (i32, i32, i32) {
    %c0_i32 = arith.constant 0 : i32
    %c0_i32_0 = arith.constant 0 : i32
    %c0_i32_1 = arith.constant 0 : i32
    return %arg0, %c0_i32, %c0_i32_0 : i32, i32, i32
  }
  func.func @transform_1(%arg0: i32) -> (i32, i32, i32) {
    %c0_i32 = arith.constant 0 : i32
    %0 = arith.subi %c0_i32, %arg0 : i32
    %c0_i32_0 = arith.constant 0 : i32
    %c0_i32_1 = arith.constant 0 : i32
    %c0_i32_2 = arith.constant 0 : i32
    return %0, %c0_i32_0, %c0_i32_1 : i32, i32, i32
  }
  func.func @transform_2(%arg0: i32) -> (i32, i32) {
    %c0_i32 = arith.constant 0 : i32
    %c0_i32_0 = arith.constant 0 : i32
    %c0_i32_1 = arith.constant 0 : i32
    return %c0_i32, %c0_i32_0 : i32, i32
  }
  func.func @transform_3(%arg0: i32) -> (i32, i32) {
    %c0_i32 = arith.constant 0 : i32
    %c0_i32_0 = arith.constant 0 : i32
    %c0_i32_1 = arith.constant 0 : i32
    return %c0_i32, %c0_i32_0 : i32, i32
  }
  func.func @transform_4(%arg0: i32) -> (i32, i32, i32) {
    %c0_i32 = arith.constant 0 : i32
    %c0_i32_0 = arith.constant 0 : i32
    %c0_i32_1 = arith.constant 0 : i32
    return %arg0, %c0_i32, %c0_i32_0 : i32, i32, i32
  }
  func.func @transform_5(%arg0: i32) -> (i32, i32, i32) {
    %c0_i32 = arith.constant 0 : i32
    %0 = arith.subi %c0_i32, %arg0 : i32
    %c0_i32_0 = arith.constant 0 : i32
    %c0_i32_1 = arith.constant 0 : i32
    %c0_i32_2 = arith.constant 0 : i32
    return %0, %c0_i32_0, %c0_i32_1 : i32, i32, i32
  }
}

</mosaic_0001>

<bundles_post_ra>
// kernel: rnn_decoder_bidi_forward.2
= control target key start
LH: loop header
LB: loop body
LE: loop exit
PB: predicated region body
PF: predicated region fallthrough
CT: control target
= control target key end

     0   :  { %v7013_v3 = vmov 0.0   ;;  %s7007_s2 = inlined_call_operand.vmem [shape: f32[128,512], index: 2, kind: input, shape index: {}]   ;;  %s7008_s3 = inlined_call_operand.vmem [shape: f32[128,512], index: 3, kind: input, shape index: {}]   ;;  %s7009_s0 = inlined_call_operand.vmem [shape: f32[8,8,512], index: 0, kind: input, shape index: {}]   ;;  %s7010_s1 = inlined_call_operand.vmem [shape: f32[8,8,512], index: 1, kind: input, shape index: {}]   ;;  %s7011_s4 = inlined_call_operand.vmem [shape: f32[8,8,128], index: 4, kind: output, shape index: {0}]   ;;  %s7012_s5 = inlined_call_operand.vmem [shape: f32[8,8,128], index: 5, kind: output, shape index: {1}]  }
   0x1   :  { %v3734_v0 = vld [vmem:[%s7007_s2 + $0x1e8] sm:$0xff]  ;;  %v3739_v1 = vld [vmem:[%s7007_s2 + $0x1e0] sm:$0xff]  ;;  %269 = vmatprep.mubr.f32.mxu0 %v7013_v3  ;;  %340 = vmatprep.mubr.f32.mxu1 %v7013_v3  ;;  %v3781_v9 = vld [vmem:[%s7007_s2 + $0x1f8] sm:$0xff] }
   0x2   :  { %v3744_v2 = vld [vmem:[%s7007_s2 + $0x1c8] sm:$0xff]  ;;  %205 = vmatprep.subr.mxu0 %v3734_v0  ;;  %v3752_v4 = vld [vmem:[%s7007_s2 + $0x1c0] sm:$0xff]  ;;  %276 = vmatprep.subr.mxu1 %v3781_v9  ;;  %v3793_v11 = vld [vmem:[%s7007_s2 + $0x1f0] sm:$0xff] }
   0x3   :  { %206 = vmatpush1.msra.mxu0 %v3739_v1  ;;  %v3758_v5 = vld [vmem:[%s7007_s2 + $0x1a8] sm:$0xff]  ;;  %v3764_v6 = vld [vmem:[%s7007_s2 + $0x1a0] sm:$0xff]  ;;  %277 = vmatpush1.msra.mxu1 %v3793_v11  ;;  %v3805_v13 = vld [vmem:[%s7007_s2 + $0x1d8] sm:$0xff] }
   0x4   :  { %207 = vmatprep.subr.mxu0 %v3744_v2  ;;  %v3770_v7 = vld [vmem:[%s7007_s2 + $0x188] sm:$0xff]  ;;  %v3776_v8 = vld [vmem:[%s7007_s2 + $0x180] sm:$0xff]  ;;  %v3810_v14 = vld [vmem:[%s7007_s2 + $0x1d0] sm:$0xff]  ;;  %278 = vmatprep.subr.mxu1 %v3805_v13 }
   0x5   :  { %208 = vmatpush1.msra.mxu0 %v3752_v4  ;;  %v3787_v10 = vld [vmem:[%s7007_s2 + $0x168] sm:$0xff]  ;;  %v3799_v12 = vld [vmem:[%s7007_s2 + $0x160] sm:$0xff]  ;;  %v3822_v16 = vld [vmem:[%s7007_s2 + $0x1b8] sm:$0xff]  ;;  %279 = vmatpush1.msra.mxu1 %v3810_v14 }
   0x6   :  { %209 = vmatprep.subr.mxu0 %v3758_v5  ;;  %v3816_v15 = vld [vmem:[%s7007_s2 + $0x148] sm:$0xff]  ;;  %v3828_v17 = vld [vmem:[%s7007_s2 + $0x140] sm:$0xff]  ;;  %v3834_v18 = vld [vmem:[%s7007_s2 + $0x1b0] sm:$0xff]  ;;  %280 = vmatprep.subr.mxu1 %v3822_v16 }
   0x7   :  { %210 = vmatpush1.msra.mxu0 %v3764_v6  ;;  %v3839_v19 = vld [vmem:[%s7007_s2 + $0x198] sm:$0xff]  ;;  %v3845_v20 = vld [vmem:[%s7007_s2 + $0x128] sm:$0xff]  ;;  %v3851_v21 = vld [vmem:[%s7007_s2 + $0x190] sm:$0xff]  ;;  %281 = vmatpush1.msra.mxu1 %v3834_v18 }
   0x8   :  { %211 = vmatprep.subr.mxu0 %v3770_v7  ;;  %v3857_v22 = vld [vmem:[%s7007_s2 + $0x120] sm:$0xff]  ;;  %v3863_v23 = vld [vmem:[%s7007_s2 + $0x178] sm:$0xff]  ;;  %v3869_v24 = vld [vmem:[%s7007_s2 + $0x108] sm:$0xff]  ;;  %282 = vmatprep.subr.mxu1 %v3839_v19 }
   0x9   :  { %212 = vmatpush1.msra.mxu0 %v3776_v8  ;;  %v3875_v25 = vld [vmem:[%s7007_s2 + $0x170] sm:$0xff]  ;;  %v3881_v26 = vld [vmem:[%s7007_s2 + $0x100] sm:$0xff]  ;;  %283 = vmatpush1.msra.mxu1 %v3851_v21  ;;  %v3887_v27 = vld [vmem:[%s7007_s2 + $0x158] sm:$0xff] }
   0xa   :  { %213 = vmatprep.subr.mxu0 %v3787_v10  ;;  %v3893_v28 = vld [vmem:[%s7007_s2 + $0xe8] sm:$0xff]  ;;  %284 = vmatprep.subr.mxu1 %v3863_v23  ;;  %v3899_v29 = vld [vmem:[%s7007_s2 + $0x150] sm:$0xff]  ;;  %v3905_v30 = vld [vmem:[%s7007_s2 + $0xe0] sm:$0xff] }
   0xb   :  { %214 = vmatpush1.msra.mxu0 %v3799_v12  ;;  %285 = vmatpush1.msra.mxu1 %v3875_v25  ;;  %v3911_v31 = vld [vmem:[%s7007_s2 + $0x138] sm:$0xff]  ;;  %v3917_v32 = vld [vmem:[%s7007_s2 + $0xc8] sm:$0xff]  ;;  %v3923_v33 = vld [vmem:[%s7007_s2 + $0x130] sm:$0xff] }
   0xc   :  { %215 = vmatprep.subr.mxu0 %v3816_v15  ;;  %286 = vmatprep.subr.mxu1 %v3887_v27  ;;  %v3929_v34 = vld [vmem:[%s7007_s2 + $0xc0] sm:$0xff]  ;;  %v3935_v35 = vld [vmem:[%s7007_s2 + $0x118] sm:$0xff]  ;;  %v3941_v36 = vld [vmem:[%s7007_s2 + $0xa8] sm:$0xff] }
   0xd   :  { %216 = vmatpush1.msra.mxu0 %v3828_v17  ;;  %7391 = vst [vmem:[#allocation3_spill] sm:$0xff] %v3929_v34  ;;  %287 = vmatpush1.msra.mxu1 %v3899_v29  ;;  %7392 = vst [vmem:[#allocation4_spill] sm:$0xff] %v3941_v36  ;;  %v3947_v37 = vld [vmem:[%s7007_s2 + $0x110] sm:$0xff]  ;;  %v3953_v38 = vld [vmem:[%s7007_s2 + $0xa0] sm:$0xff] }
   0xe   :  { %217 = vmatprep.subr.mxu0 %v3845_v20  ;;  %288 = vmatprep.subr.mxu1 %v3911_v31  ;;  %7393 = vst [vmem:[#allocation5_spill] sm:$0xff] %v3953_v38  ;;  %v3959_v39 = vld [vmem:[%s7007_s2 + $0xf8] sm:$0xff]  ;;  %v3965_v40 = vld [vmem:[%s7007_s2 + $0x88] sm:$0xff]  ;;  %v3971_v41 = vld [vmem:[%s7007_s2 + $0xf0] sm:$0xff] }
   0xf   :  { %218 = vmatpush1.msra.mxu0 %v3857_v22  ;;  %289 = vmatpush1.msra.mxu1 %v3923_v33  ;;  %7394 = vst [vmem:[#allocation6_spill] sm:$0xff] %v3965_v40  ;;  %v3977_v42 = vld [vmem:[%s7007_s2 + $0x80] sm:$0xff]  ;;  %v3983_v43 = vld [vmem:[%s7007_s2 + $0xd8] sm:$0xff]  ;;  %v3989_v44 = vld [vmem:[%s7007_s2 + $0x68] sm:$0xff] }
  0x10   :  { %219 = vmatprep.subr.mxu0 %v3869_v24  ;;  %290 = vmatprep.subr.mxu1 %v3935_v35  ;;  %7395 = vst [vmem:[#allocation7_spill] sm:$0xff] %v3977_v42  ;;  %7396 = vst [vmem:[#allocation8_spill] sm:$0xff] %v3983_v43  ;;  %v3995_v45 = vld [vmem:[%s7007_s2 + $0xd0] sm:$0xff]  ;;  %v4001_v46 = vld [vmem:[%s7007_s2 + $0x60] sm:$0xff] }
  0x11   :  { %220 = vmatpush1.msra.mxu0 %v3881_v26  ;;  %291 = vmatpush1.msra.mxu1 %v3947_v37  ;;  %7397 = vst [vmem:[#allocation9_spill] sm:$0xff] %v3989_v44  ;;  %7398 = vst [vmem:[#allocation10_spill] sm:$0xff] %v3995_v45  ;;  %v4007_v47 = vld [vmem:[%s7007_s2 + $0xb8] sm:$0xff]  ;;  %v4013_v48 = vld [vmem:[%s7007_s2 + $0x48] sm:$0xff] }
  0x12   :  { %221 = vmatprep.subr.mxu0 %v3893_v28  ;;  %292 = vmatprep.subr.mxu1 %v3959_v39  ;;  %7399 = vst [vmem:[#allocation11_spill] sm:$0xff] %v4001_v46  ;;  %7400 = vst [vmem:[#allocation12_spill] sm:$0xff] %v4007_v47  ;;  %v4019_v49 = vld [vmem:[%s7007_s2 + $0xb0] sm:$0xff]  ;;  %v4025_v50 = vld [vmem:[%s7007_s2 + $0x40] sm:$0xff] }
  0x13   :  { %222 = vmatpush1.msra.mxu0 %v3905_v30  ;;  %293 = vmatpush1.msra.mxu1 %v3971_v41  ;;  %7401 = vst [vmem:[#allocation13_spill] sm:$0xff] %v4013_v48  ;;  %7402 = vst [vmem:[#allocation14_spill] sm:$0xff] %v4019_v49  ;;  %v4031_v51 = vld [vmem:[%s7007_s2 + $0x98] sm:$0xff]  ;;  %v4037_v52 = vld [vmem:[%s7007_s2 + $0x28] sm:$0xff] }
  0x14   :  { %223 = vmatprep.subr.mxu0 %v3917_v32  ;;  %294 = vmatprep.subr.mxu1 %v3983_v43  ;;  %7403 = vst [vmem:[#allocation15_spill] sm:$0xff] %v4025_v50  ;;  %7404 = vst [vmem:[#allocation16_spill] sm:$0xff] %v4031_v51  ;;  %v4043_v53 = vld [vmem:[%s7007_s2 + $0x90] sm:$0xff]  ;;  %v4049_v54 = vld [vmem:[%s7007_s2 + $0x20] sm:$0xff] }
  0x15   :  { %224 = vmatpush1.msra.mxu0 %v3929_v34  ;;  %295 = vmatpush1.msra.mxu1 %v3995_v45  ;;  %7405 = vst [vmem:[#allocation17_spill] sm:$0xff] %v4037_v52  ;;  %7406 = vst [vmem:[#allocation18_spill] sm:$0xff] %v4043_v53  ;;  %v4055_v55 = vld [vmem:[%s7007_s2 + $0x78] sm:$0xff]  ;;  %v4061_v56 = vld [vmem:[%s7007_s2 + $0x8] sm:$0xff] }
  0x16   :  { %225 = vmatprep.subr.mxu0 %v3941_v36  ;;  %296 = vmatprep.subr.mxu1 %v4007_v47  ;;  %7407 = vst [vmem:[#allocation19_spill] sm:$0xff] %v4049_v54  ;;  %7408 = vst [vmem:[#allocation20_spill] sm:$0xff] %v4055_v55  ;;  %v4067_v57 = vld [vmem:[%s7007_s2 + $0x70] sm:$0xff]  ;;  %v4073_v58 = vld [vmem:[%s7007_s2] sm:$0xff] }
  0x17   :  { %226 = vmatpush1.msra.mxu0 %v3953_v38  ;;  %297 = vmatpush1.msra.mxu1 %v4019_v49  ;;  %7409 = vst [vmem:[#allocation21_spill] sm:$0xff] %v4061_v56  ;;  %7410 = vst [vmem:[#allocation22_spill] sm:$0xff] %v4067_v57  ;;  %v4079_v59 = vld [vmem:[%s7007_s2 + $0x58] sm:$0xff]  ;;  %v4085_v60 = vld [vmem:[%s7008_s3 + $0x1e8] sm:$0xff] }
  0x18   :  { %227 = vmatprep.subr.mxu0 %v3965_v40  ;;  %298 = vmatprep.subr.mxu1 %v4031_v51  ;;  %7411 = vst [vmem:[#allocation23_spill] sm:$0xff] %v4073_v58  ;;  %7412 = vst [vmem:[#allocation24_spill] sm:$0xff] %v4079_v59  ;;  %v4092_v61 = vld [vmem:[%s7008_s3 + $0x1e0] sm:$0xff]  ;;  %v4098_v62 = vld [vmem:[%s7007_s2 + $0x50] sm:$0xff] }
  0x19   :  { %228 = vmatpush1.msra.mxu0 %v3977_v42  ;;  %299 = vmatpush1.msra.mxu1 %v4043_v53  ;;  %7413 = vst [vmem:[#allocation25_spill] sm:$0xff] %v4085_v60  ;;  %7414 = vst [vmem:[#allocation26_spill] sm:$0xff] %v4092_v61  ;;  %v4104_v63 = vld [vmem:[%s7008_s3 + $0x1c8] sm:$0xff]  ;;  %v4110_v3 = vld [vmem:[%s7007_s2 + $0x38] sm:$0xff] }
  0x1a   :  { %229 = vmatprep.subr.mxu0 %v3989_v44  ;;  %300 = vmatprep.subr.mxu1 %v4055_v55  ;;  %7415 = vst [vmem:[#allocation27_spill] sm:$0xff] %v4098_v62  ;;  %7416 = vst [vmem:[#allocation28_spill] sm:$0xff] %v4104_v63 }
  0x1b   :  { %230 = vmatpush1.msra.mxu0 %v4001_v46  ;;  %301 = vmatpush1.msra.mxu1 %v4067_v57  ;;  %7417 = vst [vmem:[#allocation29_spill] sm:$0xff] %v4110_v3  ;;  %v4122_v57 = vld [vmem:[%s7007_s2 + $0x30] sm:$0xff] }
  0x1c   :  { %231 = vmatprep.subr.mxu0 %v4013_v48  ;;  %302 = vmatprep.subr.mxu1 %v4079_v59  ;;  %7420 = vst [vmem:[#allocation31_spill] sm:$0xff] %v4122_v57  ;;  %v4128_v59 = vld [vmem:[%s7008_s3 + $0x1a8] sm:$0xff] }
  0x1d   :  { %232 = vmatpush1.msra.mxu0 %v4025_v50  ;;  %7421 = vst [vmem:[#allocation32_spill] sm:$0xff] %v4128_v59  ;;  %303 = vmatpush1.msra.mxu1 %v4098_v62  ;;  %v4152_v62 = vld [vmem:[%s7008_s3 + $0x188] sm:$0xff] }
  0x1e   :  { %233 = vmatprep.subr.mxu0 %v4037_v52  ;;  %304 = vmatprep.subr.mxu1 %v4110_v3  ;;  %7425 = vst [vmem:[#allocation36_spill] sm:$0xff] %v4152_v62  ;;  %v4164_v3 = vld [vmem:[%s7008_s3 + $0x180] sm:$0xff] }
  0x1f   :  { %234 = vmatpush1.msra.mxu0 %v4049_v54  ;;  %v4140_v54 = vld [vmem:[%s7008_s3 + $0x1a0] sm:$0xff]  ;;  %305 = vmatpush1.msra.mxu1 %v4122_v57  ;;  %7427 = vst [vmem:[#allocation38_spill] sm:$0xff] %v4164_v3  ;;  %v4219_v57 = vld [vmem:[%s7008_s3 + $0x128] sm:$0xff] }
  0x20   :  { %235 = vmatprep.subr.mxu0 %v4061_v56  ;;  %v7418_v56 = vmov 0.0   ;;  %7423 = vst [vmem:[#allocation34_spill] sm:$0xff] %v4140_v54  ;;  %7436 = vst [vmem:[#allocation47_spill] sm:$0xff] %v4219_v57 }
  0x21   :  { %236 = vmatpush1.msra.mxu0 %v4073_v58  ;;  %v4117_v58 = vld [vmem:[%s7008_s3 + $0x1c0] sm:$0xff] }
  0x22   :  { %270 = vmatmul.mubr.f32.vlgmr.msra.gmra.mxu0 %v7418_v56  ;;  %381 = vmatprep.subr.mxu0 %v4085_v60  ;;  %7419 = vst [vmem:[#allocation30_spill] sm:$0xff] %v4117_v58  ;;  %v4134_v60 = vld [vmem:[%s7007_s2 + $0x18] sm:$0xff] }
  0x23   :  { %382 = vmatpush1.msra.mxu0 %v4092_v61  ;;  %7422 = vst [vmem:[#allocation33_spill] sm:$0xff] %v4134_v60  ;;  %v4146_v61 = vld [vmem:[%s7007_s2 + $0x10] sm:$0xff]  ;;  %306 = vmatprep.subr.mxu1 %v4134_v60  ;;  %v4183_v60 = vld [vmem:[%s7008_s3 + $0x160] sm:$0xff] }
  0x24   :  { %383 = vmatprep.subr.mxu0 %v4104_v63  ;;  %7424 = vst [vmem:[#allocation35_spill] sm:$0xff] %v4146_v61  ;;  %v4158_v63 = vld [vmem:[%s7008_s3 + $0x1f8] sm:$0xff]  ;;  %307 = vmatpush1.msra.mxu1 %v4146_v61  ;;  %7430 = vst [vmem:[#allocation41_spill] sm:$0xff] %v4183_v60  ;;  %v4195_v61 = vld [vmem:[%s7008_s3 + $0x148] sm:$0xff] }
  0x25   :  { %384 = vmatpush1.msra.mxu0 %v4117_v58  ;;  %7426 = vst [vmem:[#allocation37_spill] sm:$0xff] %v4158_v63  ;;  %v4171_v58 = vld [vmem:[%s7008_s3 + $0x168] sm:$0xff]  ;;  %452 = vmatprep.subr.mxu1 %v4158_v63  ;;  %7432 = vst [vmem:[#allocation43_spill] sm:$0xff] %v4195_v61  ;;  %v4207_v63 = vld [vmem:[%s7008_s3 + $0x140] sm:$0xff] }
  0x26   :  { %385 = vmatprep.subr.mxu0 %v4128_v59  ;;  %7428 = vst [vmem:[#allocation39_spill] sm:$0xff] %v4171_v58  ;;  %v4177_v59 = vld [vmem:[%s7008_s3 + $0x1f0] sm:$0xff]  ;;  %341 = vmatmul.mubr.f32.vlgmr.msra.gmra.mxu1 %v7418_v56  ;;  %7434 = vst [vmem:[#allocation45_spill] sm:$0xff] %v4207_v63 }
  0x27   :  { %386 = vmatpush1.msra.mxu0 %v4140_v54  ;;  %7429 = vst [vmem:[#allocation40_spill] sm:$0xff] %v4177_v59  ;;  %v4189_v54 = vld [vmem:[%s7008_s3 + $0x1d8] sm:$0xff]  ;;  %453 = vmatpush1.msra.mxu1 %v4177_v59  ;;  %v4231_v59 = vld [vmem:[%s7008_s3 + $0x120] sm:$0xff] }
  0x28   :  { %387 = vmatprep.subr.mxu0 %v4152_v62  ;;  %7431 = vst [vmem:[#allocation42_spill] sm:$0xff] %v4189_v54  ;;  %v4201_v62 = vld [vmem:[%s7008_s3 + $0x1d0] sm:$0xff]  ;;  %454 = vmatprep.subr.mxu1 %v4189_v54  ;;  %7438 = vst [vmem:[#allocation49_spill] sm:$0xff] %v4231_v59  ;;  %v4243_v54 = vld [vmem:[%s7008_s3 + $0x108] sm:$0xff] }
  0x29   :  { %388 = vmatpush1.msra.mxu0 %v4164_v3  ;;  %7433 = vst [vmem:[#allocation44_spill] sm:$0xff] %v4201_v62  ;;  %v4213_v3 = vld [vmem:[%s7008_s3 + $0x1b8] sm:$0xff]  ;;  %455 = vmatpush1.msra.mxu1 %v4201_v62  ;;  %7440 = vst [vmem:[#allocation51_spill] sm:$0xff] %v4243_v54  ;;  %v4255_v62 = vld [vmem:[%s7008_s3 + $0x100] sm:$0xff] }
  0x2a   :  { %389 = vmatprep.subr.mxu0 %v4171_v58  ;;  %7435 = vst [vmem:[#allocation46_spill] sm:$0xff] %v4213_v3  ;;  %v4225_v58 = vld [vmem:[%s7008_s3 + $0x1b0] sm:$0xff]  ;;  %456 = vmatprep.subr.mxu1 %v4213_v3  ;;  %7442 = vst [vmem:[#allocation53_spill] sm:$0xff] %v4255_v62  ;;  %v4267_v3 = vld [vmem:[%s7008_s3 + $0xe8] sm:$0xff] }
  0x2b   :  { %390 = vmatpush1.msra.mxu0 %v4183_v60  ;;  %7437 = vst [vmem:[#allocation48_spill] sm:$0xff] %v4225_v58  ;;  %v4237_v60 = vld [vmem:[%s7008_s3 + $0x198] sm:$0xff]  ;;  %457 = vmatpush1.msra.mxu1 %v4225_v58  ;;  %7444 = vst [vmem:[#allocation55_spill] sm:$0xff] %v4267_v3  ;;  %v4279_v58 = vld [vmem:[%s7008_s3 + $0xe0] sm:$0xff] }
  0x2c   :  { %391 = vmatprep.subr.mxu0 %v4195_v61  ;;  %7439 = vst [vmem:[#allocation50_spill] sm:$0xff] %v4237_v60  ;;  %v4249_v61 = vld [vmem:[%s7008_s3 + $0x190] sm:$0xff]  ;;  %458 = vmatprep.subr.mxu1 %v4237_v60  ;;  %7446 = vst [vmem:[#allocation57_spill] sm:$0xff] %v4279_v58  ;;  %v4291_v60 = vld [vmem:[%s7008_s3 + $0xc8] sm:$0xff] }
  0x2d   :  { %392 = vmatpush1.msra.mxu0 %v4207_v63  ;;  %7441 = vst [vmem:[#allocation52_spill] sm:$0xff] %v4249_v61  ;;  %v4261_v63 = vld [vmem:[%s7008_s3 + $0x178] sm:$0xff]  ;;  %459 = vmatpush1.msra.mxu1 %v4249_v61  ;;  %7448 = vst [vmem:[#allocation59_spill] sm:$0xff] %v4291_v60  ;;  %v4303_v61 = vld [vmem:[%s7008_s3 + $0xc0] sm:$0xff] }
  0x2e   :  { %393 = vmatprep.subr.mxu0 %v4219_v57  ;;  %7443 = vst [vmem:[#allocation54_spill] sm:$0xff] %v4261_v63  ;;  %v4273_v57 = vld [vmem:[%s7008_s3 + $0x170] sm:$0xff]  ;;  %460 = vmatprep.subr.mxu1 %v4261_v63  ;;  %7450 = vst [vmem:[#allocation61_spill] sm:$0xff] %v4303_v61  ;;  %v4315_v63 = vld [vmem:[%s7008_s3 + $0xa8] sm:$0xff] }
  0x2f   :  { %394 = vmatpush1.msra.mxu0 %v4231_v59  ;;  %7445 = vst [vmem:[#allocation56_spill] sm:$0xff] %v4273_v57  ;;  %v4285_v59 = vld [vmem:[%s7008_s3 + $0x158] sm:$0xff]  ;;  %461 = vmatpush1.msra.mxu1 %v4273_v57  ;;  %7452 = vst [vmem:[#allocation63_spill] sm:$0xff] %v4315_v63  ;;  %v4327_v57 = vld [vmem:[%s7008_s3 + $0xa0] sm:$0xff] }
  0x30   :  { %395 = vmatprep.subr.mxu0 %v4243_v54  ;;  %7447 = vst [vmem:[#allocation58_spill] sm:$0xff] %v4285_v59  ;;  %v4297_v54 = vld [vmem:[%s7008_s3 + $0x150] sm:$0xff]  ;;  %462 = vmatprep.subr.mxu1 %v4285_v59  ;;  %7454 = vst [vmem:[#allocation65_spill] sm:$0xff] %v4327_v57  ;;  %v4339_v59 = vld [vmem:[%s7008_s3 + $0x88] sm:$0xff] }
  0x31   :  { %396 = vmatpush1.msra.mxu0 %v4255_v62  ;;  %7449 = vst [vmem:[#allocation60_spill] sm:$0xff] %v4297_v54  ;;  %v4309_v62 = vld [vmem:[%s7008_s3 + $0x138] sm:$0xff]  ;;  %463 = vmatpush1.msra.mxu1 %v4297_v54  ;;  %7456 = vst [vmem:[#allocation67_spill] sm:$0xff] %v4339_v59  ;;  %v4394_v54 = vld [vmem:[%s7008_s3 + $0x40] sm:$0xff] }
  0x32   :  { %397 = vmatprep.subr.mxu0 %v4267_v3  ;;  %7451 = vst [vmem:[#allocation62_spill] sm:$0xff] %v4309_v62  ;;  %v4321_v3 = vld [vmem:[%s7008_s3 + $0x130] sm:$0xff]  ;;  %464 = vmatprep.subr.mxu1 %v4309_v62  ;;  %v4358_v62 = vld [vmem:[%s7008_s3 + $0x68] sm:$0xff]  ;;  %7465 = vst [vmem:[#allocation76_spill] sm:$0xff] %v4394_v54 }
  0x33   :  { %398 = vmatpush1.msra.mxu0 %v4279_v58  ;;  %7453 = vst [vmem:[#allocation64_spill] sm:$0xff] %v4321_v3  ;;  %v4333_v58 = vld [vmem:[%s7008_s3 + $0x118] sm:$0xff]  ;;  %465 = vmatpush1.msra.mxu1 %v4321_v3  ;;  %7459 = vst [vmem:[#allocation70_spill] sm:$0xff] %v4358_v62  ;;  %v4370_v3 = vld [vmem:[%s7008_s3 + $0x60] sm:$0xff] }
  0x34   :  { %399 = vmatprep.subr.mxu0 %v4291_v60  ;;  %7455 = vst [vmem:[#allocation66_spill] sm:$0xff] %v4333_v58  ;;  %v4346_v60 = vld [vmem:[%s7008_s3 + $0x80] sm:$0xff]  ;;  %466 = vmatprep.subr.mxu1 %v4333_v58  ;;  %7461 = vst [vmem:[#allocation72_spill] sm:$0xff] %v4370_v3  ;;  %v4382_v58 = vld [vmem:[%s7008_s3 + $0x48] sm:$0xff] }
  0x35   :  { %400 = vmatpush1.msra.mxu0 %v4303_v61  ;;  %7457 = vst [vmem:[#allocation68_spill] sm:$0xff] %v4346_v60  ;;  %v4352_v61 = vld [vmem:[%s7008_s3 + $0x110] sm:$0xff]  ;;  %445 = vmatprep.mubr.f32.mxu0 %v7418_v56  ;;  %7463 = vst [vmem:[#allocation74_spill] sm:$0xff] %v4382_v58 }
  0x36   :  { %401 = vmatprep.subr.mxu0 %v4315_v63  ;;  %7458 = vst [vmem:[#allocation69_spill] sm:$0xff] %v4352_v61  ;;  %v4364_v63 = vld [vmem:[%s7008_s3 + $0xf8] sm:$0xff]  ;;  %467 = vmatpush1.msra.mxu1 %v4352_v61  ;;  %v4406_v61 = vld [vmem:[%s7008_s3 + $0x28] sm:$0xff] }
  0x37   :  { %402 = vmatpush1.msra.mxu0 %v4327_v57  ;;  %7460 = vst [vmem:[#allocation71_spill] sm:$0xff] %v4364_v63  ;;  %v4376_v57 = vld [vmem:[%s7008_s3 + $0xf0] sm:$0xff]  ;;  %468 = vmatprep.subr.mxu1 %v4364_v63  ;;  %7467 = vst [vmem:[#allocation78_spill] sm:$0xff] %v4406_v61  ;;  %v4418_v63 = vld [vmem:[%s7008_s3 + $0x20] sm:$0xff] }
  0x38   :  { %403 = vmatprep.subr.mxu0 %v4339_v59  ;;  %7462 = vst [vmem:[#allocation73_spill] sm:$0xff] %v4376_v57  ;;  %v4388_v59 = vld [vmem:[%s7008_s3 + $0xd8] sm:$0xff]  ;;  %469 = vmatpush1.msra.mxu1 %v4376_v57  ;;  %7469 = vst [vmem:[#allocation80_spill] sm:$0xff] %v4418_v63  ;;  %v4430_v57 = vld [vmem:[%s7008_s3 + $0x8] sm:$0xff] }
  0x39   :  { %404 = vmatpush1.msra.mxu0 %v4346_v60  ;;  %7464 = vst [vmem:[#allocation75_spill] sm:$0xff] %v4388_v59  ;;  %v4400_v60 = vld [vmem:[%s7008_s3 + $0xd0] sm:$0xff]  ;;  %470 = vmatprep.subr.mxu1 %v4388_v59  ;;  %7471 = vst [vmem:[#allocation82_spill] sm:$0xff] %v4430_v57  ;;  %v4442_v59 = vld [vmem:[%s7008_s3] sm:$0xff] }
  0x3a   :  { %405 = vmatprep.subr.mxu0 %v4358_v62  ;;  %7466 = vst [vmem:[#allocation77_spill] sm:$0xff] %v4400_v60  ;;  %v4412_v62 = vld [vmem:[%s7008_s3 + $0xb8] sm:$0xff]  ;;  %471 = vmatpush1.msra.mxu1 %v4400_v60  ;;  %7473 = vst [vmem:[#allocation84_spill] sm:$0xff] %v4442_v59 }
  0x3b   :  { %406 = vmatpush1.msra.mxu0 %v4370_v3  ;;  %7468 = vst [vmem:[#allocation79_spill] sm:$0xff] %v4412_v62  ;;  %v4424_v3 = vld [vmem:[%s7008_s3 + $0xb0] sm:$0xff]  ;;  %472 = vmatprep.subr.mxu1 %v4412_v62 }
  0x3c   :  { %407 = vmatprep.subr.mxu0 %v4382_v58  ;;  %7470 = vst [vmem:[#allocation81_spill] sm:$0xff] %v4424_v3  ;;  %v4436_v58 = vld [vmem:[%s7008_s3 + $0x98] sm:$0xff]  ;;  %473 = vmatpush1.msra.mxu1 %v4424_v3  ;;  %v4462_v62 = vld [vmem:[%s7008_s3 + $0x70] sm:$0xff] }
  0x3d   :  { %408 = vmatpush1.msra.mxu0 %v4394_v54  ;;  %7472 = vst [vmem:[#allocation83_spill] sm:$0xff] %v4436_v58  ;;  %v4448_v54 = vld [vmem:[%s7008_s3 + $0x90] sm:$0xff]  ;;  %474 = vmatprep.subr.mxu1 %v4436_v58  ;;  %7476 = vst [vmem:[#allocation87_spill] sm:$0xff] %v4462_v62 }
  0x3e   :  { %409 = vmatprep.subr.mxu0 %v4406_v61  ;;  %7474 = vst [vmem:[#allocation85_spill] sm:$0xff] %v4448_v54  ;;  %v4455_v61 = vld [vmem:[%s7008_s3 + $0x78] sm:$0xff]  ;;  %475 = vmatpush1.msra.mxu1 %v4448_v54 }
  0x3f   :  { %410 = vmatpush1.msra.mxu0 %v4418_v63  ;;  %7475 = vst [vmem:[#allocation86_spill] sm:$0xff] %v4455_v61  ;;  %v4469_v63 = vld [vmem:[%s7008_s3 + $0x58] sm:$0xff]  ;;  %476 = vmatprep.subr.mxu1 %v4455_v61  ;;  %v4489_v61 = vld [vmem:[%s7008_s3 + $0x30] sm:$0xff] }
  0x40   :  { %411 = vmatprep.subr.mxu0 %v4430_v57  ;;  %7477 = vst [vmem:[#allocation88_spill] sm:$0xff] %v4469_v63  ;;  %v4476_v57 = vld [vmem:[%s7008_s3 + $0x50] sm:$0xff]  ;;  %477 = vmatpush1.msra.mxu1 %v4462_v62  ;;  %v4496_v62 = vld [vmem:[%s7008_s3 + $0x18] sm:$0xff] }
  0x41   :  { %412 = vmatpush1.msra.mxu0 %v4442_v59  ;;  %v4482_v59 = vld [vmem:[%s7008_s3 + $0x38] sm:$0xff]  ;;  %516 = vmatprep.mubr.f32.mxu1 %v7418_v56 }
  0x42   :  { %446 = vmatmul.mubr.f32.vlgmr.msra.gmra.mxu0 %v7418_v56  ;;  %478 = vmatprep.subr.mxu1 %v4469_v63  ;;  %v4503_v63 = vld [vmem:[%s7008_s3 + $0x10] sm:$0xff] }
  0x43   :  { %558 = vmatprep.subr.mxu0 %v3734_v0  ;;  %479 = vmatpush1.msra.mxu1 %v4476_v57 }
  0x44   :  { %559 = vmatpush1.msra.mxu0 %v3739_v1  ;;  %480 = vmatprep.subr.mxu1 %v4482_v59 }
  0x45   :  { %560 = vmatprep.subr.mxu0 %v3744_v2  ;;  %481 = vmatpush1.msra.mxu1 %v4489_v61 }
  0x46   :  { %561 = vmatpush1.msra.mxu0 %v3752_v4  ;;  %482 = vmatprep.subr.mxu1 %v4496_v62 }
  0x47   :  { %562 = vmatprep.subr.mxu0 %v3758_v5  ;;  %483 = vmatpush1.msra.mxu1 %v4503_v63 }
  0x48   :  { %563 = vmatpush1.msra.mxu0 %v3764_v6  ;;  %517 = vmatmul.mubr.f32.vlgmr.msra.gmra.mxu1 %v7418_v56 }
  0x49   :  { %629 = vmatprep.subr.mxu1 %v3781_v9  ;;  %564 = vmatprep.subr.mxu0 %v3770_v7 }
  0x4a   :  { %630 = vmatpush1.msra.mxu1 %v3793_v11  ;;  %565 = vmatpush1.msra.mxu0 %v3776_v8 }
  0x4b   :  { %631 = vmatprep.subr.mxu1 %v3805_v13  ;;  %566 = vmatprep.subr.mxu0 %v3787_v10 }
  0x4c   :  { %632 = vmatpush1.msra.mxu1 %v3810_v14  ;;  %567 = vmatpush1.msra.mxu0 %v3799_v12 }
  0x4d   :  { %633 = vmatprep.subr.mxu1 %v3822_v16  ;;  %568 = vmatprep.subr.mxu0 %v3816_v15 }
  0x4e   :  { %634 = vmatpush1.msra.mxu1 %v3834_v18  ;;  %569 = vmatpush1.msra.mxu0 %v3828_v17 }
  0x4f   :  { %635 = vmatprep.subr.mxu1 %v3839_v19  ;;  %570 = vmatprep.subr.mxu0 %v3845_v20 }
  0x50   :  { %636 = vmatpush1.msra.mxu1 %v3851_v21  ;;  %571 = vmatpush1.msra.mxu0 %v3857_v22 }
  0x51   :  { %637 = vmatprep.subr.mxu1 %v3863_v23  ;;  %572 = vmatprep.subr.mxu0 %v3869_v24 }
  0x52   :  { %638 = vmatpush1.msra.mxu1 %v3875_v25  ;;  %573 = vmatpush1.msra.mxu0 %v3881_v26 }
  0x53   :  { %639 = vmatprep.subr.mxu1 %v3887_v27  ;;  %574 = vmatprep.subr.mxu0 %v3893_v28 }
  0x54   :  { %640 = vmatpush1.msra.mxu1 %v3899_v29  ;;  %575 = vmatpush1.msra.mxu0 %v3905_v30 }
  0x55   :  { %641 = vmatprep.subr.mxu1 %v3911_v31  ;;  %576 = vmatprep.subr.mxu0 %v3917_v32 }
  0x56   :  { %642 = vmatpush1.msra.mxu1 %v3923_v33  ;;  %577 = vmatpush1.msra.mxu0 %v3929_v34 }
  0x57   :  { %643 = vmatprep.subr.mxu1 %v3935_v35  ;;  %578 = vmatprep.subr.mxu0 %v3941_v36 }
  0x58   :  { %644 = vmatpush1.msra.mxu1 %v3947_v37  ;;  %579 = vmatpush1.msra.mxu0 %v3953_v38 }
  0x59   :  { %645 = vmatprep.subr.mxu1 %v3959_v39  ;;  %580 = vmatprep.subr.mxu0 %v3965_v40  ;;  %v7480_v40 = vld [vmem:[#allocation21_spill] sm:$0xff] }
  0x5a   :  { %646 = vmatpush1.msra.mxu1 %v3971_v41  ;;  %581 = vmatpush1.msra.mxu0 %v3977_v42  ;;  %v7478_v42 = vld [vmem:[#allocation19_spill] sm:$0xff] }
  0x5b   :  { %647 = vmatprep.subr.mxu1 %v3983_v43  ;;  %582 = vmatprep.subr.mxu0 %v3989_v44  ;;  %v7479_v44 = vld [vmem:[#allocation22_spill] sm:$0xff] }
  0x5c   :  { %648 = vmatpush1.msra.mxu1 %v3995_v45  ;;  %583 = vmatpush1.msra.mxu0 %v4001_v46  ;;  %v7481_v46 = vld [vmem:[#allocation24_spill] sm:$0xff] }
  0x5d   :  { %649 = vmatprep.subr.mxu1 %v4007_v47  ;;  %584 = vmatprep.subr.mxu0 %v4013_v48  ;;  %v7483_v48 = vld [vmem:[#allocation27_spill] sm:$0xff]  ;;  %v203_v47 = vld [vmem:[%s7009_s0 + $0x10] sm:$0xff] }
  0x5e   :  { %650 = vmatpush1.msra.mxu1 %v4019_v49  ;;  %585 = vmatpush1.msra.mxu0 %v4025_v50  ;;  %v7482_v49 = vld [vmem:[#allocation23_spill] sm:$0xff]  ;;  %v7484_v50 = vld [vmem:[#allocation29_spill] sm:$0xff] }
  0x5f   :  { %651 = vmatprep.subr.mxu1 %v4031_v51  ;;  %586 = vmatprep.subr.mxu0 %v4037_v52  ;;  %v7485_v52 = vld [vmem:[#allocation31_spill] sm:$0xff] }
  0x60   :  { %652 = vmatpush1.msra.mxu1 %v4043_v53  ;;  %587 = vmatpush1.msra.mxu0 %v7478_v42  ;;  %v7487_v42 = vld [vmem:[#allocation33_spill] sm:$0xff] }
  0x61   :  { %653 = vmatprep.subr.mxu1 %v4055_v55  ;;  %588 = vmatprep.subr.mxu0 %v7480_v40  ;;  %v7486_v55 = vld [vmem:[#allocation25_spill] sm:$0xff] }
  0x62   :  { %654 = vmatpush1.msra.mxu1 %v7479_v44  ;;  %589 = vmatpush1.msra.mxu0 %v7482_v49  ;;  %v7488_v44 = vld [vmem:[#allocation35_spill] sm:$0xff]  ;;  %v7489_v40 = vld [vmem:[#allocation37_spill] sm:$0xff] }
  0x63   :  { %655 = vmatprep.subr.mxu1 %v7481_v46  ;;  %622 = vmatprep.mubr.f32.mxu0 %v7418_v56  ;;  %v201_v49 = vld [vmem:[%s7009_s0] sm:$0xff] }
  0x64   :  { %656 = vmatpush1.msra.mxu1 %v7483_v48  ;;  %693 = vmatprep.mubr.f32.mxu1 %v7418_v56 }
  0x65   :  { %657 = vmatprep.subr.mxu1 %v7484_v50  ;;  %735 = vmatprep.subr.mxu0 %v7486_v55  ;;  %v202_v50 = vld [vmem:[%s7009_s0 + $0x8] sm:$0xff] }
  0x66   :  { %658 = vmatpush1.msra.mxu1 %v7485_v52 }
  0x67   :  { %659 = vmatprep.subr.mxu1 %v7487_v42 }
  0x68   :  { %660 = vmatpush1.msra.mxu1 %v7488_v44 }
  0x69   :  { %806 = vmatprep.subr.mxu1 %v7489_v40  ;;  %v204_v40 = vld [vmem:[%s7009_s0 + $0x18] sm:$0xff] }
  0xe2   :  { %v271_v48 = vpop.f32.mrf.mxu0 }
  0xe3   :  { %v347_v46 = vadd.f32 %v271_v48, %v201_v49 }
  0xe4   :  { %v273_v53 = vpop.f32.mrf.mxu0 }
  0xe5   :  { %v3069_v52 = vmul.f32 -1.442695, %v347_v46  ;;  %v348_v51 = vadd.f32 %v273_v53, %v202_v50 }
  0xe6   :  { %v342_v42 = vpop.f32.mrf.mxu1 }
  0xe7   :  { %3188 = vpow2.f32 %v3069_v52  ;;  %v3070_v55 = vmul.f32 -1.442695, %v348_v51  ;;  %v349_v45 = vadd.f32 %v342_v42, %v203_v47  ;;  %v3072_v51 = vld [vmem:[%s7010_s1 + $0xe0] sm:$0xff] }
  0xe8   :  { %v344_v44 = vpop.f32.mrf.mxu1 }
  0xe9   :  { %3190 = vpow2.f32 %v3070_v55  ;;  %v350_v38 = vadd.f32 %v344_v44, %v204_v40 }
  0xeb   :  { %v3071_v36 = vmul.f32 -1.442695, %v350_v38  ;;  %v3073_v38 = vld [vmem:[%s7010_s1 + $0xe8] sm:$0xff] }
  0xed   :  { %3192 = vpow2.f32 %v3071_v36 }
  0xee   :  { %3194 = vtanh.f32 %v349_v45 }
  0xf4   :  { %v3189_v48 = vpop.eup %3188 }
  0xf5   :  { %v354_v46 = vadd.f32 1.0, %v3189_v48 }
  0xf6   :  { %v3191_v49 = vpop.eup %3190 }
  0xf7   :  { %3196 = vrcp.f32 %v354_v46  ;;  %v360_v50 = vadd.f32 1.0, %v3191_v49 }
  0xf9   :  { %3198 = vrcp.f32 %v360_v50 }
  0xfa   :  { %v3193_v52 = vpop.eup %3192 }
  0xfb   :  { %v3195_v40 = vpop.eup %3194  ;;  %v367_v36 = vadd.f32 1.0, %v3193_v52 }
 0x102   :  { %v447_v44 = vpop.f32.mrf.mxu0 }
 0x103   :  { %v523_v42 = vadd.f32 %v3072_v51, %v447_v44  ;;  %v3075_v51 = vld [vmem:[%s7010_s1 + $0xf8] sm:$0xff] }
 0x104   :  { %v3197_v47 = vpop.eup %3196  ;;  %v449_v53 = vpop.f32.mrf.mxu0 }
 0x105   :  { %v371_v45 = vmul.f32 %v3197_v47, %v3195_v40  ;;  %v3076_v55 = vmul.f32 -1.442695, %v523_v42  ;;  %v524_v48 = vadd.f32 %v3073_v38, %v449_v53  ;;  %v3074_v40 = vld [vmem:[%s7010_s1 + $0xf0] sm:$0xff] }
 0x106   :  { %v3199_v46 = vpop.eup %3198 }
 0x107   :  { %v370_v49 = vmul.f32 0.0, %v3199_v46  ;;  %3200 = vpow2.f32 %v3076_v55  ;;  %v3077_v50 = vmul.f32 -1.442695, %v524_v48 }
 0x108   :  { %3202 = vrcp.f32 %v367_v36  ;;  %v518_v43 = vpop.f32.mrf.mxu1 }
 0x109   :  { %v4593_v34 = vadd.f32 %v371_v45, %v370_v49  ;;  %3204 = vpow2.f32 %v3077_v50  ;;  %v525_v38 = vadd.f32 %v3074_v40, %v518_v43  ;;  %v7490_v49 = vld [vmem:[#allocation26_spill] sm:$0xff]  ;;  %v7491_v43 = vld [vmem:[#allocation40_spill] sm:$0xff] }
 0x10a   :  { %v520_v52 = vpop.f32.mrf.mxu1  ;;  %v7492_v50 = vld [vmem:[#allocation28_spill] sm:$0xff] }
 0x10b   :  { %3206 = vtanh.f32 %v4593_v34  ;;  %v526_v44 = vadd.f32 %v3075_v51, %v520_v52  ;;  %v7493_v51 = vld [vmem:[#allocation42_spill] sm:$0xff]  ;;  %v7495_v40 = vld [vmem:[#allocation44_spill] sm:$0xff] }
 0x10c   :  { %3208 = vtanh.f32 %v525_v38  ;;  %v7494_v52 = vld [vmem:[#allocation30_spill] sm:$0xff] }
 0x10d   :  { %v3078_v42 = vmul.f32 -1.442695, %v526_v44  ;;  %v7496_v44 = vld [vmem:[#allocation32_spill] sm:$0xff]  ;;  %v7497_v38 = vld [vmem:[#allocation46_spill] sm:$0xff] }
 0x10f   :  { %3210 = vpow2.f32 %v3078_v42  ;;  %v7498_v42 = vld [vmem:[#allocation34_spill] sm:$0xff] }
 0x114   :  { %v3201_v47 = vpop.eup %3200 }
 0x115   :  { %v3203_v36 = vpop.eup %3202  ;;  %v530_v53 = vadd.f32 1.0, %v3201_v47  ;;  %v7499_v47 = vld [vmem:[#allocation48_spill] sm:$0xff] }
 0x116   :  { %v3205_v45 = vpop.eup %3204 }
 0x117   :  { %3212 = vrcp.f32 %v530_v53  ;;  %v536_v55 = vadd.f32 1.0, %v3205_v45  ;;  %v7501_v53 = vld [vmem:[#allocation50_spill] sm:$0xff] }
 0x118   :  { %v3207_v48 = vpop.eup %3206 }
 0x119   :  { %3214 = vrcp.f32 %v536_v55  ;;  %v374_v46 = vmul.f32 %v3207_v48, %v3203_v36  ;;  %v7500_v36 = vld [vmem:[#allocation36_spill] sm:$0xff]  ;;  %v3209_v45 = vpop.eup %3208  ;;  %v7502_v55 = vld [vmem:[#allocation38_spill] sm:$0xff] }
 0x11a   :  { %v7503_v48 = vld [vmem:[#allocation52_spill] sm:$0xff] }
 0x11b   :  { %375 = vst [vmem:[%s7011_s4] sm:$0xff] %v374_v46  ;;  %623 = vmatmul.mubr.f32.vlgmr.msra.gmra.mxu0 %v374_v46  ;;  %694 = vmatmul.mubr.f32.vlgmr.msra.gmra.mxu1 %v374_v46 }
 0x11c   :  { %736 = vmatpush1.msra.mxu0 %v7490_v49  ;;  %807 = vmatpush1.msra.mxu1 %v7491_v43  ;;  %v3211_v46 = vpop.eup %3210  ;;  %v7514_v49 = vld [vmem:[#allocation49_spill] sm:$0xff] }
 0x11d   :  { %737 = vmatprep.subr.mxu0 %v7492_v50  ;;  %808 = vmatprep.subr.mxu1 %v7493_v51  ;;  %v543_v51 = vadd.f32 1.0, %v3211_v46  ;;  %v7510_v50 = vld [vmem:[#allocation45_spill] sm:$0xff] }
 0x11e   :  { %738 = vmatpush1.msra.mxu0 %v7494_v52  ;;  %809 = vmatpush1.msra.mxu1 %v7495_v40  ;;  %v7504_v52 = vld [vmem:[#allocation39_spill] sm:$0xff]  ;;  %v7505_v40 = vld [vmem:[#allocation54_spill] sm:$0xff]  ;;  %v7518_v46 = vld [vmem:[#allocation53_spill] sm:$0xff] }
 0x11f   :  { %739 = vmatprep.subr.mxu0 %v7496_v44  ;;  %810 = vmatprep.subr.mxu1 %v7497_v38  ;;  %v7506_v38 = vld [vmem:[#allocation41_spill] sm:$0xff]  ;;  %3216 = vrcp.f32 %v543_v51  ;;  %v7527_v51 = vld [vmem:[#allocation63_spill] sm:$0xff] }
 0x120   :  { %740 = vmatpush1.msra.mxu0 %v7498_v42  ;;  %811 = vmatpush1.msra.mxu1 %v7499_v47  ;;  %v7507_v42 = vld [vmem:[#allocation56_spill] sm:$0xff]  ;;  %v7508_v47 = vld [vmem:[#allocation43_spill] sm:$0xff] }
 0x121   :  { %741 = vmatprep.subr.mxu0 %v7500_v36  ;;  %812 = vmatprep.subr.mxu1 %v7501_v53  ;;  %v7509_v36 = vld [vmem:[#allocation58_spill] sm:$0xff] }
 0x122   :  { %742 = vmatpush1.msra.mxu0 %v7502_v55  ;;  %813 = vmatpush1.msra.mxu1 %v7503_v48  ;;  %v7511_v55 = vld [vmem:[#allocation60_spill] sm:$0xff] }
 0x123   :  { %743 = vmatprep.subr.mxu0 %v7504_v52  ;;  %814 = vmatprep.subr.mxu1 %v7505_v40  ;;  %v7512_v52 = vld [vmem:[#allocation47_spill] sm:$0xff]  ;;  %v7513_v40 = vld [vmem:[#allocation62_spill] sm:$0xff] }
 0x124   :  { %v3213_v44 = vpop.eup %3212  ;;  %744 = vmatpush1.msra.mxu0 %v7506_v38  ;;  %815 = vmatpush1.msra.mxu1 %v7507_v42  ;;  %v7515_v38 = vld [vmem:[#allocation64_spill] sm:$0xff] }
 0x125   :  { %745 = vmatprep.subr.mxu0 %v7508_v47  ;;  %816 = vmatprep.subr.mxu1 %v7509_v36  ;;  %v547_v43 = vmul.f32 %v3213_v44, %v3209_v45  ;;  %v7516_v47 = vld [vmem:[#allocation51_spill] sm:$0xff]  ;;  %v7517_v36 = vld [vmem:[#allocation66_spill] sm:$0xff]  ;;  %v7522_v45 = vld [vmem:[#allocation57_spill] sm:$0xff] }
 0x126   :  { %v3215_v53 = vpop.eup %3214  ;;  %746 = vmatpush1.msra.mxu0 %v7510_v50  ;;  %817 = vmatpush1.msra.mxu1 %v7511_v55  ;;  %v7519_v55 = vld [vmem:[#allocation69_spill] sm:$0xff]  ;;  %v7520_v44 = vld [vmem:[#allocation55_spill] sm:$0xff] }
 0x127   :  { %v546_v48 = vmul.f32 0.0, %v3215_v53  ;;  %747 = vmatprep.subr.mxu0 %v7512_v52  ;;  %818 = vmatprep.subr.mxu1 %v7513_v40  ;;  %v7521_v53 = vld [vmem:[#allocation71_spill] sm:$0xff] }
 0x128   :  { %748 = vmatpush1.msra.mxu0 %v7514_v49  ;;  %819 = vmatpush1.msra.mxu1 %v7515_v38  ;;  %v7523_v38 = vld [vmem:[#allocation73_spill] sm:$0xff] }
 0x129   :  { %v4631_v42 = vadd.f32 %v547_v43, %v546_v48  ;;  %749 = vmatprep.subr.mxu0 %v7516_v47  ;;  %820 = vmatprep.subr.mxu1 %v7517_v36  ;;  %v7524_v43 = vld [vmem:[#allocation59_spill] sm:$0xff]  ;;  %v7526_v36 = vld [vmem:[#allocation61_spill] sm:$0xff] }
 0x12a   :  { %750 = vmatpush1.msra.mxu0 %v7518_v46  ;;  %821 = vmatpush1.msra.mxu1 %v7519_v55  ;;  %v7525_v48 = vld [vmem:[#allocation75_spill] sm:$0xff]  ;;  %v7529_v46 = vld [vmem:[#allocation65_spill] sm:$0xff] }
 0x12b   :  { %3218 = vtanh.f32 %v4631_v42  ;;  %751 = vmatprep.subr.mxu0 %v7520_v44  ;;  %822 = vmatprep.subr.mxu1 %v7521_v53  ;;  %v7528_v55 = vld [vmem:[#allocation79_spill] sm:$0xff] }
 0x12c   :  { %752 = vmatpush1.msra.mxu0 %v7522_v45  ;;  %823 = vmatpush1.msra.mxu1 %v7523_v38  ;;  %v7530_v53 = vld [vmem:[#allocation67_spill] sm:$0xff]  ;;  %v7531_v38 = vld [vmem:[#allocation68_spill] sm:$0xff] }
 0x12d   :  { %753 = vmatprep.subr.mxu0 %v7524_v43  ;;  %824 = vmatprep.subr.mxu1 %v7525_v48  ;;  %v7532_v48 = vld [vmem:[#allocation70_spill] sm:$0xff] }
 0x12e   :  { %754 = vmatpush1.msra.mxu0 %v7526_v36  ;;  %825 = vmatpush1.msra.mxu1 %v4400_v60  ;;  %v7533_v36 = vld [vmem:[#allocation86_spill] sm:$0xff]  ;;  %v7534_v60 = vld [vmem:[#allocation72_spill] sm:$0xff] }
 0x12f   :  { %755 = vmatprep.subr.mxu0 %v7527_v51  ;;  %826 = vmatprep.subr.mxu1 %v7528_v55  ;;  %v7535_v51 = vld [vmem:[#allocation87_spill] sm:$0xff]  ;;  %v7536_v55 = vld [vmem:[#allocation74_spill] sm:$0xff] }
 0x130   :  { %756 = vmatpush1.msra.mxu0 %v7529_v46  ;;  %827 = vmatpush1.msra.mxu1 %v4424_v3  ;;  %v7537_v46 = vld [vmem:[#allocation88_spill] sm:$0xff] }
 0x131   :  { %757 = vmatprep.subr.mxu0 %v7530_v53  ;;  %828 = vmatprep.subr.mxu1 %v4436_v58  ;;  %v7538_v3 = vld [vmem:[#allocation76_spill] sm:$0xff]  ;;  %v3217_v58 = vpop.eup %3216 }
 0x132   :  { %758 = vmatpush1.msra.mxu0 %v7531_v38  ;;  %829 = vmatpush1.msra.mxu1 %v4448_v54  ;;  %v7539_v38 = vld [vmem:[#allocation78_spill] sm:$0xff]  ;;  %v7540_v54 = vld [vmem:[#allocation80_spill] sm:$0xff] }
 0x133   :  { %759 = vmatprep.subr.mxu0 %v7532_v48  ;;  %830 = vmatprep.subr.mxu1 %v7533_v36 }
 0x134   :  { %760 = vmatpush1.msra.mxu0 %v7534_v60  ;;  %831 = vmatpush1.msra.mxu1 %v7535_v51  ;;  %v7541_v60 = vld [vmem:[#allocation82_spill] sm:$0xff] }
 0x135   :  { %761 = vmatprep.subr.mxu0 %v7536_v55  ;;  %832 = vmatprep.subr.mxu1 %v7537_v46  ;;  %v7542_v46 = vld [vmem:[#allocation84_spill] sm:$0xff] }
 0x136   :  { %762 = vmatpush1.msra.mxu0 %v7538_v3  ;;  %833 = vmatpush1.msra.mxu1 %v4476_v57 }
 0x137   :  { %763 = vmatprep.subr.mxu0 %v7539_v38  ;;  %834 = vmatprep.subr.mxu1 %v4482_v59 }
 0x138   :  { %v3219_v48 = vpop.eup %3218  ;;  %764 = vmatpush1.msra.mxu0 %v7540_v54  ;;  %835 = vmatpush1.msra.mxu1 %v4489_v61 }
 0x139   :  { %765 = vmatprep.subr.mxu0 %v7541_v60  ;;  %836 = vmatprep.subr.mxu1 %v4496_v62  ;;  %v550_v55 = vmul.f32 %v3219_v48, %v3217_v58 }
 0x13a   :  { %766 = vmatpush1.msra.mxu0 %v7542_v46  ;;  %799 = vmatprep.mubr.f32.mxu0 %v7418_v56 }
 0x13b   :  { %837 = vmatpush1.msra.mxu1 %v4503_v63  ;;  %870 = vmatprep.mubr.f32.mxu1 %v7418_v56  ;;  %3079 = vst [vmem:[%s7012_s5 + $0x38] sm:$0xff] %v550_v55 }
 0x13c   :  { %800 = vmatmul.mubr.f32.vlgmr.msra.gmra.mxu0 %v550_v55  ;;  %871 = vmatmul.mubr.f32.vlgmr.msra.gmra.mxu1 %v550_v55  ;;  %v3083_v55 = vld [vmem:[%s7009_s0 + $0x38] sm:$0xff] }
 0x13d   :  { %912 = vmatprep.subr.mxu0 %v3734_v0  ;;  %983 = vmatprep.subr.mxu1 %v3781_v9  ;;  %v7543_v0 = vld [vmem:[#allocation8_spill] sm:$0xff] }
 0x13e   :  { %913 = vmatpush1.msra.mxu0 %v3739_v1  ;;  %984 = vmatpush1.msra.mxu1 %v3793_v11  ;;  %v7544_v1 = vld [vmem:[#allocation3_spill] sm:$0xff]  ;;  %v7551_v9 = vld [vmem:[#allocation16_spill] sm:$0xff]  ;;  %v7553_v11 = vld [vmem:[#allocation18_spill] sm:$0xff] }
 0x13f   :  { %914 = vmatprep.subr.mxu0 %v3744_v2  ;;  %985 = vmatprep.subr.mxu1 %v3805_v13  ;;  %v7545_v2 = vld [vmem:[#allocation10_spill] sm:$0xff]  ;;  %v7555_v13 = vld [vmem:[#allocation20_spill] sm:$0xff] }
 0x140   :  { %915 = vmatpush1.msra.mxu0 %v3752_v4  ;;  %986 = vmatpush1.msra.mxu1 %v3810_v14  ;;  %v7546_v4 = vld [vmem:[#allocation4_spill] sm:$0xff]  ;;  %v7556_v14 = vld [vmem:[#allocation11_spill] sm:$0xff] }
 0x141   :  { %916 = vmatprep.subr.mxu0 %v3758_v5  ;;  %987 = vmatprep.subr.mxu1 %v3822_v16  ;;  %v7547_v5 = vld [vmem:[#allocation12_spill] sm:$0xff]  ;;  %v7558_v16 = vld [vmem:[#allocation13_spill] sm:$0xff] }
 0x142   :  { %917 = vmatpush1.msra.mxu0 %v3764_v6  ;;  %988 = vmatpush1.msra.mxu1 %v3834_v18  ;;  %v7548_v6 = vld [vmem:[#allocation5_spill] sm:$0xff]  ;;  %v7560_v18 = vld [vmem:[#allocation15_spill] sm:$0xff] }
 0x143   :  { %918 = vmatprep.subr.mxu0 %v3770_v7  ;;  %989 = vmatprep.subr.mxu1 %v3839_v19  ;;  %v7549_v7 = vld [vmem:[#allocation14_spill] sm:$0xff]  ;;  %v7561_v19 = vld [vmem:[#allocation27_spill] sm:$0xff] }
 0x144   :  { %919 = vmatpush1.msra.mxu0 %v3776_v8  ;;  %990 = vmatpush1.msra.mxu1 %v3851_v21  ;;  %v7550_v8 = vld [vmem:[#allocation6_spill] sm:$0xff]  ;;  %v7563_v21 = vld [vmem:[#allocation29_spill] sm:$0xff] }
 0x145   :  { %920 = vmatprep.subr.mxu0 %v3787_v10  ;;  %991 = vmatprep.subr.mxu1 %v3863_v23  ;;  %v7552_v10 = vld [vmem:[#allocation7_spill] sm:$0xff] }
 0x146   :  { %921 = vmatpush1.msra.mxu0 %v3799_v12  ;;  %992 = vmatpush1.msra.mxu1 %v3875_v25  ;;  %v7554_v12 = vld [vmem:[#allocation9_spill] sm:$0xff]  ;;  %v7565_v23 = vld [vmem:[#allocation31_spill] sm:$0xff] }
 0x147   :  { %922 = vmatprep.subr.mxu0 %v3816_v15  ;;  %993 = vmatprep.subr.mxu1 %v3887_v27  ;;  %v7557_v15 = vld [vmem:[#allocation22_spill] sm:$0xff]  ;;  %v7567_v25 = vld [vmem:[#allocation33_spill] sm:$0xff]  ;;  %v7569_v27 = vld [vmem:[#allocation35_spill] sm:$0xff] }
 0x148   :  { %923 = vmatpush1.msra.mxu0 %v3828_v17  ;;  %994 = vmatpush1.msra.mxu1 %v3899_v29  ;;  %v7559_v17 = vld [vmem:[#allocation24_spill] sm:$0xff]  ;;  %v7571_v29 = vld [vmem:[#allocation37_spill] sm:$0xff] }
 0x149   :  { %924 = vmatprep.subr.mxu0 %v3845_v20  ;;  %995 = vmatprep.subr.mxu1 %v3911_v31  ;;  %v7562_v20 = vld [vmem:[#allocation17_spill] sm:$0xff] }
 0x14a   :  { %925 = vmatpush1.msra.mxu0 %v3857_v22  ;;  %996 = vmatpush1.msra.mxu1 %v3923_v33  ;;  %v7564_v22 = vld [vmem:[#allocation19_spill] sm:$0xff] }
 0x14b   :  { %926 = vmatprep.subr.mxu0 %v3869_v24  ;;  %997 = vmatprep.subr.mxu1 %v3935_v35  ;;  %v7566_v24 = vld [vmem:[#allocation21_spill] sm:$0xff] }
 0x14c   :  { %927 = vmatpush1.msra.mxu0 %v3881_v26  ;;  %998 = vmatpush1.msra.mxu1 %v3947_v37  ;;  %v7568_v26 = vld [vmem:[#allocation23_spill] sm:$0xff] }
 0x14d   :  { %928 = vmatprep.subr.mxu0 %v3893_v28  ;;  %999 = vmatprep.subr.mxu1 %v3959_v39  ;;  %v7570_v28 = vld [vmem:[#allocation25_spill] sm:$0xff] }
 0x14e   :  { %929 = vmatpush1.msra.mxu0 %v3905_v30  ;;  %1000 = vmatpush1.msra.mxu1 %v3971_v41  ;;  %v3080_v30 = vld [vmem:[%s7009_s0 + $0x20] sm:$0xff] }
 0x14f   :  { %930 = vmatprep.subr.mxu0 %v3917_v32  ;;  %1001 = vmatprep.subr.mxu1 %v7543_v0  ;;  %v3081_v32 = vld [vmem:[%s7009_s0 + $0x28] sm:$0xff] }
 0x150   :  { %931 = vmatpush1.msra.mxu0 %v7544_v1  ;;  %1002 = vmatpush1.msra.mxu1 %v7545_v2  ;;  %v3082_v1 = vld [vmem:[%s7009_s0 + $0x30] sm:$0xff] }
 0x151   :  { %932 = vmatprep.subr.mxu0 %v7546_v4  ;;  %1003 = vmatprep.subr.mxu1 %v7547_v5 }
 0x152   :  { %933 = vmatpush1.msra.mxu0 %v7548_v6  ;;  %1004 = vmatpush1.msra.mxu1 %v7549_v7 }
 0x153   :  { %934 = vmatprep.subr.mxu0 %v7550_v8  ;;  %1005 = vmatprep.subr.mxu1 %v7551_v9  ;;  %v3088_v9 = vld [vmem:[%s7010_s1 + $0xc0] sm:$0xff] }
 0x154   :  { %935 = vmatpush1.msra.mxu0 %v7552_v10  ;;  %1006 = vmatpush1.msra.mxu1 %v7553_v11 }
 0x155   :  { %936 = vmatprep.subr.mxu0 %v7554_v12  ;;  %1007 = vmatprep.subr.mxu1 %v7555_v13  ;;  %v3089_v12 = vld [vmem:[%s7010_s1 + $0xc8] sm:$0xff] }
 0x156   :  { %937 = vmatpush1.msra.mxu0 %v7556_v14  ;;  %1008 = vmatpush1.msra.mxu1 %v7557_v15 }
 0x157   :  { %938 = vmatprep.subr.mxu0 %v7558_v16  ;;  %1009 = vmatprep.subr.mxu1 %v7559_v17 }
 0x158   :  { %939 = vmatpush1.msra.mxu0 %v7560_v18  ;;  %1010 = vmatpush1.msra.mxu1 %v7561_v19 }
 0x159   :  { %940 = vmatprep.subr.mxu0 %v7562_v20  ;;  %1011 = vmatprep.subr.mxu1 %v7563_v21 }
 0x15a   :  { %941 = vmatpush1.msra.mxu0 %v7564_v22  ;;  %1012 = vmatpush1.msra.mxu1 %v7565_v23 }
 0x15b   :  { %942 = vmatprep.subr.mxu0 %v7566_v24  ;;  %1013 = vmatprep.subr.mxu1 %v7567_v25 }
 0x15c   :  { %943 = vmatpush1.msra.mxu0 %v7568_v26  ;;  %976 = vmatprep.mubr.f32.mxu0 %v7418_v56  ;;  %v3091_v26 = vld [vmem:[%s7010_s1 + $0xd8] sm:$0xff] }
 0x15d   :  { %1014 = vmatpush1.msra.mxu1 %v7569_v27  ;;  %1047 = vmatprep.mubr.f32.mxu1 %v7418_v56 }
 0x15e   :  { %1089 = vmatprep.subr.mxu0 %v7570_v28  ;;  %1160 = vmatprep.subr.mxu1 %v7571_v29 }
 0x1db   :  { %v624_v31 = vpop.f32.mrf.mxu0  ;;  %v695_v41 = vpop.f32.mrf.mxu1 }
 0x1dc   :  { %v700_v33 = vadd.f32 %v3080_v30, %v624_v31  ;;  %v702_v5 = vadd.f32 %v3082_v1, %v695_v41  ;;  %v7576_v1 = vld [vmem:[#allocation30_spill] sm:$0xff] }
 0x1dd   :  { %v626_v35 = vpop.f32.mrf.mxu0  ;;  %v697_v48 = vpop.f32.mrf.mxu1 }
 0x1de   :  { %v3084_v37 = vmul.f32 -1.442695, %v700_v33  ;;  %v701_v39 = vadd.f32 %v3081_v32, %v626_v35  ;;  %v703_v0 = vadd.f32 %v3083_v55, %v697_v48  ;;  %v7573_v55 = vld [vmem:[#allocation40_spill] sm:$0xff] }
 0x1df   :  { %v7574_v48 = vld [vmem:[#allocation28_spill] sm:$0xff] }
 0x1e0   :  { %3220 = vpow2.f32 %v3084_v37  ;;  %v3085_v58 = vmul.f32 -1.442695, %v701_v39  ;;  %v3086_v2 = vmul.f32 -1.442695, %v703_v0  ;;  %v7575_v0 = vld [vmem:[#allocation42_spill] sm:$0xff] }
 0x1e2   :  { %3222 = vpow2.f32 %v3085_v58  ;;  %v7572_v58 = vld [vmem:[#allocation26_spill] sm:$0xff] }
 0x1e3   :  { %3224 = vpow2.f32 %v3086_v2  ;;  %v7577_v2 = vld [vmem:[#allocation44_spill] sm:$0xff] }
 0x1ed   :  { %v3221_v4 = vpop.eup %3220 }
 0x1ee   :  { %v707_v6 = vadd.f32 1.0, %v3221_v4  ;;  %v7578_v4 = vld [vmem:[#allocation32_spill] sm:$0xff] }
 0x1ef   :  { %v3223_v7 = vpop.eup %3222 }
 0x1f0   :  { %3226 = vrcp.f32 %v707_v6  ;;  %v713_v8 = vadd.f32 1.0, %v3223_v7  ;;  %v3225_v10 = vpop.eup %3224  ;;  %v7580_v6 = vld [vmem:[#allocation34_spill] sm:$0xff]  ;;  %v7581_v7 = vld [vmem:[#allocation48_spill] sm:$0xff] }
 0x1f1   :  { %3228 = vtanh.f32 %v702_v5  ;;  %v720_v22 = vadd.f32 1.0, %v3225_v10  ;;  %v7579_v5 = vld [vmem:[#allocation46_spill] sm:$0xff] }
 0x1f2   :  { %3230 = vrcp.f32 %v713_v8  ;;  %v7582_v8 = vld [vmem:[#allocation36_spill] sm:$0xff]  ;;  %v7584_v10 = vld [vmem:[#allocation38_spill] sm:$0xff] }
 0x1fc   :  { %v801_v11 = vpop.f32.mrf.mxu0  ;;  %v872_v23 = vpop.f32.mrf.mxu1 }
 0x1fd   :  { %v3227_v13 = vpop.eup %3226  ;;  %v877_v14 = vadd.f32 %v3088_v9, %v801_v11  ;;  %v7583_v9 = vld [vmem:[#allocation50_spill] sm:$0xff]  ;;  %v7585_v11 = vld [vmem:[#allocation52_spill] sm:$0xff] }
 0x1fe   :  { %v3229_v15 = vpop.eup %3228  ;;  %v803_v16 = vpop.f32.mrf.mxu0 }
 0x1ff   :  { %v3231_v17 = vpop.eup %3230  ;;  %v3092_v18 = vmul.f32 -1.442695, %v877_v14  ;;  %v878_v19 = vadd.f32 %v3089_v12, %v803_v16  ;;  %v724_v20 = vmul.f32 %v3229_v15, %v3227_v13  ;;  %v874_v27 = vpop.f32.mrf.mxu1  ;;  %v7586_v13 = vld [vmem:[#allocation39_spill] sm:$0xff]  ;;  %v7587_v14 = vld [vmem:[#allocation54_spill] sm:$0xff]  ;;  %v7588_v16 = vld [vmem:[#allocation41_spill] sm:$0xff] }
 0x200   :  { %v723_v21 = vmul.f32 %v3231_v17, %v4593_v34  ;;  %v880_v28 = vadd.f32 %v3091_v26, %v874_v27  ;;  %v3090_v34 = vld [vmem:[%s7010_s1 + $0xd0] sm:$0xff]  ;;  %v7589_v17 = vld [vmem:[#allocation56_spill] sm:$0xff] }
 0x201   :  { %3232 = vpow2.f32 %v3092_v18  ;;  %v3093_v24 = vmul.f32 -1.442695, %v878_v19  ;;  %v879_v31 = vadd.f32 %v3090_v34, %v872_v23  ;;  %v7590_v19 = vld [vmem:[#allocation43_spill] sm:$0xff]  ;;  %v7592_v23 = vld [vmem:[#allocation60_spill] sm:$0xff]  ;;  %v7594_v34 = vld [vmem:[#allocation66_spill] sm:$0xff] }
 0x202   :  { %v4762_v25 = vadd.f32 %v724_v20, %v723_v21  ;;  %v3094_v29 = vmul.f32 -1.442695, %v880_v28  ;;  %v7591_v20 = vld [vmem:[#allocation58_spill] sm:$0xff]  ;;  %v7593_v27 = vld [vmem:[#allocation64_spill] sm:$0xff] }
 0x203   :  { %3234 = vpow2.f32 %v3093_v24 }
 0x204   :  { %3236 = vrcp.f32 %v720_v22 }
 0x205   :  { %3238 = vtanh.f32 %v4762_v25 }
 0x206   :  { %3240 = vpow2.f32 %v3094_v29  ;;  %v7596_v29 = vld [vmem:[#allocation69_spill] sm:$0xff] }
 0x20e   :  { %v3233_v30 = vpop.eup %3232 }
 0x20f   :  { %v884_v32 = vadd.f32 1.0, %v3233_v30  ;;  %v7602_v30 = vld [vmem:[#allocation63_spill] sm:$0xff] }
 0x210   :  { %v3235_v33 = vpop.eup %3234 }
 0x211   :  { %v3237_v35 = vpop.eup %3236  ;;  %3242 = vrcp.f32 %v884_v32  ;;  %v890_v37 = vadd.f32 1.0, %v3235_v33  ;;  %v7605_v32 = vld [vmem:[#allocation81_spill] sm:$0xff]  ;;  %v7607_v33 = vld [vmem:[#allocation68_spill] sm:$0xff] }
 0x212   :  { %v3239_v39 = vpop.eup %3238  ;;  %3244 = vtanh.f32 %v879_v31  ;;  %v7603_v31 = vld [vmem:[#allocation79_spill] sm:$0xff] }
 0x213   :  { %3246 = vrcp.f32 %v890_v37  ;;  %v727_v41 = vmul.f32 %v3239_v39, %v3237_v35  ;;  %v3241_v12 = vpop.eup %3240  ;;  %v7609_v35 = vld [vmem:[#allocation70_spill] sm:$0xff]  ;;  %v7610_v37 = vld [vmem:[#allocation72_spill] sm:$0xff] }
 0x214   :  { %v897_v22 = vadd.f32 1.0, %v3241_v12  ;;  %v7611_v39 = vld [vmem:[#allocation74_spill] sm:$0xff]  ;;  %v4992_v12 = vld [vmem:[%s7007_s2 + $0x128] sm:$0xff] }
 0x215   :  { %3087 = vst [vmem:[%s7011_s4 + $0x8] sm:$0xff] %v727_v41  ;;  %977 = vmatmul.mubr.f32.vlgmr.msra.gmra.mxu0 %v727_v41  ;;  %1048 = vmatmul.mubr.f32.vlgmr.msra.gmra.mxu1 %v727_v41  ;;  %v7612_v41 = vld [vmem:[#allocation88_spill] sm:$0xff] }
 0x216   :  { %1090 = vmatpush1.msra.mxu0 %v7572_v58  ;;  %1161 = vmatpush1.msra.mxu1 %v7573_v55  ;;  %3248 = vrcp.f32 %v897_v22  ;;  %v4914_v55 = vld [vmem:[%s7007_s2 + $0x1b0] sm:$0xff]  ;;  %v5052_v22 = vld [vmem:[%s7007_s2 + $0xe0] sm:$0xff] }
 0x217   :  { %1091 = vmatprep.subr.mxu0 %v7574_v48  ;;  %1162 = vmatprep.subr.mxu1 %v7575_v0  ;;  %v4920_v48 = vld [vmem:[%s7007_s2 + $0x188] sm:$0xff]  ;;  %v4926_v0 = vld [vmem:[%s7007_s2 + $0x198] sm:$0xff]  ;;  %7617 = vst [vmem:[#allocation51_spill] sm:$0xff] %v5052_v22 }
 0x218   :  { %1092 = vmatpush1.msra.mxu0 %v7576_v1  ;;  %1163 = vmatpush1.msra.mxu1 %v7577_v2  ;;  %v4932_v1 = vld [vmem:[%s7007_s2 + $0x180] sm:$0xff]  ;;  %v4938_v2 = vld [vmem:[%s7007_s2 + $0x190] sm:$0xff] }
 0x219   :  { %1093 = vmatprep.subr.mxu0 %v7578_v4  ;;  %1164 = vmatprep.subr.mxu1 %v7579_v5  ;;  %v4944_v4 = vld [vmem:[%s7007_s2 + $0x168] sm:$0xff]  ;;  %v4950_v5 = vld [vmem:[%s7007_s2 + $0x178] sm:$0xff] }
 0x21a   :  { %1094 = vmatpush1.msra.mxu0 %v7580_v6  ;;  %1165 = vmatpush1.msra.mxu1 %v7581_v7  ;;  %v4956_v6 = vld [vmem:[%s7007_s2 + $0x160] sm:$0xff]  ;;  %v4962_v7 = vld [vmem:[%s7007_s2 + $0x170] sm:$0xff] }
 0x21b   :  { %1095 = vmatprep.subr.mxu0 %v7582_v8  ;;  %1166 = vmatprep.subr.mxu1 %v7583_v9  ;;  %v4968_v8 = vld [vmem:[%s7007_s2 + $0x148] sm:$0xff]  ;;  %v4974_v9 = vld [vmem:[%s7007_s2 + $0x158] sm:$0xff] }
 0x21c   :  { %1096 = vmatpush1.msra.mxu0 %v7584_v10  ;;  %1167 = vmatpush1.msra.mxu1 %v7585_v11  ;;  %v4980_v10 = vld [vmem:[%s7007_s2 + $0x140] sm:$0xff]  ;;  %v4986_v11 = vld [vmem:[%s7007_s2 + $0x150] sm:$0xff] }
 0x21d   :  { %1097 = vmatprep.subr.mxu0 %v7586_v13  ;;  %1168 = vmatprep.subr.mxu1 %v7587_v14  ;;  %v4998_v13 = vld [vmem:[%s7007_s2 + $0x138] sm:$0xff]  ;;  %v5004_v14 = vld [vmem:[%s7007_s2 + $0x120] sm:$0xff] }
 0x21e   :  { %v3243_v15 = vpop.eup %3242  ;;  %1098 = vmatpush1.msra.mxu0 %v7588_v16  ;;  %1169 = vmatpush1.msra.mxu1 %v7589_v17  ;;  %v5016_v16 = vld [vmem:[%s7007_s2 + $0x108] sm:$0xff]  ;;  %v5022_v17 = vld [vmem:[%s7007_s2 + $0x118] sm:$0xff] }
 0x21f   :  { %v3245_v18 = vpop.eup %3244  ;;  %1099 = vmatprep.subr.mxu0 %v7590_v19  ;;  %1170 = vmatprep.subr.mxu1 %v7591_v20  ;;  %v5034_v19 = vld [vmem:[%s7007_s2 + $0x110] sm:$0xff]  ;;  %v5040_v20 = vld [vmem:[%s7007_s2 + $0xe8] sm:$0xff] }
 0x220   :  { %v3247_v21 = vpop.eup %3246  ;;  %1100 = vmatpush1.msra.mxu0 %v7510_v50  ;;  %1171 = vmatpush1.msra.mxu1 %v7592_v23  ;;  %v901_v24 = vmul.f32 %v3245_v18, %v3243_v15  ;;  %v7595_v50 = vld [vmem:[#allocation53_spill] sm:$0xff]  ;;  %v5028_v18 = vld [vmem:[%s7007_s2 + $0x100] sm:$0xff]  ;;  %7614 = vst [vmem:[#allocation47_spill] sm:$0xff] %v5034_v19  ;;  %7615 = vst [vmem:[#allocation62_spill] sm:$0xff] %v5040_v20 }
 0x221   :  { %v900_v26 = vmul.f32 %v3247_v21, %v4631_v42  ;;  %1101 = vmatprep.subr.mxu0 %v7512_v52  ;;  %1172 = vmatprep.subr.mxu1 %v7513_v40  ;;  %v7597_v52 = vld [vmem:[#allocation71_spill] sm:$0xff]  ;;  %v7600_v42 = vld [vmem:[#allocation61_spill] sm:$0xff]  ;;  %7613 = vst [vmem:[#allocation45_spill] sm:$0xff] %v5028_v18  ;;  %v5046_v21 = vld [vmem:[%s7007_s2 + $0xf8] sm:$0xff] }
 0x222   :  { %1102 = vmatpush1.msra.mxu0 %v7514_v49  ;;  %1173 = vmatpush1.msra.mxu1 %v7593_v27  ;;  %v7598_v49 = vld [vmem:[#allocation73_spill] sm:$0xff]  ;;  %v7599_v40 = vld [vmem:[#allocation75_spill] sm:$0xff]  ;;  %7616 = vst [vmem:[#allocation49_spill] sm:$0xff] %v5046_v21 }
 0x223   :  { %v4801_v28 = vadd.f32 %v901_v24, %v900_v26  ;;  %1103 = vmatprep.subr.mxu0 %v7516_v47  ;;  %1174 = vmatprep.subr.mxu1 %v7594_v34  ;;  %v7601_v47 = vld [vmem:[#allocation77_spill] sm:$0xff]  ;;  %v5064_v24 = vld [vmem:[%s7007_s2 + $0xc8] sm:$0xff]  ;;  %v5070_v26 = vld [vmem:[%s7007_s2 + $0xd8] sm:$0xff] }
 0x224   :  { %1104 = vmatpush1.msra.mxu0 %v7595_v50  ;;  %1175 = vmatpush1.msra.mxu1 %v7596_v29  ;;  %v5010_v15 = vld [vmem:[%s7007_s2 + $0x130] sm:$0xff]  ;;  %7619 = vst [vmem:[#allocation57_spill] sm:$0xff] %v5064_v24  ;;  %7620 = vst [vmem:[#allocation59_spill] sm:$0xff] %v5070_v26  ;;  %v5076_v27 = vld [vmem:[%s7007_s2 + $0xc0] sm:$0xff] }
 0x225   :  { %1105 = vmatprep.subr.mxu0 %v7520_v44  ;;  %1176 = vmatprep.subr.mxu1 %v7597_v52  ;;  %3250 = vtanh.f32 %v4801_v28  ;;  %v7604_v44 = vld [vmem:[#allocation65_spill] sm:$0xff]  ;;  %7621 = vst [vmem:[#allocation67_spill] sm:$0xff] %v5076_v27  ;;  %v5088_v50 = vld [vmem:[%s7007_s2 + $0xa8] sm:$0xff]  ;;  %v5094_v29 = vld [vmem:[%s7007_s2 + $0xb8] sm:$0xff] }
 0x226   :  { %1106 = vmatpush1.msra.mxu0 %v7522_v45  ;;  %1177 = vmatpush1.msra.mxu1 %v7598_v49  ;;  %v7606_v45 = vld [vmem:[#allocation83_spill] sm:$0xff]  ;;  %v5058_v23 = vld [vmem:[%s7007_s2 + $0xf0] sm:$0xff]  ;;  %7623 = vst [vmem:[#allocation87_spill] sm:$0xff] %v5088_v50  ;;  %7624 = vst [vmem:[#allocation76_spill] sm:$0xff] %v5094_v29 }
 0x227   :  { %1107 = vmatprep.subr.mxu0 %v7524_v43  ;;  %1178 = vmatprep.subr.mxu1 %v7599_v40  ;;  %v7608_v43 = vld [vmem:[#allocation85_spill] sm:$0xff]  ;;  %7618 = vst [vmem:[#allocation55_spill] sm:$0xff] %v5058_v23  ;;  %v5100_v52 = vld [vmem:[%s7007_s2 + $0xa0] sm:$0xff]  ;;  %v5112_v40 = vld [vmem:[%s7007_s2 + $0x88] sm:$0xff] }
 0x228   :  { %1108 = vmatpush1.msra.mxu0 %v7600_v42  ;;  %1179 = vmatpush1.msra.mxu1 %v7601_v47  ;;  %v5082_v34 = vld [vmem:[%s7007_s2 + $0xd0] sm:$0xff]  ;;  %7625 = vst [vmem:[#allocation78_spill] sm:$0xff] %v5100_v52  ;;  %7627 = vst [vmem:[#allocation82_spill] sm:$0xff] %v5112_v40  ;;  %v5118_v42 = vld [vmem:[%s7007_s2 + $0x98] sm:$0xff] }
 0x229   :  { %1109 = vmatprep.subr.mxu0 %v7602_v30  ;;  %1180 = vmatprep.subr.mxu1 %v7603_v31  ;;  %7622 = vst [vmem:[#allocation86_spill] sm:$0xff] %v5082_v34  ;;  %v5106_v49 = vld [vmem:[%s7007_s2 + $0xb0] sm:$0xff]  ;;  %7628 = vst [vmem:[#allocation84_spill] sm:$0xff] %v5118_v42  ;;  %v5124_v47 = vld [vmem:[%s7007_s2 + $0x80] sm:$0xff] }
 0x22a   :  { %1110 = vmatpush1.msra.mxu0 %v7604_v44  ;;  %1181 = vmatpush1.msra.mxu1 %v7605_v32  ;;  %7626 = vst [vmem:[#allocation80_spill] sm:$0xff] %v5106_v49  ;;  %7629 = vst [vmem:[#allocation8_spill] sm:$0xff] %v5124_v47  ;;  %v5130_v30 = vld [vmem:[%s7007_s2 + $0x90] sm:$0xff]  ;;  %v5136_v31 = vld [vmem:[%s7007_s2 + $0x68] sm:$0xff] }
 0x22b   :  { %1111 = vmatprep.subr.mxu0 %v7530_v53  ;;  %1182 = vmatprep.subr.mxu1 %v7606_v45  ;;  %v3249_v53 = vpop.eup %3248  ;;  %7630 = vst [vmem:[#allocation3_spill] sm:$0xff] %v5130_v30  ;;  %7631 = vst [vmem:[#allocation10_spill] sm:$0xff] %v5136_v31  ;;  %v5142_v44 = vld [vmem:[%s7007_s2 + $0x78] sm:$0xff]  ;;  %v5148_v32 = vld [vmem:[%s7007_s2 + $0x60] sm:$0xff] }
 0x22c   :  { %1112 = vmatpush1.msra.mxu0 %v7607_v33  ;;  %1183 = vmatpush1.msra.mxu1 %v7608_v43  ;;  %7632 = vst [vmem:[#allocation4_spill] sm:$0xff] %v5142_v44  ;;  %7633 = vst [vmem:[#allocation12_spill] sm:$0xff] %v5148_v32  ;;  %v5154_v45 = vld [vmem:[%s7007_s2 + $0x70] sm:$0xff]  ;;  %v5160_v33 = vld [vmem:[%s7007_s2 + $0x48] sm:$0xff] }
 0x22d   :  { %1113 = vmatprep.subr.mxu0 %v7609_v35  ;;  %1184 = vmatprep.subr.mxu1 %v7533_v36  ;;  %7634 = vst [vmem:[#allocation5_spill] sm:$0xff] %v5154_v45  ;;  %7635 = vst [vmem:[#allocation14_spill] sm:$0xff] %v5160_v33  ;;  %v5166_v43 = vld [vmem:[%s7007_s2 + $0x58] sm:$0xff]  ;;  %v5172_v35 = vld [vmem:[%s7007_s2 + $0x40] sm:$0xff] }
 0x22e   :  { %1114 = vmatpush1.msra.mxu0 %v7610_v37  ;;  %1185 = vmatpush1.msra.mxu1 %v7535_v51  ;;  %v4908_v51 = vld [vmem:[%s7007_s2 + $0x1a0] sm:$0xff]  ;;  %7636 = vst [vmem:[#allocation6_spill] sm:$0xff] %v5166_v43  ;;  %7637 = vst [vmem:[#allocation16_spill] sm:$0xff] %v5172_v35  ;;  %v5178_v37 = vld [vmem:[%s7007_s2 + $0x50] sm:$0xff] }
 0x22f   :  { %1115 = vmatprep.subr.mxu0 %v7611_v39  ;;  %1186 = vmatprep.subr.mxu1 %v7612_v41  ;;  %7638 = vst [vmem:[#allocation7_spill] sm:$0xff] %v5178_v37  ;;  %v5184_v39 = vld [vmem:[%s7007_s2 + $0x28] sm:$0xff]  ;;  %v5190_v41 = vld [vmem:[%s7007_s2 + $0x38] sm:$0xff] }
 0x230   :  { %1116 = vmatpush1.msra.mxu0 %v7538_v3  ;;  %1187 = vmatpush1.msra.mxu1 %v4476_v57  ;;  %v4848_v3 = vld [vmem:[%s7007_s2 + $0x1e8] sm:$0xff]  ;;  %v4860_v57 = vld [vmem:[%s7007_s2 + $0x1e0] sm:$0xff]  ;;  %7639 = vst [vmem:[#allocation18_spill] sm:$0xff] %v5184_v39  ;;  %7640 = vst [vmem:[#allocation9_spill] sm:$0xff] %v5190_v41 }
 0x231   :  { %1117 = vmatprep.subr.mxu0 %v7539_v38  ;;  %1188 = vmatprep.subr.mxu1 %v4482_v59  ;;  %v4866_v59 = vld [vmem:[%s7007_s2 + $0x1f0] sm:$0xff]  ;;  %v4896_v38 = vld [vmem:[%s7007_s2 + $0x1a8] sm:$0xff] }
 0x232   :  { %v3251_v58 = vpop.eup %3250  ;;  %1118 = vmatpush1.msra.mxu0 %v7540_v54  ;;  %1189 = vmatpush1.msra.mxu1 %v4489_v61  ;;  %v4854_v54 = vld [vmem:[%s7007_s2 + $0x1f8] sm:$0xff] }
 0x233   :  { %1119 = vmatprep.subr.mxu0 %v7541_v60  ;;  %1190 = vmatprep.subr.mxu1 %v4496_v62  ;;  %v904_v36 = vmul.f32 %v3251_v58, %v3249_v53  ;;  %v4872_v60 = vld [vmem:[%s7007_s2 + $0x1c8] sm:$0xff]  ;;  %v4878_v61 = vld [vmem:[%s7007_s2 + $0x1d8] sm:$0xff]  ;;  %v4884_v62 = vld [vmem:[%s7007_s2 + $0x1c0] sm:$0xff] }
 0x234   :  { %1120 = vmatpush1.msra.mxu0 %v7542_v46  ;;  %1153 = vmatprep.mubr.f32.mxu0 %v7418_v56  ;;  %v4902_v46 = vld [vmem:[%s7007_s2 + $0x1b8] sm:$0xff]  ;;  %v5196_v53 = vld [vmem:[%s7007_s2 + $0x20] sm:$0xff]  ;;  %v5202_v58 = vld [vmem:[%s7007_s2 + $0x30] sm:$0xff] }
 0x235   :  { %1191 = vmatpush1.msra.mxu1 %v4503_v63  ;;  %1224 = vmatprep.mubr.f32.mxu1 %v7418_v56  ;;  %3095 = vst [vmem:[%s7012_s5 + $0x30] sm:$0xff] %v904_v36  ;;  %v4890_v63 = vld [vmem:[%s7007_s2 + $0x1d0] sm:$0xff]  ;;  %7641 = vst [vmem:[#allocation20_spill] sm:$0xff] %v5196_v53 }
 0x236   :  { %1154 = vmatmul.mubr.f32.vlgmr.msra.gmra.mxu0 %v904_v36  ;;  %1225 = vmatmul.mubr.f32.vlgmr.msra.gmra.mxu1 %v904_v36  ;;  %7642 = vst [vmem:[#allocation11_spill] sm:$0xff] %v5202_v58  ;;  %v5208_v36 = vld [vmem:[%s7007_s2 + $0x8] sm:$0xff] }
 0x237   :  { %1266 = vmatprep.subr.mxu0 %v4848_v3  ;;  %1337 = vmatprep.subr.mxu1 %v4854_v54  ;;  %7643 = vst [vmem:[#allocation22_spill] sm:$0xff] %v5208_v36 }
 0x238   :  { %1267 = vmatpush1.msra.mxu0 %v4860_v57  ;;  %1338 = vmatpush1.msra.mxu1 %v4866_v59 }
 0x239   :  { %1268 = vmatprep.subr.mxu0 %v4872_v60  ;;  %1339 = vmatprep.subr.mxu1 %v4878_v61 }
 0x23a   :  { %1269 = vmatpush1.msra.mxu0 %v4884_v62  ;;  %1340 = vmatpush1.msra.mxu1 %v4890_v63 }
 0x23b   :  { %1270 = vmatprep.subr.mxu0 %v4896_v38  ;;  %1341 = vmatprep.subr.mxu1 %v4902_v46 }
 0x23c   :  { %1271 = vmatpush1.msra.mxu0 %v4908_v51  ;;  %1342 = vmatpush1.msra.mxu1 %v4914_v55 }
 0x23d   :  { %1272 = vmatprep.subr.mxu0 %v4920_v48  ;;  %1343 = vmatprep.subr.mxu1 %v4926_v0 }
 0x23e   :  { %1273 = vmatpush1.msra.mxu0 %v4932_v1  ;;  %1344 = vmatpush1.msra.mxu1 %v4938_v2 }
 0x23f   :  { %1274 = vmatprep.subr.mxu0 %v4944_v4  ;;  %1345 = vmatprep.subr.mxu1 %v4950_v5 }
 0x240   :  { %1275 = vmatpush1.msra.mxu0 %v4956_v6  ;;  %1346 = vmatpush1.msra.mxu1 %v4962_v7 }
 0x241   :  { %1276 = vmatprep.subr.mxu0 %v4968_v8  ;;  %1347 = vmatprep.subr.mxu1 %v4974_v9 }
 0x242   :  { %1277 = vmatpush1.msra.mxu0 %v4980_v10  ;;  %1348 = vmatpush1.msra.mxu1 %v4986_v11 }
 0x243   :  { %1278 = vmatprep.subr.mxu0 %v4992_v12  ;;  %1349 = vmatprep.subr.mxu1 %v4998_v13 }
 0x244   :  { %1279 = vmatpush1.msra.mxu0 %v5004_v14  ;;  %1350 = vmatpush1.msra.mxu1 %v5010_v15 }
 0x245   :  { %1280 = vmatprep.subr.mxu0 %v5016_v16  ;;  %1351 = vmatprep.subr.mxu1 %v5022_v17 }
 0x246   :  { %1281 = vmatpush1.msra.mxu0 %v5028_v18  ;;  %1352 = vmatpush1.msra.mxu1 %v5034_v19 }
 0x247   :  { %1282 = vmatprep.subr.mxu0 %v5040_v20  ;;  %1353 = vmatprep.subr.mxu1 %v5046_v21 }
 0x248   :  { %1283 = vmatpush1.msra.mxu0 %v5052_v22  ;;  %1354 = vmatpush1.msra.mxu1 %v5058_v23 }
 0x249   :  { %1284 = vmatprep.subr.mxu0 %v5064_v24  ;;  %1355 = vmatprep.subr.mxu1 %v5070_v26 }
 0x24a   :  { %1285 = vmatpush1.msra.mxu0 %v5076_v27  ;;  %1356 = vmatpush1.msra.mxu1 %v5082_v34 }
 0x24b   :  { %1286 = vmatprep.subr.mxu0 %v5088_v50  ;;  %1357 = vmatprep.subr.mxu1 %v5094_v29 }
 0x24c   :  { %1287 = vmatpush1.msra.mxu0 %v5100_v52  ;;  %1358 = vmatpush1.msra.mxu1 %v5106_v49 }
 0x24d   :  { %1288 = vmatprep.subr.mxu0 %v5112_v40  ;;  %1359 = vmatprep.subr.mxu1 %v5118_v42 }
 0x24e   :  { %1289 = vmatpush1.msra.mxu0 %v5124_v47  ;;  %1360 = vmatpush1.msra.mxu1 %v5130_v30 }
 0x24f   :  { %1290 = vmatprep.subr.mxu0 %v5136_v31  ;;  %1361 = vmatprep.subr.mxu1 %v5142_v44  ;;  %v3098_v31 = vld [vmem:[%s7009_s0 + $0x50] sm:$0xff] }
 0x250   :  { %1291 = vmatpush1.msra.mxu0 %v5148_v32  ;;  %1362 = vmatpush1.msra.mxu1 %v5154_v45 }
 0x251   :  { %1292 = vmatprep.subr.mxu0 %v5160_v33  ;;  %1363 = vmatprep.subr.mxu1 %v5166_v43 }
 0x252   :  { %1293 = vmatpush1.msra.mxu0 %v5172_v35  ;;  %1364 = vmatpush1.msra.mxu1 %v5178_v37 }
 0x253   :  { %1294 = vmatprep.subr.mxu0 %v5184_v39  ;;  %1365 = vmatprep.subr.mxu1 %v5190_v41  ;;  %v5214_v41 = vld [vmem:[%s7007_s2 + $0x18] sm:$0xff]  ;;  %v3097_v39 = vld [vmem:[%s7009_s0 + $0x48] sm:$0xff] }
 0x254   :  { %1295 = vmatpush1.msra.mxu0 %v5196_v53  ;;  %1366 = vmatpush1.msra.mxu1 %v5202_v58  ;;  %7644 = vst [vmem:[#allocation13_spill] sm:$0xff] %v5214_v41  ;;  %v5220_v53 = vld [vmem:[%s7007_s2] sm:$0xff] }
 0x255   :  { %1296 = vmatprep.subr.mxu0 %v5208_v36  ;;  %1367 = vmatprep.subr.mxu1 %v5214_v41  ;;  %7645 = vst [vmem:[#allocation24_spill] sm:$0xff] %v5220_v53  ;;  %v5227_v36 = vld [vmem:[%s7007_s2 + $0x10] sm:$0xff]  ;;  %v5234_v41 = vld [vmem:[%s7008_s3 + $0x1e8] sm:$0xff] }
 0x256   :  { %1297 = vmatpush1.msra.mxu0 %v5220_v53  ;;  %1330 = vmatprep.mubr.f32.mxu0 %v7418_v56  ;;  %7646 = vst [vmem:[#allocation15_spill] sm:$0xff] %v5227_v36  ;;  %7647 = vst [vmem:[#allocation27_spill] sm:$0xff] %v5234_v41  ;;  %v5240_v53 = vld [vmem:[%s7008_s3 + $0x1f8] sm:$0xff] }
 0x257   :  { %1368 = vmatpush1.msra.mxu1 %v5227_v36  ;;  %1401 = vmatprep.mubr.f32.mxu1 %v7418_v56  ;;  %7648 = vst [vmem:[#allocation17_spill] sm:$0xff] %v5240_v53  ;;  %v3096_v36 = vld [vmem:[%s7009_s0 + $0x40] sm:$0xff] }
 0x258   :  { %1443 = vmatprep.subr.mxu0 %v5234_v41  ;;  %1514 = vmatprep.subr.mxu1 %v5240_v53  ;;  %v3099_v53 = vld [vmem:[%s7009_s0 + $0x58] sm:$0xff] }
 0x2d5   :  { %v978_v58 = vpop.f32.mrf.mxu0  ;;  %v1049_v33 = vpop.f32.mrf.mxu1 }
 0x2d6   :  { %v1054_v37 = vadd.f32 %v3096_v36, %v978_v58  ;;  %v1056_v58 = vadd.f32 %v3098_v31, %v1049_v33 }
 0x2d7   :  { %v980_v35 = vpop.f32.mrf.mxu0  ;;  %v1051_v32 = vpop.f32.mrf.mxu1 }
 0x2d8   :  { %v3100_v43 = vmul.f32 -1.442695, %v1054_v37  ;;  %v1055_v41 = vadd.f32 %v3097_v39, %v980_v35  ;;  %v1057_v44 = vadd.f32 %v3099_v53, %v1051_v32  ;;  %v3105_v39 = vld [vmem:[%s7010_s1 + $0xa8] sm:$0xff] }
 0x2da   :  { %3252 = vpow2.f32 %v3100_v43  ;;  %v3101_v45 = vmul.f32 -1.442695, %v1055_v41  ;;  %v3102_v30 = vmul.f32 -1.442695, %v1057_v44 }
 0x2dc   :  { %3254 = vpow2.f32 %v3101_v45  ;;  %v3104_v45 = vld [vmem:[%s7010_s1 + $0xa0] sm:$0xff] }
 0x2dd   :  { %3256 = vpow2.f32 %v3102_v30 }
 0x2e7   :  { %v3253_v47 = vpop.eup %3252 }
 0x2e8   :  { %v1061_v36 = vadd.f32 1.0, %v3253_v47 }
 0x2e9   :  { %v3255_v37 = vpop.eup %3254 }
 0x2ea   :  { %3258 = vrcp.f32 %v1061_v36  ;;  %v1067_v43 = vadd.f32 1.0, %v3255_v37  ;;  %v3257_v35 = vpop.eup %3256 }
 0x2eb   :  { %3260 = vtanh.f32 %v1056_v58  ;;  %v1074_v37 = vadd.f32 1.0, %v3257_v35 }
 0x2ec   :  { %3262 = vrcp.f32 %v1067_v43 }
 0x2f6   :  { %v1155_v32 = vpop.f32.mrf.mxu0  ;;  %v1226_v43 = vpop.f32.mrf.mxu1 }
 0x2f7   :  { %v3259_v44 = vpop.eup %3258  ;;  %v1231_v41 = vadd.f32 %v3104_v45, %v1155_v32  ;;  %v3107_v45 = vld [vmem:[%s7010_s1 + $0xb8] sm:$0xff] }
 0x2f8   :  { %v3261_v31 = vpop.eup %3260  ;;  %v1157_v47 = vpop.f32.mrf.mxu0 }
 0x2f9   :  { %v3263_v33 = vpop.eup %3262  ;;  %v3108_v30 = vmul.f32 -1.442695, %v1231_v41  ;;  %v1232_v53 = vadd.f32 %v3105_v39, %v1157_v47  ;;  %v1078_v36 = vmul.f32 %v3261_v31, %v3259_v44  ;;  %v1228_v32 = vpop.f32.mrf.mxu1 }
 0x2fa   :  { %v1077_v58 = vmul.f32 %v3263_v33, %v4762_v25  ;;  %v1234_v41 = vadd.f32 %v3107_v45, %v1228_v32  ;;  %v3106_v25 = vld [vmem:[%s7010_s1 + $0xb0] sm:$0xff]  ;;  %v5301_v45 = vld [vmem:[%s7008_s3 + $0x1c0] sm:$0xff] }
 0x2fb   :  { %3264 = vpow2.f32 %v3108_v30  ;;  %v3109_v42 = vmul.f32 -1.442695, %v1232_v53  ;;  %v1233_v44 = vadd.f32 %v3106_v25, %v1226_v43  ;;  %v5295_v43 = vld [vmem:[%s7008_s3 + $0x1d8] sm:$0xff]  ;;  %v5307_v32 = vld [vmem:[%s7008_s3 + $0x1d0] sm:$0xff] }
 0x2fc   :  { %v5262_v40 = vadd.f32 %v1078_v36, %v1077_v58  ;;  %v3110_v35 = vmul.f32 -1.442695, %v1234_v41  ;;  %v5277_v36 = vld [vmem:[%s7008_s3 + $0x1e0] sm:$0xff]  ;;  %v5283_v58 = vld [vmem:[%s7008_s3 + $0x1f0] sm:$0xff]  ;;  %v5313_v41 = vld [vmem:[%s7008_s3 + $0x1a8] sm:$0xff] }
 0x2fd   :  { %3266 = vpow2.f32 %v3109_v42  ;;  %v5319_v25 = vld [vmem:[%s7008_s3 + $0x1b8] sm:$0xff] }
 0x2fe   :  { %3268 = vrcp.f32 %v1074_v37  ;;  %v5289_v37 = vld [vmem:[%s7008_s3 + $0x1c8] sm:$0xff]  ;;  %7649 = vst [vmem:[#allocation29_spill] sm:$0xff] %v5319_v25 }
 0x2ff   :  { %3270 = vtanh.f32 %v5262_v40 }
 0x300   :  { %3272 = vpow2.f32 %v3110_v35  ;;  %v5325_v35 = vld [vmem:[%s7008_s3 + $0x1a0] sm:$0xff] }
 0x301   :  { %7650 = vst [vmem:[#allocation19_spill] sm:$0xff] %v5325_v35 }
 0x308   :  { %v3265_v39 = vpop.eup %3264 }
 0x309   :  { %v1238_v31 = vadd.f32 1.0, %v3265_v39  ;;  %v5331_v39 = vld [vmem:[%s7008_s3 + $0x1b0] sm:$0xff] }
 0x30a   :  { %v3267_v47 = vpop.eup %3266  ;;  %7651 = vst [vmem:[#allocation31_spill] sm:$0xff] %v5331_v39 }
 0x30b   :  { %v3269_v42 = vpop.eup %3268  ;;  %3274 = vrcp.f32 %v1238_v31  ;;  %v1244_v33 = vadd.f32 1.0, %v3267_v47  ;;  %v5343_v31 = vld [vmem:[%s7008_s3 + $0x198] sm:$0xff]  ;;  %v5349_v47 = vld [vmem:[%s7008_s3 + $0x180] sm:$0xff] }
 0x30c   :  { %v3271_v30 = vpop.eup %3270  ;;  %3276 = vtanh.f32 %v1233_v44  ;;  %v5337_v44 = vld [vmem:[%s7008_s3 + $0x188] sm:$0xff]  ;;  %7653 = vst [vmem:[#allocation33_spill] sm:$0xff] %v5343_v31  ;;  %7654 = vst [vmem:[#allocation23_spill] sm:$0xff] %v5349_v47 }
 0x30d   :  { %3278 = vrcp.f32 %v1244_v33  ;;  %v1081_v53 = vmul.f32 %v3271_v30, %v3269_v42  ;;  %7652 = vst [vmem:[#allocation21_spill] sm:$0xff] %v5337_v44  ;;  %v5355_v42 = vld [vmem:[%s7008_s3 + $0x190] sm:$0xff]  ;;  %v3273_v33 = vpop.eup %3272  ;;  %v5361_v30 = vld [vmem:[%s7008_s3 + $0x168] sm:$0xff] }
 0x30e   :  { %7655 = vst [vmem:[#allocation35_spill] sm:$0xff] %v5355_v42  ;;  %7656 = vst [vmem:[#allocation25_spill] sm:$0xff] %v5361_v30 }
 0x30f   :  { %3103 = vst [vmem:[%s7011_s4 + $0x10] sm:$0xff] %v1081_v53  ;;  %1331 = vmatmul.mubr.f32.vlgmr.msra.gmra.mxu0 %v1081_v53  ;;  %1402 = vmatmul.mubr.f32.vlgmr.msra.gmra.mxu1 %v1081_v53  ;;  %v5367_v53 = vld [vmem:[%s7008_s3 + $0x178] sm:$0xff] }
 0x310   :  { %1444 = vmatpush1.msra.mxu0 %v5277_v36  ;;  %1515 = vmatpush1.msra.mxu1 %v5283_v58  ;;  %7657 = vst [vmem:[#allocation37_spill] sm:$0xff] %v5367_v53 }
 0x311   :  { %1445 = vmatprep.subr.mxu0 %v5289_v37  ;;  %1516 = vmatprep.subr.mxu1 %v5295_v43 }
 0x312   :  { %1446 = vmatpush1.msra.mxu0 %v5301_v45  ;;  %1517 = vmatpush1.msra.mxu1 %v5307_v32 }
 0x313   :  { %1447 = vmatprep.subr.mxu0 %v5313_v41  ;;  %1518 = vmatprep.subr.mxu1 %v5319_v25 }
 0x314   :  { %1448 = vmatpush1.msra.mxu0 %v5325_v35  ;;  %1519 = vmatpush1.msra.mxu1 %v5331_v39  ;;  %v1251_v39 = vadd.f32 1.0, %v3273_v33  ;;  %v5410_v33 = vld [vmem:[%s7008_s3 + $0x128] sm:$0xff] }
 0x315   :  { %1449 = vmatprep.subr.mxu0 %v5337_v44  ;;  %1520 = vmatprep.subr.mxu1 %v5343_v31  ;;  %v5379_v31 = vld [vmem:[%s7008_s3 + $0x170] sm:$0xff]  ;;  %v5391_v44 = vld [vmem:[%s7008_s3 + $0x158] sm:$0xff] }
 0x316   :  { %1450 = vmatpush1.msra.mxu0 %v5349_v47  ;;  %1521 = vmatpush1.msra.mxu1 %v5355_v42  ;;  %v5373_v42 = vld [vmem:[%s7008_s3 + $0x160] sm:$0xff]  ;;  %7659 = vst [vmem:[#allocation40_spill] sm:$0xff] %v5379_v31  ;;  %7661 = vst [vmem:[#allocation42_spill] sm:$0xff] %v5391_v44  ;;  %3280 = vrcp.f32 %v1251_v39  ;;  %v5466_v39 = vld [vmem:[%s7008_s3 + $0xf8] sm:$0xff] }
 0x317   :  { %1451 = vmatprep.subr.mxu0 %v5361_v30  ;;  %1522 = vmatprep.subr.mxu1 %v5367_v53  ;;  %7658 = vst [vmem:[#allocation26_spill] sm:$0xff] %v5373_v42  ;;  %v5385_v53 = vld [vmem:[%s7008_s3 + $0x148] sm:$0xff]  ;;  %7671 = vst [vmem:[#allocation52_spill] sm:$0xff] %v5466_v39 }
 0x318   :  { %v3275_v47 = vpop.eup %3274  ;;  %1452 = vmatpush1.msra.mxu0 %v5373_v42  ;;  %1523 = vmatpush1.msra.mxu1 %v5379_v31  ;;  %7660 = vst [vmem:[#allocation28_spill] sm:$0xff] %v5385_v53  ;;  %v5397_v31 = vld [vmem:[%s7008_s3 + $0x140] sm:$0xff] }
 0x319   :  { %v3277_v30 = vpop.eup %3276  ;;  %1453 = vmatprep.subr.mxu0 %v5385_v53  ;;  %1524 = vmatprep.subr.mxu1 %v5391_v44  ;;  %7662 = vst [vmem:[#allocation30_spill] sm:$0xff] %v5397_v31  ;;  %v5403_v53 = vld [vmem:[%s7008_s3 + $0x150] sm:$0xff] }
 0x31a   :  { %v3279_v42 = vpop.eup %3278  ;;  %1454 = vmatpush1.msra.mxu0 %v5397_v31  ;;  %1525 = vmatpush1.msra.mxu1 %v5403_v53  ;;  %v1255_v35 = vmul.f32 %v3277_v30, %v3275_v47  ;;  %v5416_v31 = vld [vmem:[%s7008_s3 + $0x138] sm:$0xff]  ;;  %v5422_v47 = vld [vmem:[%s7008_s3 + $0x120] sm:$0xff]  ;;  %v5436_v30 = vld [vmem:[%s7008_s3 + $0x108] sm:$0xff] }
 0x31b   :  { %v1254_v25 = vmul.f32 %v3279_v42, %v4801_v28  ;;  %1455 = vmatprep.subr.mxu0 %v5410_v33  ;;  %7663 = vst [vmem:[#allocation44_spill] sm:$0xff] %v5416_v31  ;;  %1526 = vmatprep.subr.mxu1 %v5416_v31  ;;  %7664 = vst [vmem:[#allocation32_spill] sm:$0xff] %v5422_v47  ;;  %v5428_v28 = vld [vmem:[%s7008_s3 + $0x130] sm:$0xff]  ;;  %v5641_v31 = vld [vmem:[%s7008_s3] sm:$0xff] }
 0x31c   :  { %1456 = vmatpush1.msra.mxu0 %v5422_v47  ;;  %7665 = vst [vmem:[#allocation46_spill] sm:$0xff] %v5428_v28  ;;  %1527 = vmatpush1.msra.mxu1 %v5428_v28  ;;  %7666 = vst [vmem:[#allocation34_spill] sm:$0xff] %v5436_v30  ;;  %v5442_v47 = vld [vmem:[%s7008_s3 + $0x118] sm:$0xff]  ;;  %v5623_v28 = vld [vmem:[%s7008_s3 + $0x30] sm:$0xff] }
 0x31d   :  { %v5431_v42 = vadd.f32 %v1255_v35, %v1254_v25  ;;  %1457 = vmatprep.subr.mxu0 %v5436_v30  ;;  %7667 = vst [vmem:[#allocation48_spill] sm:$0xff] %v5442_v47  ;;  %1528 = vmatprep.subr.mxu1 %v5442_v47  ;;  %v5448_v25 = vld [vmem:[%s7008_s3 + $0x100] sm:$0xff]  ;;  %v5454_v35 = vld [vmem:[%s7008_s3 + $0x110] sm:$0xff]  ;;  %v5460_v30 = vld [vmem:[%s7008_s3 + $0xe8] sm:$0xff] }
 0x31e   :  { %7668 = vst [vmem:[#allocation36_spill] sm:$0xff] %v5448_v25  ;;  %1458 = vmatpush1.msra.mxu0 %v5448_v25  ;;  %7669 = vst [vmem:[#allocation50_spill] sm:$0xff] %v5454_v35  ;;  %1529 = vmatpush1.msra.mxu1 %v5454_v35  ;;  %v5473_v35 = vld [vmem:[%s7008_s3 + $0xe0] sm:$0xff]  ;;  %v5491_v25 = vld [vmem:[%s7008_s3 + $0xd8] sm:$0xff] }
 0x31f   :  { %7670 = vst [vmem:[#allocation38_spill] sm:$0xff] %v5460_v30  ;;  %1459 = vmatprep.subr.mxu0 %v5460_v30  ;;  %1530 = vmatprep.subr.mxu1 %v5466_v39  ;;  %3282 = vtanh.f32 %v5431_v42  ;;  %7672 = vst [vmem:[#allocation39_spill] sm:$0xff] %v5473_v35  ;;  %v5479_v30 = vld [vmem:[%s7008_s3 + $0xf0] sm:$0xff]  ;;  %v5485_v39 = vld [vmem:[%s7008_s3 + $0xc8] sm:$0xff] }
 0x320   :  { %1460 = vmatpush1.msra.mxu0 %v5473_v35  ;;  %7673 = vst [vmem:[#allocation54_spill] sm:$0xff] %v5479_v30  ;;  %1531 = vmatpush1.msra.mxu1 %v5479_v30  ;;  %7674 = vst [vmem:[#allocation41_spill] sm:$0xff] %v5485_v39  ;;  %v5497_v35 = vld [vmem:[%s7008_s3 + $0xc0] sm:$0xff]  ;;  %v5503_v30 = vld [vmem:[%s7008_s3 + $0xd0] sm:$0xff] }
 0x321   :  { %1461 = vmatprep.subr.mxu0 %v5485_v39  ;;  %7675 = vst [vmem:[#allocation56_spill] sm:$0xff] %v5491_v25  ;;  %1532 = vmatprep.subr.mxu1 %v5491_v25  ;;  %7676 = vst [vmem:[#allocation43_spill] sm:$0xff] %v5497_v35  ;;  %v5509_v39 = vld [vmem:[%s7008_s3 + $0xa8] sm:$0xff]  ;;  %v5515_v25 = vld [vmem:[%s7008_s3 + $0xb8] sm:$0xff] }
 0x322   :  { %1462 = vmatpush1.msra.mxu0 %v5497_v35  ;;  %7677 = vst [vmem:[#allocation58_spill] sm:$0xff] %v5503_v30  ;;  %1533 = vmatpush1.msra.mxu1 %v5503_v30  ;;  %7678 = vst [vmem:[#allocation60_spill] sm:$0xff] %v5509_v39  ;;  %v5521_v35 = vld [vmem:[%s7008_s3 + $0xa0] sm:$0xff]  ;;  %v5527_v30 = vld [vmem:[%s7008_s3 + $0xb0] sm:$0xff] }
 0x323   :  { %1463 = vmatprep.subr.mxu0 %v5509_v39  ;;  %7679 = vst [vmem:[#allocation64_spill] sm:$0xff] %v5515_v25  ;;  %1534 = vmatprep.subr.mxu1 %v5515_v25  ;;  %7680 = vst [vmem:[#allocation66_spill] sm:$0xff] %v5521_v35  ;;  %v5533_v39 = vld [vmem:[%s7008_s3 + $0x88] sm:$0xff]  ;;  %v5539_v25 = vld [vmem:[%s7008_s3 + $0x98] sm:$0xff] }
 0x324   :  { %1464 = vmatpush1.msra.mxu0 %v5521_v35  ;;  %7681 = vst [vmem:[#allocation53_spill] sm:$0xff] %v5527_v30  ;;  %1535 = vmatpush1.msra.mxu1 %v5527_v30  ;;  %7682 = vst [vmem:[#allocation69_spill] sm:$0xff] %v5533_v39  ;;  %v5545_v35 = vld [vmem:[%s7008_s3 + $0x80] sm:$0xff]  ;;  %v5551_v30 = vld [vmem:[%s7008_s3 + $0x90] sm:$0xff] }
 0x325   :  { %1465 = vmatprep.subr.mxu0 %v5533_v39  ;;  %7683 = vst [vmem:[#allocation71_spill] sm:$0xff] %v5539_v25  ;;  %1536 = vmatprep.subr.mxu1 %v5539_v25  ;;  %7684 = vst [vmem:[#allocation73_spill] sm:$0xff] %v5545_v35  ;;  %v5557_v39 = vld [vmem:[%s7008_s3 + $0x68] sm:$0xff]  ;;  %v5563_v25 = vld [vmem:[%s7008_s3 + $0x78] sm:$0xff] }
 0x326   :  { %1466 = vmatpush1.msra.mxu0 %v5545_v35  ;;  %7685 = vst [vmem:[#allocation75_spill] sm:$0xff] %v5551_v30  ;;  %1537 = vmatpush1.msra.mxu1 %v5551_v30  ;;  %7686 = vst [vmem:[#allocation61_spill] sm:$0xff] %v5557_v39  ;;  %v5569_v35 = vld [vmem:[%s7008_s3 + $0x60] sm:$0xff]  ;;  %v5575_v30 = vld [vmem:[%s7008_s3 + $0x70] sm:$0xff] }
 0x327   :  { %1467 = vmatprep.subr.mxu0 %v5557_v39  ;;  %7687 = vst [vmem:[#allocation77_spill] sm:$0xff] %v5563_v25  ;;  %1538 = vmatprep.subr.mxu1 %v5563_v25  ;;  %7688 = vst [vmem:[#allocation63_spill] sm:$0xff] %v5569_v35  ;;  %v5581_v39 = vld [vmem:[%s7008_s3 + $0x48] sm:$0xff]  ;;  %v5587_v25 = vld [vmem:[%s7008_s3 + $0x58] sm:$0xff] }
 0x328   :  { %1468 = vmatpush1.msra.mxu0 %v5569_v35  ;;  %7689 = vst [vmem:[#allocation79_spill] sm:$0xff] %v5575_v30  ;;  %1539 = vmatpush1.msra.mxu1 %v5575_v30  ;;  %7690 = vst [vmem:[#allocation65_spill] sm:$0xff] %v5581_v39  ;;  %v5593_v35 = vld [vmem:[%s7008_s3 + $0x40] sm:$0xff]  ;;  %v5599_v30 = vld [vmem:[%s7008_s3 + $0x50] sm:$0xff] }
 0x329   :  { %1469 = vmatprep.subr.mxu0 %v5581_v39  ;;  %7691 = vst [vmem:[#allocation81_spill] sm:$0xff] %v5587_v25  ;;  %1540 = vmatprep.subr.mxu1 %v5587_v25  ;;  %7692 = vst [vmem:[#allocation83_spill] sm:$0xff] %v5593_v35  ;;  %v3281_v39 = vpop.eup %3280  ;;  %v5605_v47 = vld [vmem:[%s7008_s3 + $0x28] sm:$0xff]  ;;  %v5611_v25 = vld [vmem:[%s7008_s3 + $0x38] sm:$0xff] }
 0x32a   :  { %1470 = vmatpush1.msra.mxu0 %v5593_v35  ;;  %7693 = vst [vmem:[#allocation68_spill] sm:$0xff] %v5599_v30  ;;  %1541 = vmatpush1.msra.mxu1 %v5599_v30  ;;  %7694 = vst [vmem:[#allocation85_spill] sm:$0xff] %v5605_v47  ;;  %v5617_v30 = vld [vmem:[%s7008_s3 + $0x20] sm:$0xff] }
 0x32b   :  { %1471 = vmatprep.subr.mxu0 %v5605_v47  ;;  %7695 = vst [vmem:[#allocation70_spill] sm:$0xff] %v5611_v25  ;;  %1542 = vmatprep.subr.mxu1 %v5611_v25  ;;  %7696 = vst [vmem:[#allocation72_spill] sm:$0xff] %v5617_v30  ;;  %v5629_v47 = vld [vmem:[%s7008_s3 + $0x8] sm:$0xff]  ;;  %v5635_v25 = vld [vmem:[%s7008_s3 + $0x18] sm:$0xff] }
 0x32c   :  { %v3283_v35 = vpop.eup %3282  ;;  %1472 = vmatpush1.msra.mxu0 %v5617_v30  ;;  %1543 = vmatpush1.msra.mxu1 %v5623_v28  ;;  %7697 = vst [vmem:[#allocation74_spill] sm:$0xff] %v5629_v47 }
 0x32d   :  { %1473 = vmatprep.subr.mxu0 %v5629_v47  ;;  %1544 = vmatprep.subr.mxu1 %v5635_v25  ;;  %v1258_v30 = vmul.f32 %v3283_v35, %v3281_v39  ;;  %v5648_v47 = vld [vmem:[%s7008_s3 + $0x10] sm:$0xff]  ;;  %v7699_v35 = vld [vmem:[#allocation84_spill] sm:$0xff] }
 0x32e   :  { %1474 = vmatpush1.msra.mxu0 %v5641_v31  ;;  %1507 = vmatprep.mubr.f32.mxu0 %v7418_v56  ;;  %v7700_v39 = vld [vmem:[#allocation8_spill] sm:$0xff] }
 0x32f   :  { %1545 = vmatpush1.msra.mxu1 %v5648_v47  ;;  %1578 = vmatprep.mubr.f32.mxu1 %v7418_v56  ;;  %3111 = vst [vmem:[%s7012_s5 + $0x28] sm:$0xff] %v1258_v30 }
 0x330   :  { %1508 = vmatmul.mubr.f32.vlgmr.msra.gmra.mxu0 %v1258_v30  ;;  %1579 = vmatmul.mubr.f32.vlgmr.msra.gmra.mxu1 %v1258_v30  ;;  %v7698_v30 = vld [vmem:[#allocation82_spill] sm:$0xff] }
 0x331   :  { %1620 = vmatprep.subr.mxu0 %v4848_v3  ;;  %1691 = vmatprep.subr.mxu1 %v4854_v54 }
 0x332   :  { %1621 = vmatpush1.msra.mxu0 %v4860_v57  ;;  %1692 = vmatpush1.msra.mxu1 %v4866_v59 }
 0x333   :  { %1622 = vmatprep.subr.mxu0 %v4872_v60  ;;  %1693 = vmatprep.subr.mxu1 %v4878_v61 }
 0x334   :  { %1623 = vmatpush1.msra.mxu0 %v4884_v62  ;;  %1694 = vmatpush1.msra.mxu1 %v4890_v63 }
 0x335   :  { %1624 = vmatprep.subr.mxu0 %v4896_v38  ;;  %1695 = vmatprep.subr.mxu1 %v4902_v46 }
 0x336   :  { %1625 = vmatpush1.msra.mxu0 %v4908_v51  ;;  %1696 = vmatpush1.msra.mxu1 %v4914_v55 }
 0x337   :  { %1626 = vmatprep.subr.mxu0 %v4920_v48  ;;  %1697 = vmatprep.subr.mxu1 %v4926_v0 }
 0x338   :  { %1627 = vmatpush1.msra.mxu0 %v4932_v1  ;;  %1698 = vmatpush1.msra.mxu1 %v4938_v2 }
 0x339   :  { %1628 = vmatprep.subr.mxu0 %v4944_v4  ;;  %1699 = vmatprep.subr.mxu1 %v4950_v5 }
 0x33a   :  { %1629 = vmatpush1.msra.mxu0 %v4956_v6  ;;  %1700 = vmatpush1.msra.mxu1 %v4962_v7 }
 0x33b   :  { %1630 = vmatprep.subr.mxu0 %v4968_v8  ;;  %1701 = vmatprep.subr.mxu1 %v4974_v9 }
 0x33c   :  { %1631 = vmatpush1.msra.mxu0 %v4980_v10  ;;  %1702 = vmatpush1.msra.mxu1 %v4986_v11 }
 0x33d   :  { %1632 = vmatprep.subr.mxu0 %v4992_v12  ;;  %1703 = vmatprep.subr.mxu1 %v4998_v13 }
 0x33e   :  { %1633 = vmatpush1.msra.mxu0 %v5004_v14  ;;  %1704 = vmatpush1.msra.mxu1 %v5010_v15 }
 0x33f   :  { %1634 = vmatprep.subr.mxu0 %v5016_v16  ;;  %1705 = vmatprep.subr.mxu1 %v5022_v17 }
 0x340   :  { %1635 = vmatpush1.msra.mxu0 %v5028_v18  ;;  %1706 = vmatpush1.msra.mxu1 %v5034_v19 }
 0x341   :  { %1636 = vmatprep.subr.mxu0 %v5040_v20  ;;  %1707 = vmatprep.subr.mxu1 %v5046_v21 }
 0x342   :  { %1637 = vmatpush1.msra.mxu0 %v5052_v22  ;;  %1708 = vmatpush1.msra.mxu1 %v5058_v23  ;;  %v3114_v22 = vld [vmem:[%s7009_s0 + $0x70] sm:$0xff] }
 0x343   :  { %1638 = vmatprep.subr.mxu0 %v5064_v24  ;;  %1709 = vmatprep.subr.mxu1 %v5070_v26  ;;  %v7701_v24 = vld [vmem:[#allocation3_spill] sm:$0xff]  ;;  %v7702_v26 = vld [vmem:[#allocation10_spill] sm:$0xff] }
 0x344   :  { %1639 = vmatpush1.msra.mxu0 %v5076_v27  ;;  %1710 = vmatpush1.msra.mxu1 %v5082_v34  ;;  %v7703_v27 = vld [vmem:[#allocation4_spill] sm:$0xff] }
 0x345   :  { %1640 = vmatprep.subr.mxu0 %v5088_v50  ;;  %1711 = vmatprep.subr.mxu1 %v5094_v29  ;;  %v7704_v34 = vld [vmem:[#allocation12_spill] sm:$0xff]  ;;  %v7705_v50 = vld [vmem:[#allocation5_spill] sm:$0xff]  ;;  %v7706_v29 = vld [vmem:[#allocation14_spill] sm:$0xff] }
 0x346   :  { %1641 = vmatpush1.msra.mxu0 %v5100_v52  ;;  %1712 = vmatpush1.msra.mxu1 %v5106_v49  ;;  %v7707_v52 = vld [vmem:[#allocation6_spill] sm:$0xff]  ;;  %v7708_v49 = vld [vmem:[#allocation16_spill] sm:$0xff] }
 0x347   :  { %1642 = vmatprep.subr.mxu0 %v7698_v30  ;;  %1713 = vmatprep.subr.mxu1 %v7699_v35  ;;  %v7709_v30 = vld [vmem:[#allocation7_spill] sm:$0xff]  ;;  %v7710_v35 = vld [vmem:[#allocation18_spill] sm:$0xff] }
 0x348   :  { %1643 = vmatpush1.msra.mxu0 %v7700_v39  ;;  %1714 = vmatpush1.msra.mxu1 %v7701_v24  ;;  %v7711_v39 = vld [vmem:[#allocation9_spill] sm:$0xff]  ;;  %v7712_v24 = vld [vmem:[#allocation20_spill] sm:$0xff] }
 0x349   :  { %1644 = vmatprep.subr.mxu0 %v7702_v26  ;;  %1715 = vmatprep.subr.mxu1 %v7703_v27  ;;  %v7713_v26 = vld [vmem:[#allocation11_spill] sm:$0xff]  ;;  %v7714_v27 = vld [vmem:[#allocation22_spill] sm:$0xff] }
 0x34a   :  { %1645 = vmatpush1.msra.mxu0 %v7704_v34  ;;  %1716 = vmatpush1.msra.mxu1 %v7705_v50  ;;  %v7715_v34 = vld [vmem:[#allocation13_spill] sm:$0xff]  ;;  %v7716_v50 = vld [vmem:[#allocation24_spill] sm:$0xff] }
 0x34b   :  { %1646 = vmatprep.subr.mxu0 %v7706_v29  ;;  %1717 = vmatprep.subr.mxu1 %v7707_v52  ;;  %v7717_v52 = vld [vmem:[#allocation15_spill] sm:$0xff] }
 0x34c   :  { %1647 = vmatpush1.msra.mxu0 %v7708_v49  ;;  %1718 = vmatpush1.msra.mxu1 %v7709_v30  ;;  %v7718_v30 = vld [vmem:[#allocation27_spill] sm:$0xff] }
 0x34d   :  { %1648 = vmatprep.subr.mxu0 %v7710_v35  ;;  %1719 = vmatprep.subr.mxu1 %v7711_v39  ;;  %v7719_v35 = vld [vmem:[#allocation17_spill] sm:$0xff] }
 0x34e   :  { %1649 = vmatpush1.msra.mxu0 %v7712_v24  ;;  %1720 = vmatpush1.msra.mxu1 %v7713_v26  ;;  %v3112_v26 = vld [vmem:[%s7009_s0 + $0x60] sm:$0xff] }
 0x34f   :  { %1650 = vmatprep.subr.mxu0 %v7714_v27  ;;  %1721 = vmatprep.subr.mxu1 %v7715_v34  ;;  %v3113_v34 = vld [vmem:[%s7009_s0 + $0x68] sm:$0xff] }
 0x350   :  { %1651 = vmatpush1.msra.mxu0 %v7716_v50  ;;  %1684 = vmatprep.mubr.f32.mxu0 %v7418_v56 }
 0x351   :  { %1722 = vmatpush1.msra.mxu1 %v7717_v52  ;;  %1755 = vmatprep.mubr.f32.mxu1 %v7418_v56 }
 0x352   :  { %1797 = vmatprep.subr.mxu0 %v7718_v30  ;;  %1868 = vmatprep.subr.mxu1 %v7719_v35  ;;  %v3115_v35 = vld [vmem:[%s7009_s0 + $0x78] sm:$0xff] }
 0x3cf   :  { %v1332_v24 = vpop.f32.mrf.mxu0  ;;  %v1403_v52 = vpop.f32.mrf.mxu1 }
 0x3d0   :  { %v1408_v50 = vadd.f32 %v3112_v26, %v1332_v24  ;;  %v1410_v24 = vadd.f32 %v3114_v22, %v1403_v52 }
 0x3d1   :  { %v1334_v27 = vpop.f32.mrf.mxu0  ;;  %v1405_v30 = vpop.f32.mrf.mxu1 }
 0x3d2   :  { %v3116_v39 = vmul.f32 -1.442695, %v1408_v50  ;;  %v1409_v49 = vadd.f32 %v3113_v34, %v1334_v27  ;;  %v1411_v23 = vadd.f32 %v3115_v35, %v1405_v30  ;;  %v3120_v34 = vld [vmem:[%s7010_s1 + $0x80] sm:$0xff]  ;;  %v3121_v30 = vld [vmem:[%s7010_s1 + $0x88] sm:$0xff] }
 0x3d4   :  { %3284 = vpow2.f32 %v3116_v39  ;;  %v3117_v29 = vmul.f32 -1.442695, %v1409_v49  ;;  %v3118_v21 = vmul.f32 -1.442695, %v1411_v23 }
 0x3d6   :  { %3286 = vpow2.f32 %v3117_v29 }
 0x3d7   :  { %3288 = vpow2.f32 %v3118_v21 }
 0x3e1   :  { %v3285_v20 = vpop.eup %3284 }
 0x3e2   :  { %v1415_v26 = vadd.f32 1.0, %v3285_v20 }
 0x3e3   :  { %v3287_v50 = vpop.eup %3286 }
 0x3e4   :  { %3290 = vrcp.f32 %v1415_v26  ;;  %v1421_v27 = vadd.f32 1.0, %v3287_v50  ;;  %v3289_v29 = vpop.eup %3288 }
 0x3e5   :  { %3292 = vtanh.f32 %v1410_v24  ;;  %v1428_v50 = vadd.f32 1.0, %v3289_v29 }
 0x3e6   :  { %3294 = vrcp.f32 %v1421_v27 }
 0x3f0   :  { %v1509_v49 = vpop.f32.mrf.mxu0  ;;  %v1580_v27 = vpop.f32.mrf.mxu1 }
 0x3f1   :  { %v3291_v23 = vpop.eup %3290  ;;  %v1585_v35 = vadd.f32 %v3120_v34, %v1509_v49  ;;  %v3123_v34 = vld [vmem:[%s7010_s1 + $0x98] sm:$0xff] }
 0x3f2   :  { %v3293_v22 = vpop.eup %3292  ;;  %v1511_v20 = vpop.f32.mrf.mxu0 }
 0x3f3   :  { %v3295_v52 = vpop.eup %3294  ;;  %v3124_v21 = vmul.f32 -1.442695, %v1585_v35  ;;  %v1586_v39 = vadd.f32 %v3121_v30, %v1511_v20  ;;  %v1432_v26 = vmul.f32 %v3293_v22, %v3291_v23  ;;  %v1582_v49 = vpop.f32.mrf.mxu1 }
 0x3f4   :  { %v1431_v24 = vmul.f32 %v3295_v52, %v5262_v40  ;;  %v1588_v35 = vadd.f32 %v3123_v34, %v1582_v49  ;;  %v3122_v40 = vld [vmem:[%s7010_s1 + $0x90] sm:$0xff]  ;;  %v7725_v49 = vld [vmem:[#allocation23_spill] sm:$0xff] }
 0x3f5   :  { %3296 = vpow2.f32 %v3124_v21  ;;  %v3125_v19 = vmul.f32 -1.442695, %v1586_v39  ;;  %v1587_v23 = vadd.f32 %v3122_v40, %v1580_v27  ;;  %v7723_v27 = vld [vmem:[#allocation21_spill] sm:$0xff] }
 0x3f6   :  { %v5742_v18 = vadd.f32 %v1432_v26, %v1431_v24  ;;  %v3126_v29 = vmul.f32 -1.442695, %v1588_v35  ;;  %v7720_v26 = vld [vmem:[#allocation29_spill] sm:$0xff]  ;;  %v7721_v24 = vld [vmem:[#allocation19_spill] sm:$0xff] }
 0x3f7   :  { %3298 = vpow2.f32 %v3125_v19  ;;  %v7724_v34 = vld [vmem:[#allocation33_spill] sm:$0xff]  ;;  %v7726_v35 = vld [vmem:[#allocation35_spill] sm:$0xff] }
 0x3f8   :  { %3300 = vrcp.f32 %v1428_v50  ;;  %v7722_v50 = vld [vmem:[#allocation31_spill] sm:$0xff] }
 0x3f9   :  { %3302 = vtanh.f32 %v5742_v18 }
 0x3fa   :  { %3304 = vpow2.f32 %v3126_v29  ;;  %v7727_v29 = vld [vmem:[#allocation25_spill] sm:$0xff] }
 0x402   :  { %v3297_v30 = vpop.eup %3296 }
 0x403   :  { %v1592_v22 = vadd.f32 1.0, %v3297_v30  ;;  %v7728_v30 = vld [vmem:[#allocation37_spill] sm:$0xff] }
 0x404   :  { %v3299_v20 = vpop.eup %3298 }
 0x405   :  { %v3301_v19 = vpop.eup %3300  ;;  %3306 = vrcp.f32 %v1592_v22  ;;  %v1598_v52 = vadd.f32 1.0, %v3299_v20  ;;  %v7729_v22 = vld [vmem:[#allocation26_spill] sm:$0xff]  ;;  %v7730_v20 = vld [vmem:[#allocation40_spill] sm:$0xff] }
 0x406   :  { %v3303_v21 = vpop.eup %3302  ;;  %3308 = vtanh.f32 %v1587_v23 }
 0x407   :  { %3310 = vrcp.f32 %v1598_v52  ;;  %v1435_v39 = vmul.f32 %v3303_v21, %v3301_v19  ;;  %v3305_v40 = vpop.eup %3304  ;;  %v7731_v52 = vld [vmem:[#allocation28_spill] sm:$0xff] }
 0x409   :  { %3119 = vst [vmem:[%s7011_s4 + $0x18] sm:$0xff] %v1435_v39  ;;  %1685 = vmatmul.mubr.f32.vlgmr.msra.gmra.mxu0 %v1435_v39  ;;  %1756 = vmatmul.mubr.f32.vlgmr.msra.gmra.mxu1 %v1435_v39  ;;  %v1605_v39 = vadd.f32 1.0, %v3305_v40  ;;  %v7737_v40 = vld [vmem:[#allocation48_spill] sm:$0xff] }
 0x40a   :  { %1798 = vmatpush1.msra.mxu0 %v5277_v36  ;;  %1869 = vmatpush1.msra.mxu1 %v5283_v58 }
 0x40b   :  { %1799 = vmatprep.subr.mxu0 %v5289_v37  ;;  %1870 = vmatprep.subr.mxu1 %v5295_v43  ;;  %3312 = vrcp.f32 %v1605_v39  ;;  %v7747_v39 = vld [vmem:[#allocation58_spill] sm:$0xff] }
 0x40c   :  { %1800 = vmatpush1.msra.mxu0 %v5301_v45  ;;  %1871 = vmatpush1.msra.mxu1 %v5307_v32 }
 0x40d   :  { %1801 = vmatprep.subr.mxu0 %v5313_v41  ;;  %1872 = vmatprep.subr.mxu1 %v7720_v26 }
 0x40e   :  { %1802 = vmatpush1.msra.mxu0 %v7721_v24  ;;  %1873 = vmatpush1.msra.mxu1 %v7722_v50 }
 0x40f   :  { %1803 = vmatprep.subr.mxu0 %v7723_v27  ;;  %1874 = vmatprep.subr.mxu1 %v7724_v34 }
 0x410   :  { %1804 = vmatpush1.msra.mxu0 %v7725_v49  ;;  %1875 = vmatpush1.msra.mxu1 %v7726_v35  ;;  %v7732_v49 = vld [vmem:[#allocation30_spill] sm:$0xff] }
 0x411   :  { %1805 = vmatprep.subr.mxu0 %v7727_v29  ;;  %1876 = vmatprep.subr.mxu1 %v7728_v30  ;;  %v7733_v30 = vld [vmem:[#allocation44_spill] sm:$0xff] }
 0x412   :  { %v3307_v23 = vpop.eup %3306  ;;  %1806 = vmatpush1.msra.mxu0 %v7729_v22  ;;  %1877 = vmatpush1.msra.mxu1 %v7730_v20  ;;  %v7734_v22 = vld [vmem:[#allocation32_spill] sm:$0xff]  ;;  %v7735_v20 = vld [vmem:[#allocation46_spill] sm:$0xff] }
 0x413   :  { %v3309_v19 = vpop.eup %3308  ;;  %1807 = vmatprep.subr.mxu0 %v7731_v52  ;;  %1878 = vmatprep.subr.mxu1 %v5391_v44  ;;  %v7736_v44 = vld [vmem:[#allocation34_spill] sm:$0xff] }
 0x414   :  { %v3311_v21 = vpop.eup %3310  ;;  %1808 = vmatpush1.msra.mxu0 %v7732_v49  ;;  %1879 = vmatpush1.msra.mxu1 %v5403_v53  ;;  %v1609_v35 = vmul.f32 %v3309_v19, %v3307_v23  ;;  %v7738_v49 = vld [vmem:[#allocation36_spill] sm:$0xff]  ;;  %v7739_v23 = vld [vmem:[#allocation50_spill] sm:$0xff] }
 0x415   :  { %v1608_v29 = vmul.f32 %v3311_v21, %v5431_v42  ;;  %1809 = vmatprep.subr.mxu0 %v5410_v33  ;;  %1880 = vmatprep.subr.mxu1 %v7733_v30  ;;  %v7740_v42 = vld [vmem:[#allocation38_spill] sm:$0xff]  ;;  %v7741_v19 = vld [vmem:[#allocation52_spill] sm:$0xff]  ;;  %v7742_v21 = vld [vmem:[#allocation39_spill] sm:$0xff] }
 0x416   :  { %1810 = vmatpush1.msra.mxu0 %v7734_v22  ;;  %1881 = vmatpush1.msra.mxu1 %v7735_v20  ;;  %v7743_v20 = vld [vmem:[#allocation54_spill] sm:$0xff]  ;;  %v7766_v22 = vld [vmem:[#allocation72_spill] sm:$0xff] }
 0x417   :  { %v5781_v52 = vadd.f32 %v1609_v35, %v1608_v29  ;;  %1811 = vmatprep.subr.mxu0 %v7736_v44  ;;  %1882 = vmatprep.subr.mxu1 %v7737_v40  ;;  %v7744_v35 = vld [vmem:[#allocation41_spill] sm:$0xff]  ;;  %v7745_v29 = vld [vmem:[#allocation56_spill] sm:$0xff]  ;;  %v7746_v40 = vld [vmem:[#allocation43_spill] sm:$0xff] }
 0x418   :  { %1812 = vmatpush1.msra.mxu0 %v7738_v49  ;;  %1883 = vmatpush1.msra.mxu1 %v7739_v23  ;;  %v7748_v49 = vld [vmem:[#allocation60_spill] sm:$0xff]  ;;  %v7752_v44 = vld [vmem:[#allocation69_spill] sm:$0xff] }
 0x419   :  { %1813 = vmatprep.subr.mxu0 %v7740_v42  ;;  %1884 = vmatprep.subr.mxu1 %v7741_v19  ;;  %3314 = vtanh.f32 %v5781_v52  ;;  %v7749_v23 = vld [vmem:[#allocation64_spill] sm:$0xff]  ;;  %v7750_v42 = vld [vmem:[#allocation66_spill] sm:$0xff]  ;;  %v7751_v19 = vld [vmem:[#allocation53_spill] sm:$0xff] }
 0x41a   :  { %1814 = vmatpush1.msra.mxu0 %v7742_v21  ;;  %1885 = vmatpush1.msra.mxu1 %v7743_v20  ;;  %v7753_v21 = vld [vmem:[#allocation71_spill] sm:$0xff]  ;;  %v7754_v20 = vld [vmem:[#allocation73_spill] sm:$0xff] }
 0x41b   :  { %1815 = vmatprep.subr.mxu0 %v7744_v35  ;;  %1886 = vmatprep.subr.mxu1 %v7745_v29  ;;  %v7755_v35 = vld [vmem:[#allocation75_spill] sm:$0xff]  ;;  %v7756_v29 = vld [vmem:[#allocation61_spill] sm:$0xff] }
 0x41c   :  { %1816 = vmatpush1.msra.mxu0 %v7746_v40  ;;  %1887 = vmatpush1.msra.mxu1 %v7747_v39  ;;  %v7757_v40 = vld [vmem:[#allocation77_spill] sm:$0xff]  ;;  %v7758_v39 = vld [vmem:[#allocation63_spill] sm:$0xff] }
 0x41d   :  { %1817 = vmatprep.subr.mxu0 %v7748_v49  ;;  %1888 = vmatprep.subr.mxu1 %v7749_v23  ;;  %v7759_v49 = vld [vmem:[#allocation79_spill] sm:$0xff]  ;;  %v7760_v23 = vld [vmem:[#allocation65_spill] sm:$0xff] }
 0x41e   :  { %1818 = vmatpush1.msra.mxu0 %v7750_v42  ;;  %1889 = vmatpush1.msra.mxu1 %v7751_v19  ;;  %v7761_v42 = vld [vmem:[#allocation81_spill] sm:$0xff]  ;;  %v7762_v19 = vld [vmem:[#allocation83_spill] sm:$0xff] }
 0x41f   :  { %1819 = vmatprep.subr.mxu0 %v7752_v44  ;;  %1890 = vmatprep.subr.mxu1 %v7753_v21  ;;  %v7763_v44 = vld [vmem:[#allocation68_spill] sm:$0xff]  ;;  %v3313_v21 = vpop.eup %3312 }
 0x420   :  { %1820 = vmatpush1.msra.mxu0 %v7754_v20  ;;  %1891 = vmatpush1.msra.mxu1 %v7755_v35  ;;  %v7764_v20 = vld [vmem:[#allocation85_spill] sm:$0xff]  ;;  %v7765_v35 = vld [vmem:[#allocation70_spill] sm:$0xff] }
 0x421   :  { %1821 = vmatprep.subr.mxu0 %v7756_v29  ;;  %1892 = vmatprep.subr.mxu1 %v7757_v40 }
 0x422   :  { %1822 = vmatpush1.msra.mxu0 %v7758_v39  ;;  %1893 = vmatpush1.msra.mxu1 %v7759_v49  ;;  %v7767_v39 = vld [vmem:[#allocation74_spill] sm:$0xff] }
 0x423   :  { %1823 = vmatprep.subr.mxu0 %v7760_v23  ;;  %1894 = vmatprep.subr.mxu1 %v7761_v42 }
 0x424   :  { %1824 = vmatpush1.msra.mxu0 %v7762_v19  ;;  %1895 = vmatpush1.msra.mxu1 %v7763_v44 }
 0x425   :  { %1825 = vmatprep.subr.mxu0 %v7764_v20  ;;  %1896 = vmatprep.subr.mxu1 %v7765_v35 }
 0x426   :  { %v3315_v29 = vpop.eup %3314  ;;  %1826 = vmatpush1.msra.mxu0 %v7766_v22  ;;  %1897 = vmatpush1.msra.mxu1 %v5623_v28 }
 0x427   :  { %1827 = vmatprep.subr.mxu0 %v7767_v39  ;;  %1898 = vmatprep.subr.mxu1 %v5635_v25  ;;  %v1612_v23 = vmul.f32 %v3315_v29, %v3313_v21  ;;  %v7799_v21 = vld [vmem:[#allocation13_spill] sm:$0xff]  ;;  %v7800_v29 = vld [vmem:[#allocation24_spill] sm:$0xff] }
 0x428   :  { %1828 = vmatpush1.msra.mxu0 %v5641_v31  ;;  %1861 = vmatprep.mubr.f32.mxu0 %v7418_v56 }
 0x429   :  { %1899 = vmatpush1.msra.mxu1 %v5648_v47  ;;  %1932 = vmatprep.mubr.f32.mxu1 %v7418_v56  ;;  %3127 = vst [vmem:[%s7012_s5 + $0x20] sm:$0xff] %v1612_v23 }
 0x42a   :  { %1862 = vmatmul.mubr.f32.vlgmr.msra.gmra.mxu0 %v1612_v23  ;;  %1933 = vmatmul.mubr.f32.vlgmr.msra.gmra.mxu1 %v1612_v23  ;;  %v7798_v23 = vld [vmem:[#allocation22_spill] sm:$0xff] }
 0x42b   :  { %1974 = vmatprep.subr.mxu0 %v4848_v3  ;;  %2045 = vmatprep.subr.mxu1 %v4854_v54  ;;  %v7768_v3 = vld [vmem:[#allocation45_spill] sm:$0xff]  ;;  %v7769_v54 = vld [vmem:[#allocation47_spill] sm:$0xff] }
 0x42c   :  { %1975 = vmatpush1.msra.mxu0 %v4860_v57  ;;  %2046 = vmatpush1.msra.mxu1 %v4866_v59  ;;  %v7770_v57 = vld [vmem:[#allocation62_spill] sm:$0xff]  ;;  %v7771_v59 = vld [vmem:[#allocation49_spill] sm:$0xff] }
 0x42d   :  { %1976 = vmatprep.subr.mxu0 %v4872_v60  ;;  %2047 = vmatprep.subr.mxu1 %v4878_v61  ;;  %v7772_v60 = vld [vmem:[#allocation51_spill] sm:$0xff] }
 0x42e   :  { %1977 = vmatpush1.msra.mxu0 %v4884_v62  ;;  %2048 = vmatpush1.msra.mxu1 %v4890_v63  ;;  %v7773_v61 = vld [vmem:[#allocation55_spill] sm:$0xff]  ;;  %v7774_v62 = vld [vmem:[#allocation57_spill] sm:$0xff] }
 0x42f   :  { %1978 = vmatprep.subr.mxu0 %v4896_v38  ;;  %2049 = vmatprep.subr.mxu1 %v4902_v46  ;;  %v7775_v63 = vld [vmem:[#allocation59_spill] sm:$0xff]  ;;  %v7777_v46 = vld [vmem:[#allocation86_spill] sm:$0xff] }
 0x430   :  { %1979 = vmatpush1.msra.mxu0 %v4908_v51  ;;  %2050 = vmatpush1.msra.mxu1 %v4914_v55  ;;  %v7776_v38 = vld [vmem:[#allocation67_spill] sm:$0xff]  ;;  %v7779_v55 = vld [vmem:[#allocation76_spill] sm:$0xff] }
 0x431   :  { %1980 = vmatprep.subr.mxu0 %v4920_v48  ;;  %2051 = vmatprep.subr.mxu1 %v4926_v0  ;;  %v7778_v51 = vld [vmem:[#allocation87_spill] sm:$0xff]  ;;  %v7780_v48 = vld [vmem:[#allocation78_spill] sm:$0xff]  ;;  %v7781_v0 = vld [vmem:[#allocation80_spill] sm:$0xff] }
 0x432   :  { %1981 = vmatpush1.msra.mxu0 %v4932_v1  ;;  %2052 = vmatpush1.msra.mxu1 %v4938_v2  ;;  %v7782_v1 = vld [vmem:[#allocation82_spill] sm:$0xff]  ;;  %v7783_v2 = vld [vmem:[#allocation84_spill] sm:$0xff] }
 0x433   :  { %1982 = vmatprep.subr.mxu0 %v4944_v4  ;;  %2053 = vmatprep.subr.mxu1 %v4950_v5  ;;  %v7784_v4 = vld [vmem:[#allocation8_spill] sm:$0xff]  ;;  %v7785_v5 = vld [vmem:[#allocation3_spill] sm:$0xff] }
 0x434   :  { %1983 = vmatpush1.msra.mxu0 %v4956_v6  ;;  %2054 = vmatpush1.msra.mxu1 %v4962_v7  ;;  %v7786_v6 = vld [vmem:[#allocation10_spill] sm:$0xff]  ;;  %v7787_v7 = vld [vmem:[#allocation4_spill] sm:$0xff] }
 0x435   :  { %1984 = vmatprep.subr.mxu0 %v4968_v8  ;;  %2055 = vmatprep.subr.mxu1 %v4974_v9  ;;  %v7788_v8 = vld [vmem:[#allocation12_spill] sm:$0xff]  ;;  %v7789_v9 = vld [vmem:[#allocation5_spill] sm:$0xff] }
 0x436   :  { %1985 = vmatpush1.msra.mxu0 %v4980_v10  ;;  %2056 = vmatpush1.msra.mxu1 %v4986_v11  ;;  %v7790_v10 = vld [vmem:[#allocation14_spill] sm:$0xff] }
 0x437   :  { %1986 = vmatprep.subr.mxu0 %v4992_v12  ;;  %2057 = vmatprep.subr.mxu1 %v4998_v13  ;;  %v7791_v11 = vld [vmem:[#allocation6_spill] sm:$0xff]  ;;  %v7792_v12 = vld [vmem:[#allocation16_spill] sm:$0xff]  ;;  %v7793_v13 = vld [vmem:[#allocation7_spill] sm:$0xff] }
 0x438   :  { %1987 = vmatpush1.msra.mxu0 %v5004_v14  ;;  %2058 = vmatpush1.msra.mxu1 %v5010_v15  ;;  %v7794_v14 = vld [vmem:[#allocation18_spill] sm:$0xff]  ;;  %v7795_v15 = vld [vmem:[#allocation9_spill] sm:$0xff] }
 0x439   :  { %1988 = vmatprep.subr.mxu0 %v5016_v16  ;;  %2059 = vmatprep.subr.mxu1 %v5022_v17  ;;  %v7796_v16 = vld [vmem:[#allocation20_spill] sm:$0xff]  ;;  %v7797_v17 = vld [vmem:[#allocation11_spill] sm:$0xff] }
 0x43a   :  { %1989 = vmatpush1.msra.mxu0 %v7768_v3  ;;  %2060 = vmatpush1.msra.mxu1 %v7769_v54  ;;  %v7801_v3 = vld [vmem:[#allocation15_spill] sm:$0xff] }
 0x43b   :  { %1990 = vmatprep.subr.mxu0 %v7770_v57  ;;  %2061 = vmatprep.subr.mxu1 %v7771_v59  ;;  %v7802_v54 = vld [vmem:[#allocation27_spill] sm:$0xff]  ;;  %v7803_v57 = vld [vmem:[#allocation17_spill] sm:$0xff] }
 0x43c   :  { %1991 = vmatpush1.msra.mxu0 %v7772_v60  ;;  %2062 = vmatpush1.msra.mxu1 %v7773_v61  ;;  %v3128_v59 = vld [vmem:[%s7009_s0 + $0x80] sm:$0xff]  ;;  %v3129_v61 = vld [vmem:[%s7009_s0 + $0x88] sm:$0xff] }
 0x43d   :  { %1992 = vmatprep.subr.mxu0 %v7774_v62  ;;  %2063 = vmatprep.subr.mxu1 %v7775_v63 }
 0x43e   :  { %1993 = vmatpush1.msra.mxu0 %v7776_v38  ;;  %2064 = vmatpush1.msra.mxu1 %v7777_v46 }
 0x43f   :  { %1994 = vmatprep.subr.mxu0 %v7778_v51  ;;  %2065 = vmatprep.subr.mxu1 %v7779_v55 }
 0x440   :  { %1995 = vmatpush1.msra.mxu0 %v7780_v48  ;;  %2066 = vmatpush1.msra.mxu1 %v7781_v0  ;;  %v3131_v48 = vld [vmem:[%s7009_s0 + $0x98] sm:$0xff] }
 0x441   :  { %1996 = vmatprep.subr.mxu0 %v7782_v1  ;;  %2067 = vmatprep.subr.mxu1 %v7783_v2  ;;  %v3130_v2 = vld [vmem:[%s7009_s0 + $0x90] sm:$0xff] }
 0x442   :  { %1997 = vmatpush1.msra.mxu0 %v7784_v4  ;;  %2068 = vmatpush1.msra.mxu1 %v7785_v5 }
 0x443   :  { %1998 = vmatprep.subr.mxu0 %v7786_v6  ;;  %2069 = vmatprep.subr.mxu1 %v7787_v7 }
 0x444   :  { %1999 = vmatpush1.msra.mxu0 %v7788_v8  ;;  %2070 = vmatpush1.msra.mxu1 %v7789_v9 }
 0x445   :  { %2000 = vmatprep.subr.mxu0 %v7790_v10  ;;  %2071 = vmatprep.subr.mxu1 %v7791_v11  ;;  %v3136_v10 = vld [vmem:[%s7010_s1 + $0x60] sm:$0xff] }
 0x446   :  { %2001 = vmatpush1.msra.mxu0 %v7792_v12  ;;  %2072 = vmatpush1.msra.mxu1 %v7793_v13  ;;  %v3137_v13 = vld [vmem:[%s7010_s1 + $0x68] sm:$0xff] }
 0x447   :  { %2002 = vmatprep.subr.mxu0 %v7794_v14  ;;  %2073 = vmatprep.subr.mxu1 %v7795_v15 }
 0x448   :  { %2003 = vmatpush1.msra.mxu0 %v7796_v16  ;;  %2074 = vmatpush1.msra.mxu1 %v7797_v17 }
 0x449   :  { %2004 = vmatprep.subr.mxu0 %v7798_v23  ;;  %2075 = vmatprep.subr.mxu1 %v7799_v21 }
 0x44a   :  { %2005 = vmatpush1.msra.mxu0 %v7800_v29  ;;  %2038 = vmatprep.mubr.f32.mxu0 %v7418_v56 }
 0x44b   :  { %2076 = vmatpush1.msra.mxu1 %v7801_v3  ;;  %2109 = vmatprep.mubr.f32.mxu1 %v7418_v56 }
 0x44c   :  { %2151 = vmatprep.subr.mxu0 %v7802_v54  ;;  %2222 = vmatprep.subr.mxu1 %v7803_v57 }
 0x4c9   :  { %v1686_v60 = vpop.f32.mrf.mxu0  ;;  %v1757_v51 = vpop.f32.mrf.mxu1 }
 0x4ca   :  { %v1762_v62 = vadd.f32 %v3128_v59, %v1686_v60  ;;  %v1764_v6 = vadd.f32 %v3130_v2, %v1757_v51 }
 0x4cb   :  { %v1688_v63 = vpop.f32.mrf.mxu0  ;;  %v1759_v0 = vpop.f32.mrf.mxu1 }
 0x4cc   :  { %v3132_v38 = vmul.f32 -1.442695, %v1762_v62  ;;  %v1763_v46 = vadd.f32 %v3129_v61, %v1688_v63  ;;  %v1765_v1 = vadd.f32 %v3131_v48, %v1759_v0  ;;  %v3139_v62 = vld [vmem:[%s7010_s1 + $0x78] sm:$0xff] }
 0x4ce   :  { %3316 = vpow2.f32 %v3132_v38  ;;  %v3133_v55 = vmul.f32 -1.442695, %v1763_v46  ;;  %v3134_v4 = vmul.f32 -1.442695, %v1765_v1 }
 0x4d0   :  { %3318 = vpow2.f32 %v3133_v55 }
 0x4d1   :  { %3320 = vpow2.f32 %v3134_v4 }
 0x4db   :  { %v3317_v5 = vpop.eup %3316 }
 0x4dc   :  { %v1769_v7 = vadd.f32 1.0, %v3317_v5 }
 0x4dd   :  { %v3319_v8 = vpop.eup %3318 }
 0x4de   :  { %3322 = vrcp.f32 %v1769_v7  ;;  %v1775_v9 = vadd.f32 1.0, %v3319_v8  ;;  %v3321_v11 = vpop.eup %3320  ;;  %v7812_v7 = vld [vmem:[#allocation30_spill] sm:$0xff] }
 0x4df   :  { %3324 = vtanh.f32 %v1764_v6  ;;  %v1782_v57 = vadd.f32 1.0, %v3321_v11  ;;  %v7814_v11 = vld [vmem:[#allocation46_spill] sm:$0xff] }
 0x4e0   :  { %3326 = vrcp.f32 %v1775_v9 }
 0x4ea   :  { %v1863_v12 = vpop.f32.mrf.mxu0  ;;  %v1934_v59 = vpop.f32.mrf.mxu1 }
 0x4eb   :  { %v3323_v14 = vpop.eup %3322  ;;  %v1939_v15 = vadd.f32 %v3136_v10, %v1863_v12  ;;  %v7813_v10 = vld [vmem:[#allocation32_spill] sm:$0xff] }
 0x4ec   :  { %v3325_v16 = vpop.eup %3324  ;;  %v1865_v17 = vpop.f32.mrf.mxu0 }
 0x4ed   :  { %v3327_v23 = vpop.eup %3326  ;;  %v3140_v21 = vmul.f32 -1.442695, %v1939_v15  ;;  %v1940_v29 = vadd.f32 %v3137_v13, %v1865_v17  ;;  %v1786_v3 = vmul.f32 %v3325_v16, %v3323_v14  ;;  %v1936_v63 = vpop.f32.mrf.mxu1  ;;  %v7815_v13 = vld [vmem:[#allocation34_spill] sm:$0xff]  ;;  %v7816_v14 = vld [vmem:[#allocation48_spill] sm:$0xff]  ;;  %v7823_v17 = vld [vmem:[#allocation41_spill] sm:$0xff] }
 0x4ee   :  { %v1785_v54 = vmul.f32 %v3327_v23, %v5742_v18  ;;  %v1942_v38 = vadd.f32 %v3139_v62, %v1936_v63  ;;  %v3138_v18 = vld [vmem:[%s7010_s1 + $0x70] sm:$0xff]  ;;  %v7817_v15 = vld [vmem:[#allocation36_spill] sm:$0xff]  ;;  %v7822_v16 = vld [vmem:[#allocation54_spill] sm:$0xff] }
 0x4ef   :  { %3328 = vpow2.f32 %v3140_v21  ;;  %v3141_v60 = vmul.f32 -1.442695, %v1940_v29  ;;  %v1941_v55 = vadd.f32 %v3138_v18, %v1934_v59  ;;  %v7824_v23 = vld [vmem:[#allocation56_spill] sm:$0xff]  ;;  %v7825_v21 = vld [vmem:[#allocation43_spill] sm:$0xff]  ;;  %v7826_v29 = vld [vmem:[#allocation58_spill] sm:$0xff] }
 0x4f0   :  { %v5912_v61 = vadd.f32 %v1786_v3, %v1785_v54  ;;  %v3142_v46 = vmul.f32 -1.442695, %v1942_v38  ;;  %v7827_v3 = vld [vmem:[#allocation60_spill] sm:$0xff]  ;;  %v7830_v59 = vld [vmem:[#allocation53_spill] sm:$0xff]  ;;  %v7832_v62 = vld [vmem:[#allocation71_spill] sm:$0xff] }
 0x4f1   :  { %3330 = vpow2.f32 %v3141_v60  ;;  %v7828_v54 = vld [vmem:[#allocation64_spill] sm:$0xff]  ;;  %v7831_v60 = vld [vmem:[#allocation69_spill] sm:$0xff]  ;;  %v7834_v38 = vld [vmem:[#allocation75_spill] sm:$0xff] }
 0x4f2   :  { %3332 = vrcp.f32 %v1782_v57  ;;  %v7829_v57 = vld [vmem:[#allocation66_spill] sm:$0xff]  ;;  %v7833_v63 = vld [vmem:[#allocation73_spill] sm:$0xff] }
 0x4f3   :  { %3334 = vtanh.f32 %v5912_v61  ;;  %v7835_v18 = vld [vmem:[#allocation61_spill] sm:$0xff] }
 0x4f4   :  { %3336 = vpow2.f32 %v3142_v46  ;;  %v7836_v46 = vld [vmem:[#allocation63_spill] sm:$0xff] }
 0x4fc   :  { %v3329_v51 = vpop.eup %3328 }
 0x4fd   :  { %v1946_v48 = vadd.f32 1.0, %v3329_v51  ;;  %v7837_v51 = vld [vmem:[#allocation65_spill] sm:$0xff] }
 0x4fe   :  { %v3331_v0 = vpop.eup %3330 }
 0x4ff   :  { %v3333_v1 = vpop.eup %3332  ;;  %3338 = vrcp.f32 %v1946_v48  ;;  %v1952_v2 = vadd.f32 1.0, %v3331_v0  ;;  %v6070_v0 = vld [vmem:[%s7007_s2 + $0x188] sm:$0xff] }
 0x500   :  { %v3335_v4 = vpop.eup %3334  ;;  %3340 = vtanh.f32 %v1941_v55 }
 0x501   :  { %3342 = vrcp.f32 %v1952_v2  ;;  %v1789_v5 = vmul.f32 %v3335_v4, %v3333_v1  ;;  %v6076_v1 = vld [vmem:[%s7007_s2 + $0x198] sm:$0xff]  ;;  %v6082_v2 = vld [vmem:[%s7007_s2 + $0x180] sm:$0xff]  ;;  %v6088_v4 = vld [vmem:[%s7007_s2 + $0x190] sm:$0xff] }
 0x503   :  { %3135 = vst [vmem:[%s7011_s4 + $0x20] sm:$0xff] %v1789_v5  ;;  %2039 = vmatmul.mubr.f32.vlgmr.msra.gmra.mxu0 %v1789_v5  ;;  %2110 = vmatmul.mubr.f32.vlgmr.msra.gmra.mxu1 %v1789_v5  ;;  %v6094_v5 = vld [vmem:[%s7007_s2 + $0x168] sm:$0xff] }
 0x504   :  { %2152 = vmatpush1.msra.mxu0 %v5277_v36  ;;  %2223 = vmatpush1.msra.mxu1 %v5283_v58  ;;  %v7804_v36 = vld [vmem:[#allocation23_spill] sm:$0xff] }
 0x505   :  { %2153 = vmatprep.subr.mxu0 %v5289_v37  ;;  %2224 = vmatprep.subr.mxu1 %v5295_v43  ;;  %v7805_v58 = vld [vmem:[#allocation35_spill] sm:$0xff]  ;;  %v3337_v37 = vpop.eup %3336  ;;  %v7806_v43 = vld [vmem:[#allocation25_spill] sm:$0xff] }
 0x506   :  { %2154 = vmatpush1.msra.mxu0 %v5301_v45  ;;  %2225 = vmatpush1.msra.mxu1 %v5307_v32  ;;  %v7807_v45 = vld [vmem:[#allocation37_spill] sm:$0xff]  ;;  %v1959_v6 = vadd.f32 1.0, %v3337_v37 }
 0x507   :  { %2155 = vmatprep.subr.mxu0 %v5313_v41  ;;  %2226 = vmatprep.subr.mxu1 %v7720_v26  ;;  %v7808_v41 = vld [vmem:[#allocation26_spill] sm:$0xff]  ;;  %v7809_v26 = vld [vmem:[#allocation40_spill] sm:$0xff]  ;;  %v6112_v37 = vld [vmem:[%s7007_s2 + $0x170] sm:$0xff] }
 0x508   :  { %2156 = vmatpush1.msra.mxu0 %v7721_v24  ;;  %2227 = vmatpush1.msra.mxu1 %v7722_v50  ;;  %v7810_v50 = vld [vmem:[#allocation28_spill] sm:$0xff]  ;;  %3344 = vrcp.f32 %v1959_v6  ;;  %v6172_v6 = vld [vmem:[%s7007_s2 + $0x118] sm:$0xff] }
 0x509   :  { %2157 = vmatprep.subr.mxu0 %v7723_v27  ;;  %2228 = vmatprep.subr.mxu1 %v7724_v34  ;;  %v7811_v27 = vld [vmem:[#allocation42_spill] sm:$0xff] }
 0x50a   :  { %2158 = vmatpush1.msra.mxu0 %v7804_v36  ;;  %2229 = vmatpush1.msra.mxu1 %v7805_v58  ;;  %v6100_v36 = vld [vmem:[%s7007_s2 + $0x178] sm:$0xff]  ;;  %v6106_v58 = vld [vmem:[%s7007_s2 + $0x160] sm:$0xff] }
 0x50b   :  { %2159 = vmatprep.subr.mxu0 %v7806_v43  ;;  %2230 = vmatprep.subr.mxu1 %v7807_v45  ;;  %v6118_v43 = vld [vmem:[%s7007_s2 + $0x148] sm:$0xff]  ;;  %v6124_v45 = vld [vmem:[%s7007_s2 + $0x158] sm:$0xff] }
 0x50c   :  { %v3339_v32 = vpop.eup %3338  ;;  %2160 = vmatpush1.msra.mxu0 %v7808_v41  ;;  %2231 = vmatpush1.msra.mxu1 %v7809_v26  ;;  %v6136_v41 = vld [vmem:[%s7007_s2 + $0x150] sm:$0xff]  ;;  %v6142_v26 = vld [vmem:[%s7007_s2 + $0x128] sm:$0xff] }
 0x50d   :  { %v3341_v24 = vpop.eup %3340  ;;  %2161 = vmatprep.subr.mxu0 %v7810_v50  ;;  %2232 = vmatprep.subr.mxu1 %v7811_v27  ;;  %v6154_v50 = vld [vmem:[%s7007_s2 + $0x120] sm:$0xff]  ;;  %v6160_v27 = vld [vmem:[%s7007_s2 + $0x130] sm:$0xff] }
 0x50e   :  { %v3343_v34 = vpop.eup %3342  ;;  %2162 = vmatpush1.msra.mxu0 %v7812_v7  ;;  %2233 = vmatpush1.msra.mxu1 %v5403_v53  ;;  %v1963_v8 = vmul.f32 %v3341_v24, %v3339_v32  ;;  %v7818_v53 = vld [vmem:[#allocation50_spill] sm:$0xff]  ;;  %v6130_v32 = vld [vmem:[%s7007_s2 + $0x140] sm:$0xff] }
 0x50f   :  { %v1962_v9 = vmul.f32 %v3343_v34, %v5781_v52  ;;  %2163 = vmatprep.subr.mxu0 %v5410_v33  ;;  %2234 = vmatprep.subr.mxu1 %v7733_v30  ;;  %v7819_v52 = vld [vmem:[#allocation38_spill] sm:$0xff]  ;;  %v7820_v33 = vld [vmem:[#allocation52_spill] sm:$0xff]  ;;  %v7821_v30 = vld [vmem:[#allocation39_spill] sm:$0xff] }
 0x510   :  { %2164 = vmatpush1.msra.mxu0 %v7813_v10  ;;  %2235 = vmatpush1.msra.mxu1 %v7814_v11  ;;  %v6148_v24 = vld [vmem:[%s7007_s2 + $0x138] sm:$0xff]  ;;  %v6166_v34 = vld [vmem:[%s7007_s2 + $0x108] sm:$0xff]  ;;  %v6178_v7 = vld [vmem:[%s7007_s2 + $0x100] sm:$0xff] }
 0x511   :  { %v5951_v12 = vadd.f32 %v1963_v8, %v1962_v9  ;;  %2165 = vmatprep.subr.mxu0 %v7815_v13  ;;  %2236 = vmatprep.subr.mxu1 %v7816_v14  ;;  %v6184_v8 = vld [vmem:[%s7007_s2 + $0x110] sm:$0xff]  ;;  %v6190_v9 = vld [vmem:[%s7007_s2 + $0xe8] sm:$0xff]  ;;  %v6196_v10 = vld [vmem:[%s7007_s2 + $0xf8] sm:$0xff] }
 0x512   :  { %2166 = vmatpush1.msra.mxu0 %v7817_v15  ;;  %2237 = vmatpush1.msra.mxu1 %v7818_v53  ;;  %v6202_v11 = vld [vmem:[%s7007_s2 + $0xe0] sm:$0xff]  ;;  %v6208_v13 = vld [vmem:[%s7007_s2 + $0xf0] sm:$0xff]  ;;  %v6214_v14 = vld [vmem:[%s7007_s2 + $0xc8] sm:$0xff] }
 0x513   :  { %2167 = vmatprep.subr.mxu0 %v7819_v52  ;;  %2238 = vmatprep.subr.mxu1 %v7820_v33  ;;  %3346 = vtanh.f32 %v5951_v12  ;;  %v6220_v15 = vld [vmem:[%s7007_s2 + $0xd8] sm:$0xff]  ;;  %v6226_v53 = vld [vmem:[%s7007_s2 + $0xc0] sm:$0xff]  ;;  %v6232_v52 = vld [vmem:[%s7007_s2 + $0xd0] sm:$0xff] }
 0x514   :  { %2168 = vmatpush1.msra.mxu0 %v7821_v30  ;;  %2239 = vmatpush1.msra.mxu1 %v7822_v16  ;;  %v6238_v33 = vld [vmem:[%s7007_s2 + $0xa8] sm:$0xff]  ;;  %v6244_v30 = vld [vmem:[%s7007_s2 + $0xb8] sm:$0xff]  ;;  %v6250_v16 = vld [vmem:[%s7007_s2 + $0xa0] sm:$0xff] }
 0x515   :  { %2169 = vmatprep.subr.mxu0 %v7823_v17  ;;  %2240 = vmatprep.subr.mxu1 %v7824_v23  ;;  %v3345_v55 = vpop.eup %3344  ;;  %v6256_v17 = vld [vmem:[%s7007_s2 + $0xb0] sm:$0xff]  ;;  %v6262_v23 = vld [vmem:[%s7007_s2 + $0x88] sm:$0xff] }
 0x516   :  { %2170 = vmatpush1.msra.mxu0 %v7825_v21  ;;  %2241 = vmatpush1.msra.mxu1 %v7826_v29  ;;  %7838 = vst [vmem:[#allocation88_spill] sm:$0xff] %v6262_v23  ;;  %v6268_v21 = vld [vmem:[%s7007_s2 + $0x98] sm:$0xff]  ;;  %v6274_v29 = vld [vmem:[%s7007_s2 + $0x80] sm:$0xff] }
 0x517   :  { %2171 = vmatprep.subr.mxu0 %v7827_v3  ;;  %2242 = vmatprep.subr.mxu1 %v7828_v54  ;;  %7839 = vst [vmem:[#allocation29_spill] sm:$0xff] %v6268_v21  ;;  %7840 = vst [vmem:[#allocation19_spill] sm:$0xff] %v6274_v29  ;;  %v6280_v3 = vld [vmem:[%s7007_s2 + $0x90] sm:$0xff]  ;;  %v6286_v54 = vld [vmem:[%s7007_s2 + $0x68] sm:$0xff] }
 0x518   :  { %2172 = vmatpush1.msra.mxu0 %v7829_v57  ;;  %2243 = vmatpush1.msra.mxu1 %v7830_v59  ;;  %7841 = vst [vmem:[#allocation31_spill] sm:$0xff] %v6280_v3  ;;  %7842 = vst [vmem:[#allocation21_spill] sm:$0xff] %v6286_v54  ;;  %v6292_v57 = vld [vmem:[%s7007_s2 + $0x78] sm:$0xff]  ;;  %v6298_v59 = vld [vmem:[%s7007_s2 + $0x60] sm:$0xff] }
 0x519   :  { %2173 = vmatprep.subr.mxu0 %v7831_v60  ;;  %2244 = vmatprep.subr.mxu1 %v7832_v62  ;;  %7843 = vst [vmem:[#allocation33_spill] sm:$0xff] %v6292_v57  ;;  %7844 = vst [vmem:[#allocation44_spill] sm:$0xff] %v6298_v59  ;;  %v6304_v60 = vld [vmem:[%s7007_s2 + $0x70] sm:$0xff]  ;;  %v6310_v62 = vld [vmem:[%s7007_s2 + $0x48] sm:$0xff] }
 0x51a   :  { %2174 = vmatpush1.msra.mxu0 %v7833_v63  ;;  %2245 = vmatpush1.msra.mxu1 %v7834_v38  ;;  %7845 = vst [vmem:[#allocation77_spill] sm:$0xff] %v6304_v60  ;;  %7846 = vst [vmem:[#allocation79_spill] sm:$0xff] %v6310_v62  ;;  %v6316_v63 = vld [vmem:[%s7007_s2 + $0x58] sm:$0xff]  ;;  %v6322_v38 = vld [vmem:[%s7007_s2 + $0x40] sm:$0xff] }
 0x51b   :  { %2175 = vmatprep.subr.mxu0 %v7835_v18  ;;  %2246 = vmatprep.subr.mxu1 %v7757_v40  ;;  %v6040_v40 = vld [vmem:[%s7007_s2 + $0x1d0] sm:$0xff]  ;;  %7847 = vst [vmem:[#allocation81_spill] sm:$0xff] %v6316_v63  ;;  %7848 = vst [vmem:[#allocation83_spill] sm:$0xff] %v6322_v38 }
 0x51c   :  { %2176 = vmatpush1.msra.mxu0 %v7836_v46  ;;  %2247 = vmatpush1.msra.mxu1 %v7759_v49  ;;  %v6328_v18 = vld [vmem:[%s7007_s2 + $0x50] sm:$0xff]  ;;  %v6334_v46 = vld [vmem:[%s7007_s2 + $0x28] sm:$0xff] }
 0x51d   :  { %2177 = vmatprep.subr.mxu0 %v7837_v51  ;;  %2248 = vmatprep.subr.mxu1 %v7761_v42  ;;  %v6046_v42 = vld [vmem:[%s7007_s2 + $0x1a8] sm:$0xff]  ;;  %7849 = vst [vmem:[#allocation68_spill] sm:$0xff] %v6328_v18  ;;  %7850 = vst [vmem:[#allocation85_spill] sm:$0xff] %v6334_v46  ;;  %v6340_v51 = vld [vmem:[%s7007_s2 + $0x38] sm:$0xff] }
 0x51e   :  { %2178 = vmatpush1.msra.mxu0 %v7762_v19  ;;  %2249 = vmatpush1.msra.mxu1 %v7763_v44  ;;  %v5998_v44 = vld [vmem:[%s7007_s2 + $0x1e8] sm:$0xff]  ;;  %v6052_v19 = vld [vmem:[%s7007_s2 + $0x1b8] sm:$0xff]  ;;  %7851 = vst [vmem:[#allocation70_spill] sm:$0xff] %v6340_v51 }
 0x51f   :  { %2179 = vmatprep.subr.mxu0 %v7764_v20  ;;  %2250 = vmatprep.subr.mxu1 %v7765_v35  ;;  %v6034_v20 = vld [vmem:[%s7007_s2 + $0x1c0] sm:$0xff] }
 0x520   :  { %v3347_v48 = vpop.eup %3346  ;;  %2180 = vmatpush1.msra.mxu0 %v7766_v22  ;;  %2251 = vmatpush1.msra.mxu1 %v5623_v28  ;;  %v6016_v28 = vld [vmem:[%s7007_s2 + $0x1f0] sm:$0xff]  ;;  %v6028_v22 = vld [vmem:[%s7007_s2 + $0x1d8] sm:$0xff]  ;;  %v6058_v35 = vld [vmem:[%s7007_s2 + $0x1a0] sm:$0xff] }
 0x521   :  { %2181 = vmatprep.subr.mxu0 %v7767_v39  ;;  %2252 = vmatprep.subr.mxu1 %v5635_v25  ;;  %v1966_v49 = vmul.f32 %v3347_v48, %v3345_v55  ;;  %v6022_v25 = vld [vmem:[%s7007_s2 + $0x1c8] sm:$0xff]  ;;  %v6064_v39 = vld [vmem:[%s7007_s2 + $0x1b0] sm:$0xff]  ;;  %v6346_v55 = vld [vmem:[%s7007_s2 + $0x20] sm:$0xff] }
 0x522   :  { %2182 = vmatpush1.msra.mxu0 %v5641_v31  ;;  %2215 = vmatprep.mubr.f32.mxu0 %v7418_v56  ;;  %v6004_v31 = vld [vmem:[%s7007_s2 + $0x1f8] sm:$0xff]  ;;  %7852 = vst [vmem:[#allocation72_spill] sm:$0xff] %v6346_v55  ;;  %v6352_v48 = vld [vmem:[%s7007_s2 + $0x30] sm:$0xff] }
 0x523   :  { %2253 = vmatpush1.msra.mxu1 %v5648_v47  ;;  %2286 = vmatprep.mubr.f32.mxu1 %v7418_v56  ;;  %3143 = vst [vmem:[%s7012_s5 + $0x18] sm:$0xff] %v1966_v49  ;;  %v6010_v47 = vld [vmem:[%s7007_s2 + $0x1e0] sm:$0xff]  ;;  %7853 = vst [vmem:[#allocation74_spill] sm:$0xff] %v6352_v48 }
 0x524   :  { %2216 = vmatmul.mubr.f32.vlgmr.msra.gmra.mxu0 %v1966_v49  ;;  %2287 = vmatmul.mubr.f32.vlgmr.msra.gmra.mxu1 %v1966_v49  ;;  %v6358_v49 = vld [vmem:[%s7007_s2 + $0x8] sm:$0xff] }
 0x525   :  { %2328 = vmatprep.subr.mxu0 %v5998_v44  ;;  %2399 = vmatprep.subr.mxu1 %v6004_v31  ;;  %7854 = vst [vmem:[#allocation45_spill] sm:$0xff] %v6358_v49 }
 0x526   :  { %2329 = vmatpush1.msra.mxu0 %v6010_v47  ;;  %2400 = vmatpush1.msra.mxu1 %v6016_v28 }
 0x527   :  { %2330 = vmatprep.subr.mxu0 %v6022_v25  ;;  %2401 = vmatprep.subr.mxu1 %v6028_v22 }
 0x528   :  { %2331 = vmatpush1.msra.mxu0 %v6034_v20  ;;  %2402 = vmatpush1.msra.mxu1 %v6040_v40 }
 0x529   :  { %2332 = vmatprep.subr.mxu0 %v6046_v42  ;;  %2403 = vmatprep.subr.mxu1 %v6052_v19 }
 0x52a   :  { %2333 = vmatpush1.msra.mxu0 %v6058_v35  ;;  %2404 = vmatpush1.msra.mxu1 %v6064_v39 }
 0x52b   :  { %2334 = vmatprep.subr.mxu0 %v6070_v0  ;;  %2405 = vmatprep.subr.mxu1 %v6076_v1 }
 0x52c   :  { %2335 = vmatpush1.msra.mxu0 %v6082_v2  ;;  %2406 = vmatpush1.msra.mxu1 %v6088_v4 }
 0x52d   :  { %2336 = vmatprep.subr.mxu0 %v6094_v5  ;;  %2407 = vmatprep.subr.mxu1 %v6100_v36 }
 0x52e   :  { %2337 = vmatpush1.msra.mxu0 %v6106_v58  ;;  %2408 = vmatpush1.msra.mxu1 %v6112_v37 }
 0x52f   :  { %2338 = vmatprep.subr.mxu0 %v6118_v43  ;;  %2409 = vmatprep.subr.mxu1 %v6124_v45 }
 0x530   :  { %2339 = vmatpush1.msra.mxu0 %v6130_v32  ;;  %2410 = vmatpush1.msra.mxu1 %v6136_v41 }
 0x531   :  { %2340 = vmatprep.subr.mxu0 %v6142_v26  ;;  %2411 = vmatprep.subr.mxu1 %v6148_v24 }
 0x532   :  { %2341 = vmatpush1.msra.mxu0 %v6154_v50  ;;  %2412 = vmatpush1.msra.mxu1 %v6160_v27 }
 0x533   :  { %2342 = vmatprep.subr.mxu0 %v6166_v34  ;;  %2413 = vmatprep.subr.mxu1 %v6172_v6 }
 0x534   :  { %2343 = vmatpush1.msra.mxu0 %v6178_v7  ;;  %2414 = vmatpush1.msra.mxu1 %v6184_v8 }
 0x535   :  { %2344 = vmatprep.subr.mxu0 %v6190_v9  ;;  %2415 = vmatprep.subr.mxu1 %v6196_v10 }
 0x536   :  { %2345 = vmatpush1.msra.mxu0 %v6202_v11  ;;  %2416 = vmatpush1.msra.mxu1 %v6208_v13 }
 0x537   :  { %2346 = vmatprep.subr.mxu0 %v6214_v14  ;;  %2417 = vmatprep.subr.mxu1 %v6220_v15 }
 0x538   :  { %2347 = vmatpush1.msra.mxu0 %v6226_v53  ;;  %2418 = vmatpush1.msra.mxu1 %v6232_v52 }
 0x539   :  { %2348 = vmatprep.subr.mxu0 %v6238_v33  ;;  %2419 = vmatprep.subr.mxu1 %v6244_v30 }
 0x53a   :  { %2349 = vmatpush1.msra.mxu0 %v6250_v16  ;;  %2420 = vmatpush1.msra.mxu1 %v6256_v17 }
 0x53b   :  { %2350 = vmatprep.subr.mxu0 %v6262_v23  ;;  %2421 = vmatprep.subr.mxu1 %v6268_v21 }
 0x53c   :  { %2351 = vmatpush1.msra.mxu0 %v6274_v29  ;;  %2422 = vmatpush1.msra.mxu1 %v6280_v3 }
 0x53d   :  { %2352 = vmatprep.subr.mxu0 %v6286_v54  ;;  %2423 = vmatprep.subr.mxu1 %v6292_v57  ;;  %v3146_v54 = vld [vmem:[%s7009_s0 + $0xb0] sm:$0xff] }
 0x53e   :  { %2353 = vmatpush1.msra.mxu0 %v6298_v59  ;;  %2424 = vmatpush1.msra.mxu1 %v6304_v60 }
 0x53f   :  { %2354 = vmatprep.subr.mxu0 %v6310_v62  ;;  %2425 = vmatprep.subr.mxu1 %v6316_v63 }
 0x540   :  { %2355 = vmatpush1.msra.mxu0 %v6322_v38  ;;  %2426 = vmatpush1.msra.mxu1 %v6328_v18 }
 0x541   :  { %2356 = vmatprep.subr.mxu0 %v6334_v46  ;;  %2427 = vmatprep.subr.mxu1 %v6340_v51  ;;  %v6364_v51 = vld [vmem:[%s7007_s2 + $0x18] sm:$0xff]  ;;  %v3145_v46 = vld [vmem:[%s7009_s0 + $0xa8] sm:$0xff] }
 0x542   :  { %2357 = vmatpush1.msra.mxu0 %v6346_v55  ;;  %2428 = vmatpush1.msra.mxu1 %v6352_v48  ;;  %7855 = vst [vmem:[#allocation47_spill] sm:$0xff] %v6364_v51  ;;  %v6370_v55 = vld [vmem:[%s7007_s2] sm:$0xff] }
 0x543   :  { %2358 = vmatprep.subr.mxu0 %v6358_v49  ;;  %2429 = vmatprep.subr.mxu1 %v6364_v51  ;;  %7856 = vst [vmem:[#allocation62_spill] sm:$0xff] %v6370_v55  ;;  %v6377_v49 = vld [vmem:[%s7007_s2 + $0x10] sm:$0xff]  ;;  %v6384_v51 = vld [vmem:[%s7008_s3 + $0x1e8] sm:$0xff] }
 0x544   :  { %2359 = vmatpush1.msra.mxu0 %v6370_v55  ;;  %2392 = vmatprep.mubr.f32.mxu0 %v7418_v56  ;;  %7857 = vst [vmem:[#allocation49_spill] sm:$0xff] %v6377_v49  ;;  %7858 = vst [vmem:[#allocation51_spill] sm:$0xff] %v6384_v51  ;;  %v6390_v55 = vld [vmem:[%s7008_s3 + $0x1f8] sm:$0xff] }
 0x545   :  { %2430 = vmatpush1.msra.mxu1 %v6377_v49  ;;  %2463 = vmatprep.mubr.f32.mxu1 %v7418_v56  ;;  %7859 = vst [vmem:[#allocation55_spill] sm:$0xff] %v6390_v55  ;;  %v3144_v49 = vld [vmem:[%s7009_s0 + $0xa0] sm:$0xff] }
 0x546   :  { %2505 = vmatprep.subr.mxu0 %v6384_v51  ;;  %2576 = vmatprep.subr.mxu1 %v6390_v55  ;;  %v3147_v55 = vld [vmem:[%s7009_s0 + $0xb8] sm:$0xff] }
 0x5c3   :  { %v2040_v48 = vpop.f32.mrf.mxu0  ;;  %v2111_v62 = vpop.f32.mrf.mxu1 }
 0x5c4   :  { %v2116_v18 = vadd.f32 %v3144_v49, %v2040_v48  ;;  %v2118_v48 = vadd.f32 %v3146_v54, %v2111_v62 }
 0x5c5   :  { %v2042_v38 = vpop.f32.mrf.mxu0  ;;  %v2113_v59 = vpop.f32.mrf.mxu1 }
 0x5c6   :  { %v3148_v63 = vmul.f32 -1.442695, %v2116_v18  ;;  %v2117_v51 = vadd.f32 %v3145_v46, %v2042_v38  ;;  %v2119_v57 = vadd.f32 %v3147_v55, %v2113_v59  ;;  %v3153_v46 = vld [vmem:[%s7010_s1 + $0x48] sm:$0xff] }
 0x5c8   :  { %3348 = vpow2.f32 %v3148_v63  ;;  %v3149_v60 = vmul.f32 -1.442695, %v2117_v51  ;;  %v3150_v3 = vmul.f32 -1.442695, %v2119_v57 }
 0x5ca   :  { %3350 = vpow2.f32 %v3149_v60  ;;  %v3152_v60 = vld [vmem:[%s7010_s1 + $0x40] sm:$0xff] }
 0x5cb   :  { %3352 = vpow2.f32 %v3150_v3 }
 0x5d5   :  { %v3349_v29 = vpop.eup %3348 }
 0x5d6   :  { %v2123_v49 = vadd.f32 1.0, %v3349_v29 }
 0x5d7   :  { %v3351_v18 = vpop.eup %3350 }
 0x5d8   :  { %3354 = vrcp.f32 %v2123_v49  ;;  %v2129_v63 = vadd.f32 1.0, %v3351_v18  ;;  %v3353_v38 = vpop.eup %3352 }
 0x5d9   :  { %3356 = vtanh.f32 %v2118_v48  ;;  %v2136_v18 = vadd.f32 1.0, %v3353_v38 }
 0x5da   :  { %3358 = vrcp.f32 %v2129_v63 }
 0x5e4   :  { %v2217_v59 = vpop.f32.mrf.mxu0  ;;  %v2288_v63 = vpop.f32.mrf.mxu1 }
 0x5e5   :  { %v3355_v57 = vpop.eup %3354  ;;  %v2293_v51 = vadd.f32 %v3152_v60, %v2217_v59  ;;  %v3155_v60 = vld [vmem:[%s7010_s1 + $0x58] sm:$0xff] }
 0x5e6   :  { %v3357_v54 = vpop.eup %3356  ;;  %v2219_v29 = vpop.f32.mrf.mxu0 }
 0x5e7   :  { %v3359_v62 = vpop.eup %3358  ;;  %v3156_v3 = vmul.f32 -1.442695, %v2293_v51  ;;  %v2294_v55 = vadd.f32 %v3153_v46, %v2219_v29  ;;  %v2140_v49 = vmul.f32 %v3357_v54, %v3355_v57  ;;  %v2290_v59 = vpop.f32.mrf.mxu1 }
 0x5e8   :  { %v2139_v48 = vmul.f32 %v3359_v62, %v5912_v61  ;;  %v2296_v51 = vadd.f32 %v3155_v60, %v2290_v59  ;;  %v3154_v61 = vld [vmem:[%s7010_s1 + $0x50] sm:$0xff]  ;;  %v6451_v60 = vld [vmem:[%s7008_s3 + $0x1c0] sm:$0xff] }
 0x5e9   :  { %3360 = vpow2.f32 %v3156_v3  ;;  %v3157_v21 = vmul.f32 -1.442695, %v2294_v55  ;;  %v2295_v57 = vadd.f32 %v3154_v61, %v2288_v63  ;;  %v6445_v63 = vld [vmem:[%s7008_s3 + $0x1d8] sm:$0xff]  ;;  %v6457_v59 = vld [vmem:[%s7008_s3 + $0x1d0] sm:$0xff] }
 0x5ea   :  { %v6412_v23 = vadd.f32 %v2140_v49, %v2139_v48  ;;  %v3158_v38 = vmul.f32 -1.442695, %v2296_v51  ;;  %v6427_v49 = vld [vmem:[%s7008_s3 + $0x1e0] sm:$0xff]  ;;  %v6433_v48 = vld [vmem:[%s7008_s3 + $0x1f0] sm:$0xff]  ;;  %v6463_v51 = vld [vmem:[%s7008_s3 + $0x1a8] sm:$0xff] }
 0x5eb   :  { %3362 = vpow2.f32 %v3157_v21  ;;  %v6469_v61 = vld [vmem:[%s7008_s3 + $0x1b8] sm:$0xff] }
 0x5ec   :  { %3364 = vrcp.f32 %v2136_v18  ;;  %v6439_v18 = vld [vmem:[%s7008_s3 + $0x1c8] sm:$0xff]  ;;  %7860 = vst [vmem:[#allocation57_spill] sm:$0xff] %v6469_v61 }
 0x5ed   :  { %3366 = vtanh.f32 %v6412_v23 }
 0x5ee   :  { %3368 = vpow2.f32 %v3158_v38  ;;  %v6475_v38 = vld [vmem:[%s7008_s3 + $0x1a0] sm:$0xff] }
 0x5ef   :  { %7861 = vst [vmem:[#allocation59_spill] sm:$0xff] %v6475_v38 }
 0x5f6   :  { %v3361_v46 = vpop.eup %3360 }
 0x5f7   :  { %v2300_v54 = vadd.f32 1.0, %v3361_v46  ;;  %v6481_v46 = vld [vmem:[%s7008_s3 + $0x1b0] sm:$0xff] }
 0x5f8   :  { %v3363_v29 = vpop.eup %3362  ;;  %7862 = vst [vmem:[#allocation67_spill] sm:$0xff] %v6481_v46 }
 0x5f9   :  { %v3365_v21 = vpop.eup %3364  ;;  %3370 = vrcp.f32 %v2300_v54  ;;  %v2306_v62 = vadd.f32 1.0, %v3363_v29  ;;  %v6493_v54 = vld [vmem:[%s7008_s3 + $0x198] sm:$0xff]  ;;  %v6499_v29 = vld [vmem:[%s7008_s3 + $0x180] sm:$0xff] }
 0x5fa   :  { %v3367_v3 = vpop.eup %3366  ;;  %3372 = vtanh.f32 %v2295_v57  ;;  %v6487_v57 = vld [vmem:[%s7008_s3 + $0x188] sm:$0xff]  ;;  %7864 = vst [vmem:[#allocation87_spill] sm:$0xff] %v6493_v54  ;;  %7865 = vst [vmem:[#allocation76_spill] sm:$0xff] %v6499_v29 }
 0x5fb   :  { %3374 = vrcp.f32 %v2306_v62  ;;  %v2143_v55 = vmul.f32 %v3367_v3, %v3365_v21  ;;  %7863 = vst [vmem:[#allocation86_spill] sm:$0xff] %v6487_v57  ;;  %v6505_v21 = vld [vmem:[%s7008_s3 + $0x190] sm:$0xff]  ;;  %v3369_v62 = vpop.eup %3368  ;;  %v6511_v3 = vld [vmem:[%s7008_s3 + $0x168] sm:$0xff] }
 0x5fc   :  { %7866 = vst [vmem:[#allocation78_spill] sm:$0xff] %v6505_v21  ;;  %7867 = vst [vmem:[#allocation80_spill] sm:$0xff] %v6511_v3 }
 0x5fd   :  { %3151 = vst [vmem:[%s7011_s4 + $0x28] sm:$0xff] %v2143_v55  ;;  %2393 = vmatmul.mubr.f32.vlgmr.msra.gmra.mxu0 %v2143_v55  ;;  %2464 = vmatmul.mubr.f32.vlgmr.msra.gmra.mxu1 %v2143_v55  ;;  %v6517_v55 = vld [vmem:[%s7008_s3 + $0x178] sm:$0xff] }
 0x5fe   :  { %2506 = vmatpush1.msra.mxu0 %v6427_v49  ;;  %2577 = vmatpush1.msra.mxu1 %v6433_v48  ;;  %7868 = vst [vmem:[#allocation82_spill] sm:$0xff] %v6517_v55 }
 0x5ff   :  { %2507 = vmatprep.subr.mxu0 %v6439_v18  ;;  %2578 = vmatprep.subr.mxu1 %v6445_v63 }
 0x600   :  { %2508 = vmatpush1.msra.mxu0 %v6451_v60  ;;  %2579 = vmatpush1.msra.mxu1 %v6457_v59 }
 0x601   :  { %2509 = vmatprep.subr.mxu0 %v6463_v51  ;;  %2580 = vmatprep.subr.mxu1 %v6469_v61 }
 0x602   :  { %2510 = vmatpush1.msra.mxu0 %v6475_v38  ;;  %2581 = vmatpush1.msra.mxu1 %v6481_v46  ;;  %v2313_v46 = vadd.f32 1.0, %v3369_v62  ;;  %v6560_v62 = vld [vmem:[%s7008_s3 + $0x128] sm:$0xff] }
 0x603   :  { %2511 = vmatprep.subr.mxu0 %v6487_v57  ;;  %2582 = vmatprep.subr.mxu1 %v6493_v54  ;;  %v6529_v54 = vld [vmem:[%s7008_s3 + $0x170] sm:$0xff]  ;;  %v6541_v57 = vld [vmem:[%s7008_s3 + $0x158] sm:$0xff] }
 0x604   :  { %2512 = vmatpush1.msra.mxu0 %v6499_v29  ;;  %2583 = vmatpush1.msra.mxu1 %v6505_v21  ;;  %v6523_v21 = vld [vmem:[%s7008_s3 + $0x160] sm:$0xff]  ;;  %7870 = vst [vmem:[#allocation8_spill] sm:$0xff] %v6529_v54  ;;  %3376 = vrcp.f32 %v2313_v46  ;;  %v6616_v46 = vld [vmem:[%s7008_s3 + $0xf8] sm:$0xff] }
 0x605   :  { %2513 = vmatprep.subr.mxu0 %v6511_v3  ;;  %2584 = vmatprep.subr.mxu1 %v6517_v55  ;;  %7869 = vst [vmem:[#allocation84_spill] sm:$0xff] %v6523_v21  ;;  %v6535_v55 = vld [vmem:[%s7008_s3 + $0x148] sm:$0xff]  ;;  %7881 = vst [vmem:[#allocation9_spill] sm:$0xff] %v6616_v46 }
 0x606   :  { %v3371_v29 = vpop.eup %3370  ;;  %2514 = vmatpush1.msra.mxu0 %v6523_v21  ;;  %2585 = vmatpush1.msra.mxu1 %v6529_v54  ;;  %7871 = vst [vmem:[#allocation3_spill] sm:$0xff] %v6535_v55  ;;  %v6547_v54 = vld [vmem:[%s7008_s3 + $0x140] sm:$0xff] }
 0x607   :  { %v3373_v3 = vpop.eup %3372  ;;  %2515 = vmatprep.subr.mxu0 %v6535_v55  ;;  %2586 = vmatprep.subr.mxu1 %v6541_v57  ;;  %7872 = vst [vmem:[#allocation10_spill] sm:$0xff] %v6547_v54  ;;  %v6553_v55 = vld [vmem:[%s7008_s3 + $0x150] sm:$0xff] }
 0x608   :  { %v3375_v21 = vpop.eup %3374  ;;  %2516 = vmatpush1.msra.mxu0 %v6547_v54  ;;  %2587 = vmatpush1.msra.mxu1 %v6553_v55  ;;  %v2317_v38 = vmul.f32 %v3373_v3, %v3371_v29  ;;  %v6566_v54 = vld [vmem:[%s7008_s3 + $0x138] sm:$0xff]  ;;  %v6572_v29 = vld [vmem:[%s7008_s3 + $0x120] sm:$0xff]  ;;  %v6586_v3 = vld [vmem:[%s7008_s3 + $0x108] sm:$0xff] }
 0x609   :  { %v2316_v61 = vmul.f32 %v3375_v21, %v5951_v12  ;;  %2517 = vmatprep.subr.mxu0 %v6560_v62  ;;  %7873 = vst [vmem:[#allocation4_spill] sm:$0xff] %v6566_v54  ;;  %2588 = vmatprep.subr.mxu1 %v6566_v54  ;;  %7874 = vst [vmem:[#allocation12_spill] sm:$0xff] %v6572_v29  ;;  %v6578_v12 = vld [vmem:[%s7008_s3 + $0x130] sm:$0xff]  ;;  %v6791_v54 = vld [vmem:[%s7008_s3] sm:$0xff] }
 0x60a   :  { %2518 = vmatpush1.msra.mxu0 %v6572_v29  ;;  %7875 = vst [vmem:[#allocation5_spill] sm:$0xff] %v6578_v12  ;;  %2589 = vmatpush1.msra.mxu1 %v6578_v12  ;;  %7876 = vst [vmem:[#allocation14_spill] sm:$0xff] %v6586_v3  ;;  %v6592_v29 = vld [vmem:[%s7008_s3 + $0x118] sm:$0xff]  ;;  %v6773_v12 = vld [vmem:[%s7008_s3 + $0x30] sm:$0xff] }
 0x60b   :  { %v6581_v21 = vadd.f32 %v2317_v38, %v2316_v61  ;;  %2519 = vmatprep.subr.mxu0 %v6586_v3  ;;  %7877 = vst [vmem:[#allocation6_spill] sm:$0xff] %v6592_v29  ;;  %2590 = vmatprep.subr.mxu1 %v6592_v29  ;;  %v6598_v61 = vld [vmem:[%s7008_s3 + $0x100] sm:$0xff]  ;;  %v6604_v38 = vld [vmem:[%s7008_s3 + $0x110] sm:$0xff]  ;;  %v6610_v3 = vld [vmem:[%s7008_s3 + $0xe8] sm:$0xff] }
 0x60c   :  { %7878 = vst [vmem:[#allocation16_spill] sm:$0xff] %v6598_v61  ;;  %2520 = vmatpush1.msra.mxu0 %v6598_v61  ;;  %7879 = vst [vmem:[#allocation7_spill] sm:$0xff] %v6604_v38  ;;  %2591 = vmatpush1.msra.mxu1 %v6604_v38  ;;  %v6623_v38 = vld [vmem:[%s7008_s3 + $0xe0] sm:$0xff]  ;;  %v6641_v61 = vld [vmem:[%s7008_s3 + $0xd8] sm:$0xff] }
 0x60d   :  { %7880 = vst [vmem:[#allocation18_spill] sm:$0xff] %v6610_v3  ;;  %2521 = vmatprep.subr.mxu0 %v6610_v3  ;;  %2592 = vmatprep.subr.mxu1 %v6616_v46  ;;  %3378 = vtanh.f32 %v6581_v21  ;;  %7882 = vst [vmem:[#allocation20_spill] sm:$0xff] %v6623_v38  ;;  %v6629_v3 = vld [vmem:[%s7008_s3 + $0xf0] sm:$0xff]  ;;  %v6635_v46 = vld [vmem:[%s7008_s3 + $0xc8] sm:$0xff] }
 0x60e   :  { %2522 = vmatpush1.msra.mxu0 %v6623_v38  ;;  %7883 = vst [vmem:[#allocation11_spill] sm:$0xff] %v6629_v3  ;;  %2593 = vmatpush1.msra.mxu1 %v6629_v3  ;;  %7884 = vst [vmem:[#allocation22_spill] sm:$0xff] %v6635_v46  ;;  %v6647_v38 = vld [vmem:[%s7008_s3 + $0xc0] sm:$0xff]  ;;  %v6653_v3 = vld [vmem:[%s7008_s3 + $0xd0] sm:$0xff] }
 0x60f   :  { %2523 = vmatprep.subr.mxu0 %v6635_v46  ;;  %7885 = vst [vmem:[#allocation13_spill] sm:$0xff] %v6641_v61  ;;  %2594 = vmatprep.subr.mxu1 %v6641_v61  ;;  %7886 = vst [vmem:[#allocation24_spill] sm:$0xff] %v6647_v38  ;;  %v6659_v46 = vld [vmem:[%s7008_s3 + $0xa8] sm:$0xff]  ;;  %v6665_v61 = vld [vmem:[%s7008_s3 + $0xb8] sm:$0xff] }
 0x610   :  { %2524 = vmatpush1.msra.mxu0 %v6647_v38  ;;  %7887 = vst [vmem:[#allocation15_spill] sm:$0xff] %v6653_v3  ;;  %2595 = vmatpush1.msra.mxu1 %v6653_v3  ;;  %7888 = vst [vmem:[#allocation27_spill] sm:$0xff] %v6659_v46  ;;  %v6671_v38 = vld [vmem:[%s7008_s3 + $0xa0] sm:$0xff]  ;;  %v6677_v3 = vld [vmem:[%s7008_s3 + $0xb0] sm:$0xff] }
 0x611   :  { %2525 = vmatprep.subr.mxu0 %v6659_v46  ;;  %7889 = vst [vmem:[#allocation17_spill] sm:$0xff] %v6665_v61  ;;  %2596 = vmatprep.subr.mxu1 %v6665_v61  ;;  %7890 = vst [vmem:[#allocation23_spill] sm:$0xff] %v6671_v38  ;;  %v6683_v46 = vld [vmem:[%s7008_s3 + $0x88] sm:$0xff]  ;;  %v6689_v61 = vld [vmem:[%s7008_s3 + $0x98] sm:$0xff] }
 0x612   :  { %2526 = vmatpush1.msra.mxu0 %v6671_v38  ;;  %7891 = vst [vmem:[#allocation35_spill] sm:$0xff] %v6677_v3  ;;  %2597 = vmatpush1.msra.mxu1 %v6677_v3  ;;  %7892 = vst [vmem:[#allocation25_spill] sm:$0xff] %v6683_v46  ;;  %v6695_v38 = vld [vmem:[%s7008_s3 + $0x80] sm:$0xff]  ;;  %v6701_v3 = vld [vmem:[%s7008_s3 + $0x90] sm:$0xff] }
 0x613   :  { %2527 = vmatprep.subr.mxu0 %v6683_v46  ;;  %7893 = vst [vmem:[#allocation37_spill] sm:$0xff] %v6689_v61  ;;  %2598 = vmatprep.subr.mxu1 %v6689_v61  ;;  %7894 = vst [vmem:[#allocation26_spill] sm:$0xff] %v6695_v38  ;;  %v6707_v46 = vld [vmem:[%s7008_s3 + $0x68] sm:$0xff]  ;;  %v6713_v61 = vld [vmem:[%s7008_s3 + $0x78] sm:$0xff] }
 0x614   :  { %2528 = vmatpush1.msra.mxu0 %v6695_v38  ;;  %7895 = vst [vmem:[#allocation40_spill] sm:$0xff] %v6701_v3  ;;  %2599 = vmatpush1.msra.mxu1 %v6701_v3  ;;  %7896 = vst [vmem:[#allocation28_spill] sm:$0xff] %v6707_v46  ;;  %v6719_v38 = vld [vmem:[%s7008_s3 + $0x60] sm:$0xff]  ;;  %v6725_v3 = vld [vmem:[%s7008_s3 + $0x70] sm:$0xff] }
 0x615   :  { %2529 = vmatprep.subr.mxu0 %v6707_v46  ;;  %7897 = vst [vmem:[#allocation42_spill] sm:$0xff] %v6713_v61  ;;  %2600 = vmatprep.subr.mxu1 %v6713_v61  ;;  %7898 = vst [vmem:[#allocation30_spill] sm:$0xff] %v6719_v38  ;;  %v6731_v46 = vld [vmem:[%s7008_s3 + $0x48] sm:$0xff]  ;;  %v6737_v61 = vld [vmem:[%s7008_s3 + $0x58] sm:$0xff] }
 0x616   :  { %2530 = vmatpush1.msra.mxu0 %v6719_v38  ;;  %7899 = vst [vmem:[#allocation32_spill] sm:$0xff] %v6725_v3  ;;  %2601 = vmatpush1.msra.mxu1 %v6725_v3  ;;  %7900 = vst [vmem:[#allocation46_spill] sm:$0xff] %v6731_v46  ;;  %v6743_v38 = vld [vmem:[%s7008_s3 + $0x40] sm:$0xff]  ;;  %v6749_v3 = vld [vmem:[%s7008_s3 + $0x50] sm:$0xff] }
 0x617   :  { %2531 = vmatprep.subr.mxu0 %v6731_v46  ;;  %7901 = vst [vmem:[#allocation34_spill] sm:$0xff] %v6737_v61  ;;  %2602 = vmatprep.subr.mxu1 %v6737_v61  ;;  %7902 = vst [vmem:[#allocation48_spill] sm:$0xff] %v6743_v38  ;;  %v3377_v46 = vpop.eup %3376  ;;  %v6755_v29 = vld [vmem:[%s7008_s3 + $0x28] sm:$0xff]  ;;  %v6761_v61 = vld [vmem:[%s7008_s3 + $0x38] sm:$0xff] }
 0x618   :  { %2532 = vmatpush1.msra.mxu0 %v6743_v38  ;;  %7903 = vst [vmem:[#allocation36_spill] sm:$0xff] %v6749_v3  ;;  %2603 = vmatpush1.msra.mxu1 %v6749_v3  ;;  %7904 = vst [vmem:[#allocation50_spill] sm:$0xff] %v6755_v29  ;;  %v6767_v3 = vld [vmem:[%s7008_s3 + $0x20] sm:$0xff] }
 0x619   :  { %2533 = vmatprep.subr.mxu0 %v6755_v29  ;;  %7905 = vst [vmem:[#allocation38_spill] sm:$0xff] %v6761_v61  ;;  %2604 = vmatprep.subr.mxu1 %v6761_v61  ;;  %7906 = vst [vmem:[#allocation52_spill] sm:$0xff] %v6767_v3  ;;  %v6779_v29 = vld [vmem:[%s7008_s3 + $0x8] sm:$0xff]  ;;  %v6785_v61 = vld [vmem:[%s7008_s3 + $0x18] sm:$0xff] }
 0x61a   :  { %v3379_v38 = vpop.eup %3378  ;;  %2534 = vmatpush1.msra.mxu0 %v6767_v3  ;;  %2605 = vmatpush1.msra.mxu1 %v6773_v12  ;;  %7907 = vst [vmem:[#allocation39_spill] sm:$0xff] %v6779_v29 }
 0x61b   :  { %2535 = vmatprep.subr.mxu0 %v6779_v29  ;;  %2606 = vmatprep.subr.mxu1 %v6785_v61  ;;  %v2320_v3 = vmul.f32 %v3379_v38, %v3377_v46  ;;  %v6798_v29 = vld [vmem:[%s7008_s3 + $0x10] sm:$0xff] }
 0x61c   :  { %2536 = vmatpush1.msra.mxu0 %v6791_v54  ;;  %2569 = vmatprep.mubr.f32.mxu0 %v7418_v56 }
 0x61d   :  { %2607 = vmatpush1.msra.mxu1 %v6798_v29  ;;  %2640 = vmatprep.mubr.f32.mxu1 %v7418_v56  ;;  %3159 = vst [vmem:[%s7012_s5 + $0x10] sm:$0xff] %v2320_v3 }
 0x61e   :  { %2570 = vmatmul.mubr.f32.vlgmr.msra.gmra.mxu0 %v2320_v3  ;;  %2641 = vmatmul.mubr.f32.vlgmr.msra.gmra.mxu1 %v2320_v3  ;;  %v3169_v3 = vld [vmem:[%s7010_s1 + $0x28] sm:$0xff] }
 0x61f   :  { %2682 = vmatprep.subr.mxu0 %v5998_v44  ;;  %2753 = vmatprep.subr.mxu1 %v6004_v31  ;;  %v7908_v44 = vld [vmem:[#allocation88_spill] sm:$0xff]  ;;  %v7909_v31 = vld [vmem:[#allocation29_spill] sm:$0xff] }
 0x620   :  { %2683 = vmatpush1.msra.mxu0 %v6010_v47  ;;  %2754 = vmatpush1.msra.mxu1 %v6016_v28  ;;  %v7910_v47 = vld [vmem:[#allocation19_spill] sm:$0xff] }
 0x621   :  { %2684 = vmatprep.subr.mxu0 %v6022_v25  ;;  %2755 = vmatprep.subr.mxu1 %v6028_v22  ;;  %v7911_v28 = vld [vmem:[#allocation31_spill] sm:$0xff]  ;;  %v7912_v25 = vld [vmem:[#allocation21_spill] sm:$0xff] }
 0x622   :  { %2685 = vmatpush1.msra.mxu0 %v6034_v20  ;;  %2756 = vmatpush1.msra.mxu1 %v6040_v40  ;;  %v7913_v22 = vld [vmem:[#allocation33_spill] sm:$0xff]  ;;  %v7914_v20 = vld [vmem:[#allocation44_spill] sm:$0xff] }
 0x623   :  { %2686 = vmatprep.subr.mxu0 %v6046_v42  ;;  %2757 = vmatprep.subr.mxu1 %v6052_v19  ;;  %v7915_v40 = vld [vmem:[#allocation77_spill] sm:$0xff]  ;;  %v7916_v42 = vld [vmem:[#allocation79_spill] sm:$0xff] }
 0x624   :  { %2687 = vmatpush1.msra.mxu0 %v6058_v35  ;;  %2758 = vmatpush1.msra.mxu1 %v6064_v39  ;;  %v7917_v19 = vld [vmem:[#allocation81_spill] sm:$0xff]  ;;  %v7918_v35 = vld [vmem:[#allocation83_spill] sm:$0xff]  ;;  %v7919_v39 = vld [vmem:[#allocation68_spill] sm:$0xff] }
 0x625   :  { %2688 = vmatprep.subr.mxu0 %v6070_v0  ;;  %2759 = vmatprep.subr.mxu1 %v6076_v1  ;;  %v7920_v0 = vld [vmem:[#allocation85_spill] sm:$0xff]  ;;  %v7921_v1 = vld [vmem:[#allocation70_spill] sm:$0xff] }
 0x626   :  { %2689 = vmatpush1.msra.mxu0 %v6082_v2  ;;  %2760 = vmatpush1.msra.mxu1 %v6088_v4  ;;  %v7922_v2 = vld [vmem:[#allocation72_spill] sm:$0xff]  ;;  %v7923_v4 = vld [vmem:[#allocation74_spill] sm:$0xff] }
 0x627   :  { %2690 = vmatprep.subr.mxu0 %v6094_v5  ;;  %2761 = vmatprep.subr.mxu1 %v6100_v36  ;;  %v7924_v5 = vld [vmem:[#allocation45_spill] sm:$0xff]  ;;  %v7925_v36 = vld [vmem:[#allocation47_spill] sm:$0xff] }
 0x628   :  { %2691 = vmatpush1.msra.mxu0 %v6106_v58  ;;  %2762 = vmatpush1.msra.mxu1 %v6112_v37  ;;  %v7926_v58 = vld [vmem:[#allocation62_spill] sm:$0xff]  ;;  %v7927_v37 = vld [vmem:[#allocation49_spill] sm:$0xff] }
 0x629   :  { %2692 = vmatprep.subr.mxu0 %v6118_v43  ;;  %2763 = vmatprep.subr.mxu1 %v6124_v45  ;;  %v7928_v43 = vld [vmem:[#allocation51_spill] sm:$0xff] }
 0x62a   :  { %2693 = vmatpush1.msra.mxu0 %v6130_v32  ;;  %2764 = vmatpush1.msra.mxu1 %v6136_v41  ;;  %v7929_v45 = vld [vmem:[#allocation55_spill] sm:$0xff] }
 0x62b   :  { %2694 = vmatprep.subr.mxu0 %v6142_v26  ;;  %2765 = vmatprep.subr.mxu1 %v6148_v24  ;;  %v3160_v32 = vld [vmem:[%s7009_s0 + $0xc0] sm:$0xff]  ;;  %v3161_v26 = vld [vmem:[%s7009_s0 + $0xc8] sm:$0xff] }
 0x62c   :  { %2695 = vmatpush1.msra.mxu0 %v6154_v50  ;;  %2766 = vmatpush1.msra.mxu1 %v6160_v27 }
 0x62d   :  { %2696 = vmatprep.subr.mxu0 %v6166_v34  ;;  %2767 = vmatprep.subr.mxu1 %v6172_v6 }
 0x62e   :  { %2697 = vmatpush1.msra.mxu0 %v6178_v7  ;;  %2768 = vmatpush1.msra.mxu1 %v6184_v8  ;;  %v3163_v8 = vld [vmem:[%s7009_s0 + $0xd8] sm:$0xff] }
 0x62f   :  { %2698 = vmatprep.subr.mxu0 %v6190_v9  ;;  %2769 = vmatprep.subr.mxu1 %v6196_v10 }
 0x630   :  { %2699 = vmatpush1.msra.mxu0 %v6202_v11  ;;  %2770 = vmatpush1.msra.mxu1 %v6208_v13  ;;  %v3162_v11 = vld [vmem:[%s7009_s0 + $0xd0] sm:$0xff] }
 0x631   :  { %2700 = vmatprep.subr.mxu0 %v6214_v14  ;;  %2771 = vmatprep.subr.mxu1 %v6220_v15 }
 0x632   :  { %2701 = vmatpush1.msra.mxu0 %v6226_v53  ;;  %2772 = vmatpush1.msra.mxu1 %v6232_v52 }
 0x633   :  { %2702 = vmatprep.subr.mxu0 %v6238_v33  ;;  %2773 = vmatprep.subr.mxu1 %v6244_v30  ;;  %v3168_v30 = vld [vmem:[%s7010_s1 + $0x20] sm:$0xff] }
 0x634   :  { %2703 = vmatpush1.msra.mxu0 %v6250_v16  ;;  %2774 = vmatpush1.msra.mxu1 %v6256_v17 }
 0x635   :  { %2704 = vmatprep.subr.mxu0 %v7908_v44  ;;  %2775 = vmatprep.subr.mxu1 %v7909_v31 }
 0x636   :  { %2705 = vmatpush1.msra.mxu0 %v7910_v47  ;;  %2776 = vmatpush1.msra.mxu1 %v7911_v28 }
 0x637   :  { %2706 = vmatprep.subr.mxu0 %v7912_v25  ;;  %2777 = vmatprep.subr.mxu1 %v7913_v22 }
 0x638   :  { %2707 = vmatpush1.msra.mxu0 %v7914_v20  ;;  %2778 = vmatpush1.msra.mxu1 %v7915_v40 }
 0x639   :  { %2708 = vmatprep.subr.mxu0 %v7916_v42  ;;  %2779 = vmatprep.subr.mxu1 %v7917_v19 }
 0x63a   :  { %2709 = vmatpush1.msra.mxu0 %v7918_v35  ;;  %2780 = vmatpush1.msra.mxu1 %v7919_v39  ;;  %v3171_v39 = vld [vmem:[%s7010_s1 + $0x38] sm:$0xff] }
 0x63b   :  { %2710 = vmatprep.subr.mxu0 %v7920_v0  ;;  %2781 = vmatprep.subr.mxu1 %v7921_v1 }
 0x63c   :  { %2711 = vmatpush1.msra.mxu0 %v7922_v2  ;;  %2782 = vmatpush1.msra.mxu1 %v7923_v4 }
 0x63d   :  { %2712 = vmatprep.subr.mxu0 %v7924_v5  ;;  %2783 = vmatprep.subr.mxu1 %v7925_v36 }
 0x63e   :  { %2713 = vmatpush1.msra.mxu0 %v7926_v58  ;;  %2746 = vmatprep.mubr.f32.mxu0 %v7418_v56 }
 0x63f   :  { %2784 = vmatpush1.msra.mxu1 %v7927_v37  ;;  %2817 = vmatprep.mubr.f32.mxu1 %v7418_v56 }
 0x640   :  { %2858 = vmatprep.subr.mxu0 %v7928_v43  ;;  %2929 = vmatprep.subr.mxu1 %v7929_v45 }
 0x6bd   :  { %v2394_v41 = vpop.f32.mrf.mxu0  ;;  %v2465_v6 = vpop.f32.mrf.mxu1 }
 0x6be   :  { %v2470_v24 = vadd.f32 %v3160_v32, %v2394_v41  ;;  %v2472_v15 = vadd.f32 %v3162_v11, %v2465_v6  ;;  %v7930_v41 = vld [vmem:[#allocation57_spill] sm:$0xff] }
 0x6bf   :  { %v2396_v50 = vpop.f32.mrf.mxu0  ;;  %v2467_v9 = vpop.f32.mrf.mxu1 }
 0x6c0   :  { %v3164_v27 = vmul.f32 -1.442695, %v2470_v24  ;;  %v2471_v34 = vadd.f32 %v3161_v26, %v2396_v50  ;;  %v2473_v10 = vadd.f32 %v3163_v8, %v2467_v9  ;;  %v7931_v26 = vld [vmem:[#allocation59_spill] sm:$0xff]  ;;  %v7933_v50 = vld [vmem:[#allocation86_spill] sm:$0xff] }
 0x6c1   :  { %v7932_v24 = vld [vmem:[#allocation67_spill] sm:$0xff] }
 0x6c2   :  { %3380 = vpow2.f32 %v3164_v27  ;;  %v3165_v7 = vmul.f32 -1.442695, %v2471_v34  ;;  %v3166_v13 = vmul.f32 -1.442695, %v2473_v10  ;;  %v7939_v27 = vld [vmem:[#allocation84_spill] sm:$0xff]  ;;  %v7942_v10 = vld [vmem:[#allocation10_spill] sm:$0xff] }
 0x6c3   :  { %v7940_v34 = vld [vmem:[#allocation8_spill] sm:$0xff] }
 0x6c4   :  { %3382 = vpow2.f32 %v3165_v7  ;;  %v7941_v7 = vld [vmem:[#allocation3_spill] sm:$0xff] }
 0x6c5   :  { %3384 = vpow2.f32 %v3166_v13 }
 0x6cf   :  { %v3381_v14 = vpop.eup %3380 }
 0x6d0   :  { %v2477_v53 = vadd.f32 1.0, %v3381_v14  ;;  %v7943_v14 = vld [vmem:[#allocation4_spill] sm:$0xff] }
 0x6d1   :  { %v3383_v52 = vpop.eup %3382 }
 0x6d2   :  { %3386 = vrcp.f32 %v2477_v53  ;;  %v2483_v33 = vadd.f32 1.0, %v3383_v52  ;;  %v3385_v16 = vpop.eup %3384  ;;  %v7945_v53 = vld [vmem:[#allocation5_spill] sm:$0xff] }
 0x6d3   :  { %3388 = vtanh.f32 %v2472_v15  ;;  %v2490_v40 = vadd.f32 1.0, %v3385_v16  ;;  %v7944_v15 = vld [vmem:[#allocation12_spill] sm:$0xff] }
 0x6d4   :  { %3390 = vrcp.f32 %v2483_v33  ;;  %v7947_v33 = vld [vmem:[#allocation6_spill] sm:$0xff]  ;;  %v7952_v16 = vld [vmem:[#allocation20_spill] sm:$0xff] }
 0x6de   :  { %v2571_v17 = vpop.f32.mrf.mxu0  ;;  %v2642_v42 = vpop.f32.mrf.mxu1 }
 0x6df   :  { %v3387_v38 = vpop.eup %3386  ;;  %v2647_v46 = vadd.f32 %v3168_v30, %v2571_v17  ;;  %v7948_v30 = vld [vmem:[#allocation16_spill] sm:$0xff]  ;;  %v7953_v17 = vld [vmem:[#allocation11_spill] sm:$0xff] }
 0x6e0   :  { %v3389_v44 = vpop.eup %3388  ;;  %v2573_v31 = vpop.f32.mrf.mxu0 }
 0x6e1   :  { %v3391_v47 = vpop.eup %3390  ;;  %v3172_v28 = vmul.f32 -1.442695, %v2647_v46  ;;  %v2648_v25 = vadd.f32 %v3169_v3, %v2573_v31  ;;  %v2494_v22 = vmul.f32 %v3389_v44, %v3387_v38  ;;  %v2644_v0 = vpop.f32.mrf.mxu1  ;;  %v7954_v3 = vld [vmem:[#allocation22_spill] sm:$0xff]  ;;  %v7955_v38 = vld [vmem:[#allocation13_spill] sm:$0xff]  ;;  %v7956_v46 = vld [vmem:[#allocation24_spill] sm:$0xff] }
 0x6e2   :  { %v2493_v20 = vmul.f32 %v3391_v47, %v6412_v23  ;;  %v2650_v1 = vadd.f32 %v3171_v39, %v2644_v0  ;;  %v3170_v23 = vld [vmem:[%s7010_s1 + $0x30] sm:$0xff]  ;;  %v7957_v44 = vld [vmem:[#allocation15_spill] sm:$0xff]  ;;  %v7967_v39 = vld [vmem:[#allocation42_spill] sm:$0xff] }
 0x6e3   :  { %3392 = vpow2.f32 %v3172_v28  ;;  %v3173_v19 = vmul.f32 -1.442695, %v2648_v25  ;;  %v2649_v5 = vadd.f32 %v3170_v23, %v2642_v42  ;;  %v7958_v31 = vld [vmem:[#allocation27_spill] sm:$0xff]  ;;  %v7959_v47 = vld [vmem:[#allocation17_spill] sm:$0xff]  ;;  %v7965_v42 = vld [vmem:[#allocation40_spill] sm:$0xff] }
 0x6e4   :  { %v6892_v35 = vadd.f32 %v2494_v22, %v2493_v20  ;;  %v3174_v2 = vmul.f32 -1.442695, %v2650_v1  ;;  %v7960_v28 = vld [vmem:[#allocation23_spill] sm:$0xff]  ;;  %v7962_v22 = vld [vmem:[#allocation25_spill] sm:$0xff]  ;;  %v7968_v0 = vld [vmem:[#allocation30_spill] sm:$0xff] }
 0x6e5   :  { %3394 = vpow2.f32 %v3173_v19  ;;  %v7961_v25 = vld [vmem:[#allocation35_spill] sm:$0xff]  ;;  %v7963_v20 = vld [vmem:[#allocation37_spill] sm:$0xff]  ;;  %v7966_v19 = vld [vmem:[#allocation28_spill] sm:$0xff] }
 0x6e6   :  { %3396 = vrcp.f32 %v2490_v40  ;;  %v7964_v40 = vld [vmem:[#allocation26_spill] sm:$0xff]  ;;  %v7969_v1 = vld [vmem:[#allocation32_spill] sm:$0xff] }
 0x6e7   :  { %3398 = vtanh.f32 %v6892_v35  ;;  %v7970_v23 = vld [vmem:[#allocation46_spill] sm:$0xff] }
 0x6e8   :  { %3400 = vpow2.f32 %v3174_v2  ;;  %v7971_v2 = vld [vmem:[#allocation34_spill] sm:$0xff] }
 0x6f0   :  { %v3393_v4 = vpop.eup %3392 }
 0x6f1   :  { %v2654_v36 = vadd.f32 1.0, %v3393_v4  ;;  %v7972_v4 = vld [vmem:[#allocation48_spill] sm:$0xff] }
 0x6f2   :  { %v3395_v58 = vpop.eup %3394 }
 0x6f3   :  { %v3397_v37 = vpop.eup %3396  ;;  %3402 = vrcp.f32 %v2654_v36  ;;  %v2660_v43 = vadd.f32 1.0, %v3395_v58  ;;  %v7974_v58 = vld [vmem:[#allocation50_spill] sm:$0xff] }
 0x6f4   :  { %v3399_v45 = vpop.eup %3398  ;;  %3404 = vtanh.f32 %v2649_v5  ;;  %v7973_v5 = vld [vmem:[#allocation36_spill] sm:$0xff] }
 0x6f5   :  { %3406 = vrcp.f32 %v2660_v43  ;;  %v2497_v32 = vmul.f32 %v3399_v45, %v3397_v37  ;;  %v7975_v37 = vld [vmem:[#allocation38_spill] sm:$0xff]  ;;  %v7976_v45 = vld [vmem:[#allocation52_spill] sm:$0xff] }
 0x6f7   :  { %3167 = vst [vmem:[%s7011_s4 + $0x30] sm:$0xff] %v2497_v32  ;;  %2747 = vmatmul.mubr.f32.vlgmr.msra.gmra.mxu0 %v2497_v32  ;;  %2818 = vmatmul.mubr.f32.vlgmr.msra.gmra.mxu1 %v2497_v32  ;;  %v7977_v32 = vld [vmem:[#allocation39_spill] sm:$0xff] }
 0x6f8   :  { %2859 = vmatpush1.msra.mxu0 %v6427_v49  ;;  %2930 = vmatpush1.msra.mxu1 %v6433_v48  ;;  %v7934_v49 = vld [vmem:[#allocation87_spill] sm:$0xff]  ;;  %v7935_v48 = vld [vmem:[#allocation76_spill] sm:$0xff] }
 0x6f9   :  { %2860 = vmatprep.subr.mxu0 %v6439_v18  ;;  %2931 = vmatprep.subr.mxu1 %v6445_v63  ;;  %v7936_v18 = vld [vmem:[#allocation78_spill] sm:$0xff]  ;;  %v3401_v63 = vpop.eup %3400 }
 0x6fa   :  { %2861 = vmatpush1.msra.mxu0 %v6451_v60  ;;  %2932 = vmatpush1.msra.mxu1 %v6457_v59  ;;  %v7937_v60 = vld [vmem:[#allocation80_spill] sm:$0xff]  ;;  %v7938_v59 = vld [vmem:[#allocation82_spill] sm:$0xff]  ;;  %v2667_v9 = vadd.f32 1.0, %v3401_v63 }
 0x6fb   :  { %2862 = vmatprep.subr.mxu0 %v6463_v51  ;;  %2933 = vmatprep.subr.mxu1 %v7930_v41 }
 0x6fc   :  { %2863 = vmatpush1.msra.mxu0 %v7931_v26  ;;  %2934 = vmatpush1.msra.mxu1 %v7932_v24  ;;  %3408 = vrcp.f32 %v2667_v9 }
 0x6fd   :  { %2864 = vmatprep.subr.mxu0 %v7933_v50  ;;  %2935 = vmatprep.subr.mxu1 %v7934_v49 }
 0x6fe   :  { %2865 = vmatpush1.msra.mxu0 %v7935_v48  ;;  %2936 = vmatpush1.msra.mxu1 %v7936_v18  ;;  %v3179_v48 = vld [vmem:[%s7009_s0 + $0xf8] sm:$0xff] }
 0x6ff   :  { %2866 = vmatprep.subr.mxu0 %v7937_v60  ;;  %2937 = vmatprep.subr.mxu1 %v7938_v59  ;;  %v3178_v60 = vld [vmem:[%s7009_s0 + $0xf0] sm:$0xff] }
 0x700   :  { %v3403_v51 = vpop.eup %3402  ;;  %2867 = vmatpush1.msra.mxu0 %v7939_v27  ;;  %2938 = vmatpush1.msra.mxu1 %v7940_v34 }
 0x701   :  { %v3405_v6 = vpop.eup %3404  ;;  %2868 = vmatprep.subr.mxu0 %v7941_v7  ;;  %2939 = vmatprep.subr.mxu1 %v6541_v57  ;;  %v7946_v57 = vld [vmem:[#allocation14_spill] sm:$0xff] }
 0x702   :  { %v3407_v8 = vpop.eup %3406  ;;  %2869 = vmatpush1.msra.mxu0 %v7942_v10  ;;  %2940 = vmatpush1.msra.mxu1 %v6553_v55  ;;  %v2671_v11 = vmul.f32 %v3405_v6, %v3403_v51  ;;  %v7949_v55 = vld [vmem:[#allocation7_spill] sm:$0xff] }
 0x703   :  { %v2670_v13 = vmul.f32 %v3407_v8, %v6581_v21  ;;  %2870 = vmatprep.subr.mxu0 %v6560_v62  ;;  %2941 = vmatprep.subr.mxu1 %v7943_v14  ;;  %v7950_v21 = vld [vmem:[#allocation18_spill] sm:$0xff]  ;;  %v7951_v62 = vld [vmem:[#allocation9_spill] sm:$0xff]  ;;  %v2854_v8 = vld [vmem:[%s7010_s1] sm:$0xff] }
 0x704   :  { %2871 = vmatpush1.msra.mxu0 %v7944_v15  ;;  %2942 = vmatpush1.msra.mxu1 %v7945_v53 }
 0x705   :  { %v6931_v52 = vadd.f32 %v2671_v11, %v2670_v13  ;;  %2872 = vmatprep.subr.mxu0 %v7946_v57  ;;  %2943 = vmatprep.subr.mxu1 %v7947_v33  ;;  %v2855_v11 = vld [vmem:[%s7010_s1 + $0x8] sm:$0xff] }
 0x706   :  { %2873 = vmatpush1.msra.mxu0 %v7948_v30  ;;  %2944 = vmatpush1.msra.mxu1 %v7949_v55 }
 0x707   :  { %2874 = vmatprep.subr.mxu0 %v7950_v21  ;;  %2945 = vmatprep.subr.mxu1 %v7951_v62  ;;  %3410 = vtanh.f32 %v6931_v52 }
 0x708   :  { %2875 = vmatpush1.msra.mxu0 %v7952_v16  ;;  %2946 = vmatpush1.msra.mxu1 %v7953_v17 }
 0x709   :  { %2876 = vmatprep.subr.mxu0 %v7954_v3  ;;  %2947 = vmatprep.subr.mxu1 %v7955_v38  ;;  %v3409_v36 = vpop.eup %3408  ;;  %v2857_v38 = vld [vmem:[%s7010_s1 + $0x18] sm:$0xff] }
 0x70a   :  { %2877 = vmatpush1.msra.mxu0 %v7956_v46  ;;  %2948 = vmatpush1.msra.mxu1 %v7957_v44 }
 0x70b   :  { %2878 = vmatprep.subr.mxu0 %v7958_v31  ;;  %2949 = vmatprep.subr.mxu1 %v7959_v47  ;;  %v2856_v31 = vld [vmem:[%s7010_s1 + $0x10] sm:$0xff] }
 0x70c   :  { %2879 = vmatpush1.msra.mxu0 %v7960_v28  ;;  %2950 = vmatpush1.msra.mxu1 %v7961_v25 }
 0x70d   :  { %2880 = vmatprep.subr.mxu0 %v7962_v22  ;;  %2951 = vmatprep.subr.mxu1 %v7963_v20 }
 0x70e   :  { %2881 = vmatpush1.msra.mxu0 %v7964_v40  ;;  %2952 = vmatpush1.msra.mxu1 %v7965_v42 }
 0x70f   :  { %2882 = vmatprep.subr.mxu0 %v7966_v19  ;;  %2953 = vmatprep.subr.mxu1 %v7967_v39 }
 0x710   :  { %2883 = vmatpush1.msra.mxu0 %v7968_v0  ;;  %2954 = vmatpush1.msra.mxu1 %v7969_v1 }
 0x711   :  { %2884 = vmatprep.subr.mxu0 %v7970_v23  ;;  %2955 = vmatprep.subr.mxu1 %v7971_v2 }
 0x712   :  { %2885 = vmatpush1.msra.mxu0 %v7972_v4  ;;  %2956 = vmatpush1.msra.mxu1 %v7973_v5 }
 0x713   :  { %2886 = vmatprep.subr.mxu0 %v7974_v58  ;;  %2957 = vmatprep.subr.mxu1 %v7975_v37 }
 0x714   :  { %v3411_v43 = vpop.eup %3410  ;;  %2887 = vmatpush1.msra.mxu0 %v7976_v45  ;;  %2958 = vmatpush1.msra.mxu1 %v6773_v12  ;;  %v3176_v12 = vld [vmem:[%s7009_s0 + $0xe0] sm:$0xff] }
 0x715   :  { %2888 = vmatprep.subr.mxu0 %v7977_v32  ;;  %2959 = vmatprep.subr.mxu1 %v6785_v61  ;;  %v2674_v41 = vmul.f32 %v3411_v43, %v3409_v36 }
 0x716   :  { %2889 = vmatpush1.msra.mxu0 %v6791_v54  ;;  %2922 = vmatprep.mubr.f32.mxu0 %v7418_v56  ;;  %v3177_v54 = vld [vmem:[%s7009_s0 + $0xe8] sm:$0xff] }
 0x717   :  { %2960 = vmatpush1.msra.mxu1 %v6798_v29  ;;  %2993 = vmatprep.mubr.f32.mxu1 %v7418_v56  ;;  %3175 = vst [vmem:[%s7012_s5 + $0x8] sm:$0xff] %v2674_v41 }
 0x718   :  { %2923 = vmatmul.mubr.f32.vlgmr.msra.gmra.mxu0 %v2674_v41  ;;  %2994 = vmatmul.mubr.f32.vlgmr.msra.gmra.mxu1 %v2674_v41 }
 0x7b7   :  { %v2748_v61 = vpop.f32.mrf.mxu0  ;;  %v2819_v56 = vpop.f32.mrf.mxu1 }
 0x7b8   :  { %v2824_v26 = vadd.f32 %v3176_v12, %v2748_v61  ;;  %v2826_v27 = vadd.f32 %v3178_v60, %v2819_v56 }
 0x7b9   :  { %v2750_v24 = vpop.f32.mrf.mxu0  ;;  %v2821_v18 = vpop.f32.mrf.mxu1 }
 0x7ba   :  { %v3180_v29 = vmul.f32 -1.442695, %v2824_v26  ;;  %v2825_v50 = vadd.f32 %v3177_v54, %v2750_v24  ;;  %v2827_v63 = vadd.f32 %v3179_v48, %v2821_v18 }
 0x7bc   :  { %3412 = vpow2.f32 %v3180_v29  ;;  %v3181_v49 = vmul.f32 -1.442695, %v2825_v50  ;;  %v3182_v59 = vmul.f32 -1.442695, %v2827_v63 }
 0x7be   :  { %3414 = vpow2.f32 %v3181_v49 }
 0x7bf   :  { %3416 = vpow2.f32 %v3182_v59 }
 0x7c9   :  { %v3413_v51 = vpop.eup %3412 }
 0x7ca   :  { %v2831_v34 = vadd.f32 1.0, %v3413_v51 }
 0x7cb   :  { %v3415_v6 = vpop.eup %3414 }
 0x7cc   :  { %3418 = vrcp.f32 %v2831_v34  ;;  %v2837_v7 = vadd.f32 1.0, %v3415_v6  ;;  %v3417_v9 = vpop.eup %3416 }
 0x7cd   :  { %3420 = vtanh.f32 %v2826_v27  ;;  %v2844_v53 = vadd.f32 1.0, %v3417_v9 }
 0x7ce   :  { %3422 = vrcp.f32 %v2837_v7 }
 0x7d8   :  { %v2924_v10 = vpop.f32.mrf.mxu0  ;;  %v2995_v16 = vpop.f32.mrf.mxu1 }
 0x7d9   :  { %v3419_v13 = vpop.eup %3418  ;;  %v3000_v14 = vadd.f32 %v2924_v10, %v2854_v8 }
 0x7da   :  { %v3421_v15 = vpop.eup %3420  ;;  %v2926_v57 = vpop.f32.mrf.mxu0 }
 0x7db   :  { %v3423_v33 = vpop.eup %3422  ;;  %v3184_v30 = vmul.f32 -1.442695, %v3000_v14  ;;  %v3001_v55 = vadd.f32 %v2926_v57, %v2855_v11  ;;  %v2848_v21 = vmul.f32 %v3421_v15, %v3419_v13  ;;  %v2997_v46 = vpop.f32.mrf.mxu1 }
 0x7dc   :  { %v2847_v62 = vmul.f32 %v3423_v33, %v6892_v35  ;;  %v3003_v44 = vadd.f32 %v2997_v46, %v2857_v38  ;;  %v3002_v35 = vadd.f32 %v2995_v16, %v2856_v31 }
 0x7dd   :  { %3424 = vpow2.f32 %v3184_v30  ;;  %v3185_v17 = vmul.f32 -1.442695, %v3001_v55 }
 0x7de   :  { %v2849_v3 = vadd.f32 %v2848_v21, %v2847_v62  ;;  %3426 = vrcp.f32 %v2844_v53  ;;  %v3186_v47 = vmul.f32 -1.442695, %v3003_v44 }
 0x7df   :  { %3428 = vpow2.f32 %v3185_v17 }
 0x7e0   :  { %3430 = vtanh.f32 %v2849_v3 }
 0x7e1   :  { %3432 = vpow2.f32 %v3186_v47 }
 0x7ea   :  { %v3425_v28 = vpop.eup %3424 }
 0x7eb   :  { %v3427_v25 = vpop.eup %3426  ;;  %v3007_v22 = vadd.f32 1.0, %v3425_v28 }
 0x7ec   :  { %v3429_v20 = vpop.eup %3428 }
 0x7ed   :  { %v3431_v40 = vpop.eup %3430  ;;  %3434 = vrcp.f32 %v3007_v22  ;;  %v3013_v42 = vadd.f32 1.0, %v3429_v20 }
 0x7ee   :  { %v2851_v19 = vmul.f32 %v3431_v40, %v3427_v25  ;;  %3436 = vtanh.f32 %v3002_v35  ;;  %v3433_v39 = vpop.eup %3432 }
 0x7ef   :  { %3438 = vrcp.f32 %v3013_v42  ;;  %v3020_v2 = vadd.f32 1.0, %v3433_v39 }
 0x7f0   :  { %3183 = vst [vmem:[%s7011_s4 + $0x38] sm:$0xff] %v2851_v19 }
 0x7f1   :  { %3440 = vrcp.f32 %v3020_v2 }
 0x7fa   :  { %v3435_v0 = vpop.eup %3434 }
 0x7fb   :  { %v3437_v1 = vpop.eup %3436 }
 0x7fc   :  { %v3439_v23 = vpop.eup %3438  ;;  %v3024_v4 = vmul.f32 %v3437_v1, %v3435_v0 }
 0x7fd   :  { %v3023_v5 = vmul.f32 %v3439_v23, %v6931_v52 }
 0x7fe   :  { %v3441_v58 = vpop.eup %3440 }
 0x7ff   :  { %v3025_v36 = vadd.f32 %v3024_v4, %v3023_v5 }
 0x801   :  { %3442 = vtanh.f32 %v3025_v36 }
 0x80e   :  { %v3443_v37 = vpop.eup %3442 }
 0x80f   :  { %v3027_v43 = vmul.f32 %v3443_v37, %v3441_v58 }
 0x811   :  { %3028 = vst [vmem:[%s7012_s5] sm:$0xff] %v3027_v43 }

</bundles_post_ra>
